<compile_context>
chip_gen: v7x
topology: tpu7x:2x2x1
jax: 0.10.0
libtpu: 0.0.40
codegen_flags: <defaults>
</compile_context>

<pallas_src>
import jax
import jax.numpy as jnp
from jax import lax
from jax.experimental import pallas as pl
from jax.experimental.pallas import tpu as pltpu


# ---------------------------------------------------------------------------
# Fused kernel: one batch element per grid step, everything stays in VMEM.
# ---------------------------------------------------------------------------
def fused_comparison_kernel(x1_ref, x2_ref,
                            w1a_ref, w1b_ref, b1_ref,
                            w2_ref, b2_ref,
                            w3_ref, b3_ref,
                            o_ref,
                            pad_a, pad_b):
    """
    x1_ref/x2_ref : (1, H, W, Cin)  NHWC input tiles
    w1a/w1b       : (Cin, C)        1x1 projection, split per input (fused cat)
    w2, w3        : (3, 3, C, C)    HWIO 3x3 weights
    b1, b2, b3    : (1, C)
    o_ref         : (1, H, W, C)
    pad_a, pad_b  : (H+2, W+2, C)   VMEM scratch with zero halo border
    """
    _, H, W, _ = o_ref.shape

    # Zero the halo scratch. Re-done every grid step so the kernel stays
    # correct when the parallel batch axis is sharded across TensorCores
    # (each core has its own scratch); interior is fully overwritten below.
    pad_a[...] = jnp.zeros_like(pad_a)
    pad_b[...] = jnp.zeros_like(pad_b)

    # ---- Stage 1: concat + 1x1 conv + bias + relu (concat folded into 2 dots)
    dn1 = (((3,), (0,)), ((), ()))
    y = lax.dot_general(x1_ref[...], w1a_ref[...], dn1,
                        preferred_element_type=jnp.float32)
    y = y + lax.dot_general(x2_ref[...], w1b_ref[...], dn1,
                            preferred_element_type=jnp.float32)
    y = jnp.maximum(y + b1_ref[...], 0.0)
    pad_a[1:H + 1, 1:W + 1, :] = y[0]

    # ---- 3x3 conv + bias + relu on a zero-padded VMEM buffer.
    # 9 shifted MXU contractions over the channel (lane) axis; accumulator is
    # seeded by the first tap, bias/relu applied once at the end.
    def conv3x3_relu(pad_ref, w_ref, b_ref):
        dn3 = (((2,), (0,)), ((), ()))
        acc = None
        for dy in range(3):
            for dx in range(3):
                tap = lax.dot_general(pad_ref[dy:dy + H, dx:dx + W, :],
                                      w_ref[dy, dx], dn3,
                                      preferred_element_type=jnp.float32)
                acc = tap if acc is None else acc + tap
        return jnp.maximum(acc + b_ref[...], 0.0)

    # ---- Stage 2: conv1 + relu -> stays in VMEM (interior of pad_b).
    pad_b[1:H + 1, 1:W + 1, :] = conv3x3_relu(pad_a, w2_ref, b2_ref)

    # ---- Stage 3: conv2 + relu -> final output tile.
    o_ref[0] = conv3x3_relu(pad_b, w3_ref, b3_ref).astype(o_ref.dtype)


# ---------------------------------------------------------------------------
# Wrapper (PyTorch-style NCHW in / NCHW out)
# ---------------------------------------------------------------------------
@jax.jit
def comparison_module_forward(in1_nchw, in2_nchw, params):
    # NCHW -> NHWC (channels on the lane axis).
    in1 = jnp.transpose(in1_nchw, (0, 2, 3, 1))
    in2 = jnp.transpose(in2_nchw, (0, 2, 3, 1))
    N, H, W, Cin = in1.shape
    C = params["w_proj"].shape[1]

    # Fold the channel concat into the 1x1 projection: split weight per input.
    w1a = params["w_proj"][:Cin]          # applied to in1
    w1b = params["w_proj"][Cin:]          # applied to in2
    b1 = params["b_proj"].reshape(1, C)
    b2 = params["b_conv1"].reshape(1, C)
    b3 = params["b_conv2"].reshape(1, C)

    out_nhwc = pl.pallas_call(
        fused_comparison_kernel,
        out_shape=jax.ShapeDtypeStruct((N, H, W, C), in1.dtype),
        grid_spec=pltpu.PrefetchScalarGridSpec(
            num_scalar_prefetch=0,
            grid=(N,),                                    # one image per step
            in_specs=[
                pl.BlockSpec((1, H, W, Cin), lambda b: (b, 0, 0, 0)),   # in1
                pl.BlockSpec((1, H, W, Cin), lambda b: (b, 0, 0, 0)),   # in2
                pl.BlockSpec((Cin, C), lambda b: (0, 0)),               # w1a
                pl.BlockSpec((Cin, C), lambda b: (0, 0)),               # w1b
                pl.BlockSpec((1, C), lambda b: (0, 0)),                 # b1
                pl.BlockSpec((3, 3, C, C), lambda b: (0, 0, 0, 0)),     # w2
                pl.BlockSpec((1, C), lambda b: (0, 0)),                 # b2
                pl.BlockSpec((3, 3, C, C), lambda b: (0, 0, 0, 0)),     # w3
                pl.BlockSpec((1, C), lambda b: (0, 0)),                 # b3
            ],
            out_specs=pl.BlockSpec((1, H, W, C), lambda b: (b, 0, 0, 0)),
            scratch_shapes=[
                pltpu.VMEM((H + 2, W + 2, C), jnp.float32),   # stage-1 output
                pltpu.VMEM((H + 2, W + 2, C), jnp.float32),   # stage-2 output
            ],
        ),
        compiler_params=pltpu.CompilerParams(
            dimension_semantics=("parallel",)),
    )(in1, in2, w1a, w1b, b1,
      params["w_conv1"], b2, params["w_conv2"], b3)

    # NHWC -> NCHW to match the PyTorch module's output layout.
    return jnp.transpose(out_nhwc, (0, 3, 1, 2))


# ---------------------------------------------------------------------------
# Deterministic parameter init (synthetic weights, PyTorch-like scales)
# ---------------------------------------------------------------------------
def init_params(key, dim):
    ks = jax.random.split(key, 6)
    # projection: Conv2d(2*dim, dim, 1x1). Stored as (Cin=2*dim, Cout=dim).
    fan_in_proj = 2 * dim
    w_proj = jax.random.normal(ks[0], (2 * dim, dim), jnp.float32) / jnp.sqrt(fan_in_proj)
    b_proj = jax.random.normal(ks[1], (dim,), jnp.float32) * 0.01
    # conv1/conv2: Conv2d(dim, dim, 3x3), kaiming normal: std = sqrt(2 / fan_in).
    fan_in_3x3 = dim * 3 * 3
    std = jnp.sqrt(2.0 / fan_in_3x3)
    w_conv1 = jax.random.normal(ks[2], (3, 3, dim, dim), jnp.float32) * std
    b_conv1 = jax.random.normal(ks[3], (dim,), jnp.float32) * 0.01
    w_conv2 = jax.random.normal(ks[4], (3, 3, dim, dim), jnp.float32) * std
    b_conv2 = jax.random.normal(ks[5], (dim,), jnp.float32) * 0.01
    return dict(w_proj=w_proj, b_proj=b_proj,
                w_conv1=w_conv1, b_conv1=b_conv1,
                w_conv2=w_conv2, b_conv2=b_conv2)


# ---------------------------------------------------------------------------
# Pure-JAX reference (lax.conv) for a correctness sanity check
# ---------------------------------------------------------------------------
def reference_forward(in1_nchw, in2_nchw, params):
    x = jnp.concatenate([in1_nchw, in2_nchw], axis=1)  # NCHW concat

    def conv(x, w_hwio, b, pad):
        w_oihw = jnp.transpose(w_hwio, (3, 2, 0, 1))
        y = lax.conv_general_dilated(
            x, w_oihw, window_strides=(1, 1), padding=pad,
            dimension_numbers=("NCHW", "OIHW", "NCHW"))
        return jnp.maximum(y + b[None, :, None, None], 0.0)

    w_proj_hwio = params["w_proj"][None, None, :, :]
    x = conv(x, w_proj_hwio, params["b_proj"], "VALID")
    x = conv(x, params["w_conv1"], params["b_conv1"], "SAME")
    x = conv(x, params["w_conv2"], params["b_conv2"], "SAME")
    return x


if __name__ == "__main__":
    key = jax.random.PRNGKey(0)
    k_in1, k_in2, k_par = jax.random.split(key, 3)

    batch, dim, H, W = 2, 4, 16, 16
    in1 = jax.random.normal(k_in1, (batch, dim, H, W), jnp.float32)
    in2 = jax.random.normal(k_in2, (batch, dim, H, W), jnp.float32)
    params = init_params(k_par, dim)

    out = comparison_module_forward(in1, in2, params)
    out = jax.block_until_ready(out)

    ref = jax.block_until_ready(reference_forward(in1, in2, params))
    assert out.shape == (batch, dim, H, W)
    assert jnp.allclose(out, ref, atol=1e-4, rtol=1e-4), "mismatch vs reference"

    print("KERNEL_OK")
</pallas_src>

<mosaic_0001>
module attributes {stable_mosaic.version = 11 : i64} {
  func.func @fused_comparison_kernel(%arg0: i32, %arg1: memref<1x16x16x4xf32, #tpu.memory_space<vmem>>, %arg2: memref<1x16x16x4xf32, #tpu.memory_space<vmem>>, %arg3: memref<4x4xf32, #tpu.memory_space<vmem>>, %arg4: memref<4x4xf32, #tpu.memory_space<vmem>>, %arg5: memref<1x4xf32, #tpu.memory_space<vmem>>, %arg6: memref<3x3x4x4xf32, #tpu.memory_space<vmem>>, %arg7: memref<1x4xf32, #tpu.memory_space<vmem>>, %arg8: memref<3x3x4x4xf32, #tpu.memory_space<vmem>>, %arg9: memref<1x4xf32, #tpu.memory_space<vmem>>, %arg10: memref<1x16x16x4xf32, #tpu.memory_space<vmem>>, %arg11: memref<18x18x4xf32, #tpu.memory_space<vmem>>, %arg12: memref<18x18x4xf32, #tpu.memory_space<vmem>>) attributes {dimension_semantics = [#tpu.dimension_semantics<parallel>], iteration_bounds = array<i64: 2>, scalar_prefetch = 0 : i64, scratch_operands = 2 : i64, tpu.core_type = #tpu.core_type<tc>, window_params = [{transform_indices = @transform_0, window_bounds = array<i64: 1, 16, 16, 4>}, {transform_indices = @transform_1, window_bounds = array<i64: 1, 16, 16, 4>}, {pipeline_mode = #tpu.pipeline_mode<synchronous>, transform_indices = @transform_2, window_bounds = array<i64: 4, 4>}, {pipeline_mode = #tpu.pipeline_mode<synchronous>, transform_indices = @transform_3, window_bounds = array<i64: 4, 4>}, {pipeline_mode = #tpu.pipeline_mode<synchronous>, transform_indices = @transform_4, window_bounds = array<i64: 1, 4>}, {pipeline_mode = #tpu.pipeline_mode<synchronous>, transform_indices = @transform_5, window_bounds = array<i64: 3, 3, 4, 4>}, {pipeline_mode = #tpu.pipeline_mode<synchronous>, transform_indices = @transform_6, window_bounds = array<i64: 1, 4>}, {pipeline_mode = #tpu.pipeline_mode<synchronous>, transform_indices = @transform_7, window_bounds = array<i64: 3, 3, 4, 4>}, {pipeline_mode = #tpu.pipeline_mode<synchronous>, transform_indices = @transform_8, window_bounds = array<i64: 1, 4>}, {transform_indices = @transform_9, window_bounds = array<i64: 1, 16, 16, 4>}]} {
    %cst = arith.constant 0.000000e+00 : f32
    %0 = vector.broadcast %cst : f32 to vector<18x18x4xf32>
    %c0 = arith.constant 0 : index
    %c0_0 = arith.constant 0 : index
    %c0_1 = arith.constant 0 : index
    %1 = vector.load %arg11[%c0, %c0_0, %c0_1] : memref<18x18x4xf32, #tpu.memory_space<vmem>>, vector<18x18x4xf32>
    tpu.vector_store %arg11[%c0, %c0_0, %c0_1], %0 {strides = array<i32>} : memref<18x18x4xf32, #tpu.memory_space<vmem>>, vector<18x18x4xf32>,
    %cst_2 = arith.constant 0.000000e+00 : f32
    %2 = vector.broadcast %cst_2 : f32 to vector<18x18x4xf32>
    %c0_3 = arith.constant 0 : index
    %c0_4 = arith.constant 0 : index
    %c0_5 = arith.constant 0 : index
    %3 = vector.load %arg12[%c0_3, %c0_4, %c0_5] : memref<18x18x4xf32, #tpu.memory_space<vmem>>, vector<18x18x4xf32>
    tpu.vector_store %arg12[%c0_3, %c0_4, %c0_5], %2 {strides = array<i32>} : memref<18x18x4xf32, #tpu.memory_space<vmem>>, vector<18x18x4xf32>,
    %c0_6 = arith.constant 0 : index
    %c0_7 = arith.constant 0 : index
    %c0_8 = arith.constant 0 : index
    %c0_9 = arith.constant 0 : index
    %4 = vector.load %arg1[%c0_6, %c0_7, %c0_8, %c0_9] : memref<1x16x16x4xf32, #tpu.memory_space<vmem>>, vector<1x16x16x4xf32>
    %c0_10 = arith.constant 0 : index
    %c0_11 = arith.constant 0 : index
    %5 = vector.load %arg3[%c0_10, %c0_11] : memref<4x4xf32, #tpu.memory_space<vmem>>, vector<4x4xf32>
    %cst_12 = arith.constant dense<0.000000e+00> : vector<1x16x16x4xf32>
    %6 = tpu.matmul %4, %5, %cst_12 {dimension_numbers = #tpu.dot_dimension_numbers<[3], [0], [0, 1, 2], [1], [0, 0, 0, 1, 0, 2, 1, 1], [], []>} : vector<1x16x16x4xf32>, vector<4x4xf32>, vector<1x16x16x4xf32> -> vector<1x16x16x4xf32>
    %c0_13 = arith.constant 0 : index
    %c0_14 = arith.constant 0 : index
    %c0_15 = arith.constant 0 : index
    %c0_16 = arith.constant 0 : index
    %7 = vector.load %arg2[%c0_13, %c0_14, %c0_15, %c0_16] : memref<1x16x16x4xf32, #tpu.memory_space<vmem>>, vector<1x16x16x4xf32>
    %c0_17 = arith.constant 0 : index
    %c0_18 = arith.constant 0 : index
    %8 = vector.load %arg4[%c0_17, %c0_18] : memref<4x4xf32, #tpu.memory_space<vmem>>, vector<4x4xf32>
    %cst_19 = arith.constant dense<0.000000e+00> : vector<1x16x16x4xf32>
    %9 = tpu.matmul %7, %8, %cst_19 {dimension_numbers = #tpu.dot_dimension_numbers<[3], [0], [0, 1, 2], [1], [0, 0, 0, 1, 0, 2, 1, 1], [], []>} : vector<1x16x16x4xf32>, vector<4x4xf32>, vector<1x16x16x4xf32> -> vector<1x16x16x4xf32>
    %10 = arith.addf %6, %9 : vector<1x16x16x4xf32>
    %c0_20 = arith.constant 0 : index
    %c0_21 = arith.constant 0 : index
    %11 = vector.load %arg5[%c0_20, %c0_21] : memref<1x4xf32, #tpu.memory_space<vmem>>, vector<1x4xf32>
    %12 = vector.shape_cast %11 : vector<1x4xf32> to vector<1x1x1x4xf32>
    %13 = vector.broadcast %12 : vector<1x1x1x4xf32> to vector<1x16x16x4xf32>
    %14 = arith.addf %10, %13 : vector<1x16x16x4xf32>
    %cst_22 = arith.constant 0.000000e+00 : f32
    %15 = vector.broadcast %cst_22 : f32 to vector<1x16x16x4xf32>
    %16 = arith.maximumf %14, %15 : vector<1x16x16x4xf32>
    %17 = vector.shape_cast %16 : vector<1x16x16x4xf32> to vector<16x16x4xf32>
    %c1 = arith.constant 1 : index
    %c1_23 = arith.constant 1 : index
    %c0_24 = arith.constant 0 : index
    %18 = vector.load %arg11[%c1, %c1_23, %c0_24] : memref<18x18x4xf32, #tpu.memory_space<vmem>>, vector<16x16x4xf32>
    tpu.vector_store %arg11[%c1, %c1_23, %c0_24], %17 {strides = array<i32>} : memref<18x18x4xf32, #tpu.memory_space<vmem>>, vector<16x16x4xf32>,
    %c0_25 = arith.constant 0 : index
    %c0_26 = arith.constant 0 : index
    %c0_27 = arith.constant 0 : index
    %19 = vector.load %arg11[%c0_25, %c0_26, %c0_27] : memref<18x18x4xf32, #tpu.memory_space<vmem>>, vector<16x16x4xf32>
    %c0_28 = arith.constant 0 : index
    %c0_29 = arith.constant 0 : index
    %c0_30 = arith.constant 0 : index
    %c0_31 = arith.constant 0 : index
    %20 = vector.load %arg6[%c0_28, %c0_29, %c0_30, %c0_31] : memref<3x3x4x4xf32, #tpu.memory_space<vmem>>, vector<1x1x4x4xf32>
    %21 = vector.shape_cast %20 : vector<1x1x4x4xf32> to vector<4x4xf32>
    %cst_32 = arith.constant dense<0.000000e+00> : vector<16x16x4xf32>
    %22 = tpu.matmul %19, %21, %cst_32 {dimension_numbers = #tpu.dot_dimension_numbers<[2], [0], [0, 1], [1], [0, 0, 0, 1, 1, 1], [], []>} : vector<16x16x4xf32>, vector<4x4xf32>, vector<16x16x4xf32> -> vector<16x16x4xf32>
    %c0_33 = arith.constant 0 : index
    %c1_34 = arith.constant 1 : index
    %c0_35 = arith.constant 0 : index
    %23 = vector.load %arg11[%c0_33, %c1_34, %c0_35] : memref<18x18x4xf32, #tpu.memory_space<vmem>>, vector<16x16x4xf32>
    %c0_36 = arith.constant 0 : index
    %c1_37 = arith.constant 1 : index
    %c0_38 = arith.constant 0 : index
    %c0_39 = arith.constant 0 : index
    %24 = vector.load %arg6[%c0_36, %c1_37, %c0_38, %c0_39] : memref<3x3x4x4xf32, #tpu.memory_space<vmem>>, vector<1x1x4x4xf32>
    %25 = vector.shape_cast %24 : vector<1x1x4x4xf32> to vector<4x4xf32>
    %cst_40 = arith.constant dense<0.000000e+00> : vector<16x16x4xf32>
    %26 = tpu.matmul %23, %25, %cst_40 {dimension_numbers = #tpu.dot_dimension_numbers<[2], [0], [0, 1], [1], [0, 0, 0, 1, 1, 1], [], []>} : vector<16x16x4xf32>, vector<4x4xf32>, vector<16x16x4xf32> -> vector<16x16x4xf32>
    %27 = arith.addf %22, %26 : vector<16x16x4xf32>
    %c0_41 = arith.constant 0 : index
    %c2 = arith.constant 2 : index
    %c0_42 = arith.constant 0 : index
    %28 = vector.load %arg11[%c0_41, %c2, %c0_42] : memref<18x18x4xf32, #tpu.memory_space<vmem>>, vector<16x16x4xf32>
    %c0_43 = arith.constant 0 : index
    %c2_44 = arith.constant 2 : index
    %c0_45 = arith.constant 0 : index
    %c0_46 = arith.constant 0 : index
    %29 = vector.load %arg6[%c0_43, %c2_44, %c0_45, %c0_46] : memref<3x3x4x4xf32, #tpu.memory_space<vmem>>, vector<1x1x4x4xf32>
    %30 = vector.shape_cast %29 : vector<1x1x4x4xf32> to vector<4x4xf32>
    %cst_47 = arith.constant dense<0.000000e+00> : vector<16x16x4xf32>
    %31 = tpu.matmul %28, %30, %cst_47 {dimension_numbers = #tpu.dot_dimension_numbers<[2], [0], [0, 1], [1], [0, 0, 0, 1, 1, 1], [], []>} : vector<16x16x4xf32>, vector<4x4xf32>, vector<16x16x4xf32> -> vector<16x16x4xf32>
    %32 = arith.addf %27, %31 : vector<16x16x4xf32>
    %c1_48 = arith.constant 1 : index
    %c0_49 = arith.constant 0 : index
    %c0_50 = arith.constant 0 : index
    %33 = vector.load %arg11[%c1_48, %c0_49, %c0_50] : memref<18x18x4xf32, #tpu.memory_space<vmem>>, vector<16x16x4xf32>
    %c1_51 = arith.constant 1 : index
    %c0_52 = arith.constant 0 : index
    %c0_53 = arith.constant 0 : index
    %c0_54 = arith.constant 0 : index
    %34 = vector.load %arg6[%c1_51, %c0_52, %c0_53, %c0_54] : memref<3x3x4x4xf32, #tpu.memory_space<vmem>>, vector<1x1x4x4xf32>
    %35 = vector.shape_cast %34 : vector<1x1x4x4xf32> to vector<4x4xf32>
    %cst_55 = arith.constant dense<0.000000e+00> : vector<16x16x4xf32>
    %36 = tpu.matmul %33, %35, %cst_55 {dimension_numbers = #tpu.dot_dimension_numbers<[2], [0], [0, 1], [1], [0, 0, 0, 1, 1, 1], [], []>} : vector<16x16x4xf32>, vector<4x4xf32>, vector<16x16x4xf32> -> vector<16x16x4xf32>
    %37 = arith.addf %32, %36 : vector<16x16x4xf32>
    %c1_56 = arith.constant 1 : index
    %c1_57 = arith.constant 1 : index
    %c0_58 = arith.constant 0 : index
    %38 = vector.load %arg11[%c1_56, %c1_57, %c0_58] : memref<18x18x4xf32, #tpu.memory_space<vmem>>, vector<16x16x4xf32>
    %c1_59 = arith.constant 1 : index
    %c1_60 = arith.constant 1 : index
    %c0_61 = arith.constant 0 : index
    %c0_62 = arith.constant 0 : index
    %39 = vector.load %arg6[%c1_59, %c1_60, %c0_61, %c0_62] : memref<3x3x4x4xf32, #tpu.memory_space<vmem>>, vector<1x1x4x4xf32>
    %40 = vector.shape_cast %39 : vector<1x1x4x4xf32> to vector<4x4xf32>
    %cst_63 = arith.constant dense<0.000000e+00> : vector<16x16x4xf32>
    %41 = tpu.matmul %38, %40, %cst_63 {dimension_numbers = #tpu.dot_dimension_numbers<[2], [0], [0, 1], [1], [0, 0, 0, 1, 1, 1], [], []>} : vector<16x16x4xf32>, vector<4x4xf32>, vector<16x16x4xf32> -> vector<16x16x4xf32>
    %42 = arith.addf %37, %41 : vector<16x16x4xf32>
    %c1_64 = arith.constant 1 : index
    %c2_65 = arith.constant 2 : index
    %c0_66 = arith.constant 0 : index
    %43 = vector.load %arg11[%c1_64, %c2_65, %c0_66] : memref<18x18x4xf32, #tpu.memory_space<vmem>>, vector<16x16x4xf32>
    %c1_67 = arith.constant 1 : index
    %c2_68 = arith.constant 2 : index
    %c0_69 = arith.constant 0 : index
    %c0_70 = arith.constant 0 : index
    %44 = vector.load %arg6[%c1_67, %c2_68, %c0_69, %c0_70] : memref<3x3x4x4xf32, #tpu.memory_space<vmem>>, vector<1x1x4x4xf32>
    %45 = vector.shape_cast %44 : vector<1x1x4x4xf32> to vector<4x4xf32>
    %cst_71 = arith.constant dense<0.000000e+00> : vector<16x16x4xf32>
    %46 = tpu.matmul %43, %45, %cst_71 {dimension_numbers = #tpu.dot_dimension_numbers<[2], [0], [0, 1], [1], [0, 0, 0, 1, 1, 1], [], []>} : vector<16x16x4xf32>, vector<4x4xf32>, vector<16x16x4xf32> -> vector<16x16x4xf32>
    %47 = arith.addf %42, %46 : vector<16x16x4xf32>
    %c2_72 = arith.constant 2 : index
    %c0_73 = arith.constant 0 : index
    %c0_74 = arith.constant 0 : index
    %48 = vector.load %arg11[%c2_72, %c0_73, %c0_74] : memref<18x18x4xf32, #tpu.memory_space<vmem>>, vector<16x16x4xf32>
    %c2_75 = arith.constant 2 : index
    %c0_76 = arith.constant 0 : index
    %c0_77 = arith.constant 0 : index
    %c0_78 = arith.constant 0 : index
    %49 = vector.load %arg6[%c2_75, %c0_76, %c0_77, %c0_78] : memref<3x3x4x4xf32, #tpu.memory_space<vmem>>, vector<1x1x4x4xf32>
    %50 = vector.shape_cast %49 : vector<1x1x4x4xf32> to vector<4x4xf32>
    %cst_79 = arith.constant dense<0.000000e+00> : vector<16x16x4xf32>
    %51 = tpu.matmul %48, %50, %cst_79 {dimension_numbers = #tpu.dot_dimension_numbers<[2], [0], [0, 1], [1], [0, 0, 0, 1, 1, 1], [], []>} : vector<16x16x4xf32>, vector<4x4xf32>, vector<16x16x4xf32> -> vector<16x16x4xf32>
    %52 = arith.addf %47, %51 : vector<16x16x4xf32>
    %c2_80 = arith.constant 2 : index
    %c1_81 = arith.constant 1 : index
    %c0_82 = arith.constant 0 : index
    %53 = vector.load %arg11[%c2_80, %c1_81, %c0_82] : memref<18x18x4xf32, #tpu.memory_space<vmem>>, vector<16x16x4xf32>
    %c2_83 = arith.constant 2 : index
    %c1_84 = arith.constant 1 : index
    %c0_85 = arith.constant 0 : index
    %c0_86 = arith.constant 0 : index
    %54 = vector.load %arg6[%c2_83, %c1_84, %c0_85, %c0_86] : memref<3x3x4x4xf32, #tpu.memory_space<vmem>>, vector<1x1x4x4xf32>
    %55 = vector.shape_cast %54 : vector<1x1x4x4xf32> to vector<4x4xf32>
    %cst_87 = arith.constant dense<0.000000e+00> : vector<16x16x4xf32>
    %56 = tpu.matmul %53, %55, %cst_87 {dimension_numbers = #tpu.dot_dimension_numbers<[2], [0], [0, 1], [1], [0, 0, 0, 1, 1, 1], [], []>} : vector<16x16x4xf32>, vector<4x4xf32>, vector<16x16x4xf32> -> vector<16x16x4xf32>
    %57 = arith.addf %52, %56 : vector<16x16x4xf32>
    %c2_88 = arith.constant 2 : index
    %c2_89 = arith.constant 2 : index
    %c0_90 = arith.constant 0 : index
    %58 = vector.load %arg11[%c2_88, %c2_89, %c0_90] : memref<18x18x4xf32, #tpu.memory_space<vmem>>, vector<16x16x4xf32>
    %c2_91 = arith.constant 2 : index
    %c2_92 = arith.constant 2 : index
    %c0_93 = arith.constant 0 : index
    %c0_94 = arith.constant 0 : index
    %59 = vector.load %arg6[%c2_91, %c2_92, %c0_93, %c0_94] : memref<3x3x4x4xf32, #tpu.memory_space<vmem>>, vector<1x1x4x4xf32>
    %60 = vector.shape_cast %59 : vector<1x1x4x4xf32> to vector<4x4xf32>
    %cst_95 = arith.constant dense<0.000000e+00> : vector<16x16x4xf32>
    %61 = tpu.matmul %58, %60, %cst_95 {dimension_numbers = #tpu.dot_dimension_numbers<[2], [0], [0, 1], [1], [0, 0, 0, 1, 1, 1], [], []>} : vector<16x16x4xf32>, vector<4x4xf32>, vector<16x16x4xf32> -> vector<16x16x4xf32>
    %62 = arith.addf %57, %61 : vector<16x16x4xf32>
    %c0_96 = arith.constant 0 : index
    %c0_97 = arith.constant 0 : index
    %63 = vector.load %arg7[%c0_96, %c0_97] : memref<1x4xf32, #tpu.memory_space<vmem>>, vector<1x4xf32>
    %64 = vector.shape_cast %63 : vector<1x4xf32> to vector<1x1x4xf32>
    %65 = vector.broadcast %64 : vector<1x1x4xf32> to vector<16x16x4xf32>
    %66 = arith.addf %62, %65 : vector<16x16x4xf32>
    %cst_98 = arith.constant 0.000000e+00 : f32
    %67 = vector.broadcast %cst_98 : f32 to vector<16x16x4xf32>
    %68 = arith.maximumf %66, %67 : vector<16x16x4xf32>
    %c1_99 = arith.constant 1 : index
    %c1_100 = arith.constant 1 : index
    %c0_101 = arith.constant 0 : index
    %69 = vector.load %arg12[%c1_99, %c1_100, %c0_101] : memref<18x18x4xf32, #tpu.memory_space<vmem>>, vector<16x16x4xf32>
    tpu.vector_store %arg12[%c1_99, %c1_100, %c0_101], %68 {strides = array<i32>} : memref<18x18x4xf32, #tpu.memory_space<vmem>>, vector<16x16x4xf32>,
    %c0_102 = arith.constant 0 : index
    %c0_103 = arith.constant 0 : index
    %c0_104 = arith.constant 0 : index
    %70 = vector.load %arg12[%c0_102, %c0_103, %c0_104] : memref<18x18x4xf32, #tpu.memory_space<vmem>>, vector<16x16x4xf32>
    %c0_105 = arith.constant 0 : index
    %c0_106 = arith.constant 0 : index
    %c0_107 = arith.constant 0 : index
    %c0_108 = arith.constant 0 : index
    %71 = vector.load %arg8[%c0_105, %c0_106, %c0_107, %c0_108] : memref<3x3x4x4xf32, #tpu.memory_space<vmem>>, vector<1x1x4x4xf32>
    %72 = vector.shape_cast %71 : vector<1x1x4x4xf32> to vector<4x4xf32>
    %cst_109 = arith.constant dense<0.000000e+00> : vector<16x16x4xf32>
    %73 = tpu.matmul %70, %72, %cst_109 {dimension_numbers = #tpu.dot_dimension_numbers<[2], [0], [0, 1], [1], [0, 0, 0, 1, 1, 1], [], []>} : vector<16x16x4xf32>, vector<4x4xf32>, vector<16x16x4xf32> -> vector<16x16x4xf32>
    %c0_110 = arith.constant 0 : index
    %c1_111 = arith.constant 1 : index
    %c0_112 = arith.constant 0 : index
    %74 = vector.load %arg12[%c0_110, %c1_111, %c0_112] : memref<18x18x4xf32, #tpu.memory_space<vmem>>, vector<16x16x4xf32>
    %c0_113 = arith.constant 0 : index
    %c1_114 = arith.constant 1 : index
    %c0_115 = arith.constant 0 : index
    %c0_116 = arith.constant 0 : index
    %75 = vector.load %arg8[%c0_113, %c1_114, %c0_115, %c0_116] : memref<3x3x4x4xf32, #tpu.memory_space<vmem>>, vector<1x1x4x4xf32>
    %76 = vector.shape_cast %75 : vector<1x1x4x4xf32> to vector<4x4xf32>
    %cst_117 = arith.constant dense<0.000000e+00> : vector<16x16x4xf32>
    %77 = tpu.matmul %74, %76, %cst_117 {dimension_numbers = #tpu.dot_dimension_numbers<[2], [0], [0, 1], [1], [0, 0, 0, 1, 1, 1], [], []>} : vector<16x16x4xf32>, vector<4x4xf32>, vector<16x16x4xf32> -> vector<16x16x4xf32>
    %78 = arith.addf %73, %77 : vector<16x16x4xf32>
    %c0_118 = arith.constant 0 : index
    %c2_119 = arith.constant 2 : index
    %c0_120 = arith.constant 0 : index
    %79 = vector.load %arg12[%c0_118, %c2_119, %c0_120] : memref<18x18x4xf32, #tpu.memory_space<vmem>>, vector<16x16x4xf32>
    %c0_121 = arith.constant 0 : index
    %c2_122 = arith.constant 2 : index
    %c0_123 = arith.constant 0 : index
    %c0_124 = arith.constant 0 : index
    %80 = vector.load %arg8[%c0_121, %c2_122, %c0_123, %c0_124] : memref<3x3x4x4xf32, #tpu.memory_space<vmem>>, vector<1x1x4x4xf32>
    %81 = vector.shape_cast %80 : vector<1x1x4x4xf32> to vector<4x4xf32>
    %cst_125 = arith.constant dense<0.000000e+00> : vector<16x16x4xf32>
    %82 = tpu.matmul %79, %81, %cst_125 {dimension_numbers = #tpu.dot_dimension_numbers<[2], [0], [0, 1], [1], [0, 0, 0, 1, 1, 1], [], []>} : vector<16x16x4xf32>, vector<4x4xf32>, vector<16x16x4xf32> -> vector<16x16x4xf32>
    %83 = arith.addf %78, %82 : vector<16x16x4xf32>
    %c1_126 = arith.constant 1 : index
    %c0_127 = arith.constant 0 : index
    %c0_128 = arith.constant 0 : index
    %84 = vector.load %arg12[%c1_126, %c0_127, %c0_128] : memref<18x18x4xf32, #tpu.memory_space<vmem>>, vector<16x16x4xf32>
    %c1_129 = arith.constant 1 : index
    %c0_130 = arith.constant 0 : index
    %c0_131 = arith.constant 0 : index
    %c0_132 = arith.constant 0 : index
    %85 = vector.load %arg8[%c1_129, %c0_130, %c0_131, %c0_132] : memref<3x3x4x4xf32, #tpu.memory_space<vmem>>, vector<1x1x4x4xf32>
    %86 = vector.shape_cast %85 : vector<1x1x4x4xf32> to vector<4x4xf32>
    %cst_133 = arith.constant dense<0.000000e+00> : vector<16x16x4xf32>
    %87 = tpu.matmul %84, %86, %cst_133 {dimension_numbers = #tpu.dot_dimension_numbers<[2], [0], [0, 1], [1], [0, 0, 0, 1, 1, 1], [], []>} : vector<16x16x4xf32>, vector<4x4xf32>, vector<16x16x4xf32> -> vector<16x16x4xf32>
    %88 = arith.addf %83, %87 : vector<16x16x4xf32>
    %c1_134 = arith.constant 1 : index
    %c1_135 = arith.constant 1 : index
    %c0_136 = arith.constant 0 : index
    %89 = vector.load %arg12[%c1_134, %c1_135, %c0_136] : memref<18x18x4xf32, #tpu.memory_space<vmem>>, vector<16x16x4xf32>
    %c1_137 = arith.constant 1 : index
    %c1_138 = arith.constant 1 : index
    %c0_139 = arith.constant 0 : index
    %c0_140 = arith.constant 0 : index
    %90 = vector.load %arg8[%c1_137, %c1_138, %c0_139, %c0_140] : memref<3x3x4x4xf32, #tpu.memory_space<vmem>>, vector<1x1x4x4xf32>
    %91 = vector.shape_cast %90 : vector<1x1x4x4xf32> to vector<4x4xf32>
    %cst_141 = arith.constant dense<0.000000e+00> : vector<16x16x4xf32>
    %92 = tpu.matmul %89, %91, %cst_141 {dimension_numbers = #tpu.dot_dimension_numbers<[2], [0], [0, 1], [1], [0, 0, 0, 1, 1, 1], [], []>} : vector<16x16x4xf32>, vector<4x4xf32>, vector<16x16x4xf32> -> vector<16x16x4xf32>
    %93 = arith.addf %88, %92 : vector<16x16x4xf32>
    %c1_142 = arith.constant 1 : index
    %c2_143 = arith.constant 2 : index
    %c0_144 = arith.constant 0 : index
    %94 = vector.load %arg12[%c1_142, %c2_143, %c0_144] : memref<18x18x4xf32, #tpu.memory_space<vmem>>, vector<16x16x4xf32>
    %c1_145 = arith.constant 1 : index
    %c2_146 = arith.constant 2 : index
    %c0_147 = arith.constant 0 : index
    %c0_148 = arith.constant 0 : index
    %95 = vector.load %arg8[%c1_145, %c2_146, %c0_147, %c0_148] : memref<3x3x4x4xf32, #tpu.memory_space<vmem>>, vector<1x1x4x4xf32>
    %96 = vector.shape_cast %95 : vector<1x1x4x4xf32> to vector<4x4xf32>
    %cst_149 = arith.constant dense<0.000000e+00> : vector<16x16x4xf32>
    %97 = tpu.matmul %94, %96, %cst_149 {dimension_numbers = #tpu.dot_dimension_numbers<[2], [0], [0, 1], [1], [0, 0, 0, 1, 1, 1], [], []>} : vector<16x16x4xf32>, vector<4x4xf32>, vector<16x16x4xf32> -> vector<16x16x4xf32>
    %98 = arith.addf %93, %97 : vector<16x16x4xf32>
    %c2_150 = arith.constant 2 : index
    %c0_151 = arith.constant 0 : index
    %c0_152 = arith.constant 0 : index
    %99 = vector.load %arg12[%c2_150, %c0_151, %c0_152] : memref<18x18x4xf32, #tpu.memory_space<vmem>>, vector<16x16x4xf32>
    %c2_153 = arith.constant 2 : index
    %c0_154 = arith.constant 0 : index
    %c0_155 = arith.constant 0 : index
    %c0_156 = arith.constant 0 : index
    %100 = vector.load %arg8[%c2_153, %c0_154, %c0_155, %c0_156] : memref<3x3x4x4xf32, #tpu.memory_space<vmem>>, vector<1x1x4x4xf32>
    %101 = vector.shape_cast %100 : vector<1x1x4x4xf32> to vector<4x4xf32>
    %cst_157 = arith.constant dense<0.000000e+00> : vector<16x16x4xf32>
    %102 = tpu.matmul %99, %101, %cst_157 {dimension_numbers = #tpu.dot_dimension_numbers<[2], [0], [0, 1], [1], [0, 0, 0, 1, 1, 1], [], []>} : vector<16x16x4xf32>, vector<4x4xf32>, vector<16x16x4xf32> -> vector<16x16x4xf32>
    %103 = arith.addf %98, %102 : vector<16x16x4xf32>
    %c2_158 = arith.constant 2 : index
    %c1_159 = arith.constant 1 : index
    %c0_160 = arith.constant 0 : index
    %104 = vector.load %arg12[%c2_158, %c1_159, %c0_160] : memref<18x18x4xf32, #tpu.memory_space<vmem>>, vector<16x16x4xf32>
    %c2_161 = arith.constant 2 : index
    %c1_162 = arith.constant 1 : index
    %c0_163 = arith.constant 0 : index
    %c0_164 = arith.constant 0 : index
    %105 = vector.load %arg8[%c2_161, %c1_162, %c0_163, %c0_164] : memref<3x3x4x4xf32, #tpu.memory_space<vmem>>, vector<1x1x4x4xf32>
    %106 = vector.shape_cast %105 : vector<1x1x4x4xf32> to vector<4x4xf32>
    %cst_165 = arith.constant dense<0.000000e+00> : vector<16x16x4xf32>
    %107 = tpu.matmul %104, %106, %cst_165 {dimension_numbers = #tpu.dot_dimension_numbers<[2], [0], [0, 1], [1], [0, 0, 0, 1, 1, 1], [], []>} : vector<16x16x4xf32>, vector<4x4xf32>, vector<16x16x4xf32> -> vector<16x16x4xf32>
    %108 = arith.addf %103, %107 : vector<16x16x4xf32>
    %c2_166 = arith.constant 2 : index
    %c2_167 = arith.constant 2 : index
    %c0_168 = arith.constant 0 : index
    %109 = vector.load %arg12[%c2_166, %c2_167, %c0_168] : memref<18x18x4xf32, #tpu.memory_space<vmem>>, vector<16x16x4xf32>
    %c2_169 = arith.constant 2 : index
    %c2_170 = arith.constant 2 : index
    %c0_171 = arith.constant 0 : index
    %c0_172 = arith.constant 0 : index
    %110 = vector.load %arg8[%c2_169, %c2_170, %c0_171, %c0_172] : memref<3x3x4x4xf32, #tpu.memory_space<vmem>>, vector<1x1x4x4xf32>
    %111 = vector.shape_cast %110 : vector<1x1x4x4xf32> to vector<4x4xf32>
    %cst_173 = arith.constant dense<0.000000e+00> : vector<16x16x4xf32>
    %112 = tpu.matmul %109, %111, %cst_173 {dimension_numbers = #tpu.dot_dimension_numbers<[2], [0], [0, 1], [1], [0, 0, 0, 1, 1, 1], [], []>} : vector<16x16x4xf32>, vector<4x4xf32>, vector<16x16x4xf32> -> vector<16x16x4xf32>
    %113 = arith.addf %108, %112 : vector<16x16x4xf32>
    %c0_174 = arith.constant 0 : index
    %c0_175 = arith.constant 0 : index
    %114 = vector.load %arg9[%c0_174, %c0_175] : memref<1x4xf32, #tpu.memory_space<vmem>>, vector<1x4xf32>
    %115 = vector.shape_cast %114 : vector<1x4xf32> to vector<1x1x4xf32>
    %116 = vector.broadcast %115 : vector<1x1x4xf32> to vector<16x16x4xf32>
    %117 = arith.addf %113, %116 : vector<16x16x4xf32>
    %cst_176 = arith.constant 0.000000e+00 : f32
    %118 = vector.broadcast %cst_176 : f32 to vector<16x16x4xf32>
    %119 = arith.maximumf %117, %118 : vector<16x16x4xf32>
    %c0_177 = arith.constant 0 : index
    %c0_178 = arith.constant 0 : index
    %c0_179 = arith.constant 0 : index
    %c0_180 = arith.constant 0 : index
    %120 = vector.load %arg10[%c0_177, %c0_178, %c0_179, %c0_180] : memref<1x16x16x4xf32, #tpu.memory_space<vmem>>, vector<1x16x16x4xf32>
    %121 = vector.shape_cast %120 : vector<1x16x16x4xf32> to vector<16x16x4xf32>
    %122 = vector.shape_cast %119 : vector<16x16x4xf32> to vector<1x16x16x4xf32>
    tpu.vector_store %arg10[%c0_177, %c0_178, %c0_179, %c0_180], %122 {strides = array<i32>} : memref<1x16x16x4xf32, #tpu.memory_space<vmem>>, vector<1x16x16x4xf32>,
    return
  }
  func.func @transform_0(%arg0: i32) -> (i32, i32, i32, i32) {
    %c0_i32 = arith.constant 0 : i32
    %c0_i32_0 = arith.constant 0 : i32
    %c0_i32_1 = arith.constant 0 : i32
    %c0_i32_2 = arith.constant 0 : i32
    return %arg0, %c0_i32, %c0_i32_0, %c0_i32_1 : i32, i32, i32, i32
  }
  func.func @transform_1(%arg0: i32) -> (i32, i32, i32, i32) {
    %c0_i32 = arith.constant 0 : i32
    %c0_i32_0 = arith.constant 0 : i32
    %c0_i32_1 = arith.constant 0 : i32
    %c0_i32_2 = arith.constant 0 : i32
    return %arg0, %c0_i32, %c0_i32_0, %c0_i32_1 : i32, i32, i32, i32
  }
  func.func @transform_2(%arg0: i32) -> (i32, i32) {
    %c0_i32 = arith.constant 0 : i32
    %c0_i32_0 = arith.constant 0 : i32
    %c0_i32_1 = arith.constant 0 : i32
    return %c0_i32, %c0_i32_0 : i32, i32
  }
  func.func @transform_3(%arg0: i32) -> (i32, i32) {
    %c0_i32 = arith.constant 0 : i32
    %c0_i32_0 = arith.constant 0 : i32
    %c0_i32_1 = arith.constant 0 : i32
    return %c0_i32, %c0_i32_0 : i32, i32
  }
  func.func @transform_4(%arg0: i32) -> (i32, i32) {
    %c0_i32 = arith.constant 0 : i32
    %c0_i32_0 = arith.constant 0 : i32
    %c0_i32_1 = arith.constant 0 : i32
    return %c0_i32, %c0_i32_0 : i32, i32
  }
  func.func @transform_5(%arg0: i32) -> (i32, i32, i32, i32) {
    %c0_i32 = arith.constant 0 : i32
    %c0_i32_0 = arith.constant 0 : i32
    %c0_i32_1 = arith.constant 0 : i32
    %c0_i32_2 = arith.constant 0 : i32
    %c0_i32_3 = arith.constant 0 : i32
    return %c0_i32, %c0_i32_0, %c0_i32_1, %c0_i32_2 : i32, i32, i32, i32
  }
  func.func @transform_6(%arg0: i32) -> (i32, i32) {
    %c0_i32 = arith.constant 0 : i32
    %c0_i32_0 = arith.constant 0 : i32
    %c0_i32_1 = arith.constant 0 : i32
    return %c0_i32, %c0_i32_0 : i32, i32
  }
  func.func @transform_7(%arg0: i32) -> (i32, i32, i32, i32) {
    %c0_i32 = arith.constant 0 : i32
    %c0_i32_0 = arith.constant 0 : i32
    %c0_i32_1 = arith.constant 0 : i32
    %c0_i32_2 = arith.constant 0 : i32
    %c0_i32_3 = arith.constant 0 : i32
    return %c0_i32, %c0_i32_0, %c0_i32_1, %c0_i32_2 : i32, i32, i32, i32
  }
  func.func @transform_8(%arg0: i32) -> (i32, i32) {
    %c0_i32 = arith.constant 0 : i32
    %c0_i32_0 = arith.constant 0 : i32
    %c0_i32_1 = arith.constant 0 : i32
    return %c0_i32, %c0_i32_0 : i32, i32
  }
  func.func @transform_9(%arg0: i32) -> (i32, i32, i32, i32) {
    %c0_i32 = arith.constant 0 : i32
    %c0_i32_0 = arith.constant 0 : i32
    %c0_i32_1 = arith.constant 0 : i32
    %c0_i32_2 = arith.constant 0 : i32
    return %arg0, %c0_i32, %c0_i32_0, %c0_i32_1 : i32, i32, i32, i32
  }
}

</mosaic_0001>

<bundles_post_ra>
// kernel: comparison_module_forward.1
= control target key start
LH: loop header
LB: loop body
LE: loop exit
PB: predicated region body
PF: predicated region fallthrough
CT: control target
= control target key end

     0   :  { %s11415_s30 = smov 0   ;;  %s13642_s0 = inlined_call_operand.vmem [shape: f32[2,16,16,4], index: 0, kind: input, shape index: {}]   ;;  %s13643_s1 = inlined_call_operand.vmem [shape: f32[2,16,16,4], index: 1, kind: input, shape index: {}]   ;;  %s13644_s2 = inlined_call_operand.vmem [shape: f32[4,4], index: 2, kind: input, shape index: {}]   ;;  %s13645_s3 = inlined_call_operand.vmem [shape: f32[4,4], index: 3, kind: input, shape index: {}]   ;;  %s13646_s4 = inlined_call_operand.vmem [shape: f32[1,4], index: 4, kind: input, shape index: {}]   ;;  %s13647_s5 = inlined_call_operand.vmem [shape: f32[3,3,4,4], index: 5, kind: input, shape index: {}]   ;;  %s13648_s6 = inlined_call_operand.vmem [shape: f32[1,4], index: 6, kind: input, shape index: {}]   ;;  %s13649_s7 = inlined_call_operand.vmem [shape: f32[3,3,4,4], index: 7, kind: input, shape index: {}]   ;;  %s13650_s8 = inlined_call_operand.vmem [shape: f32[1,4], index: 8, kind: input, shape index: {}]   ;;  %s13651_s9 = inlined_call_operand.vmem [shape: f32[2,16,16,4], index: 9, kind: output, shape index: {}]  }
   0x1 LB: > { %s8448_s10 = sadd.s32 4294967295, %s11362_s30   ;;  %p8452_p0 = scmp.ge.s32.totalorder %s11362_s30, 1  ;;  %s11362_s30 = sphi %s11415_s30, %s19_s30  }
   0x2   : > { %p297_p1 = scmp.lt.s32.totalorder %s11362_s30, 3 }
   0x4   : > { %p298_p2 = pnand %p8452_p0, %p297_p1 }
   0x6   : > { %301 = sbr.rel (%p298_p2) target bundleno = 1769 (0x6e9), region = 56 }
   0xd   : > { %v528_v0 = vld [vmem:[%s13645_s3] sm:$0xf]  ;;  %vm625_vm0 = vcmask 1043456   ;;  %p338_p3 = scmp.lt.s32.totalorder %s8448_s10, 1  ;;  %v8526_v2 = vld [vmem:[%s13647_s5 + $0x4] sm:$0xf] }
   0xe   : > { %v495_v1 = vld [vmem:[%s13644_s2] sm:$0xf]  ;;  %9803 = vmatprep.subr.msk.mxu1 %vm625_vm0, %v528_v0  ;;  %vm353_vm1 = vcmask 31744   ;;  %vm356_vm2 = vcmask 25600   ;;  %v11364_v63 = vmov 0.0  }
   0xf   : > { %9853 = vmatprep.subr.msk.mxu0 %vm625_vm0, %v495_v1  ;;  %9804 = vmatpush3.msk.msra.mxu1 %vm625_vm0, %v528_v0  ;;  %s13910_s10 = smov (!%p338_p3, %s8448_s10), 1  ;;  %359 = vst.msk [vmem:[#allocation2 + $0x20] sm:$0xff] %vm353_vm1, %v11364_v63  ;;  %354 = vst.msk [vmem:[#allocation2] sm:$0xff] %vm353_vm1, %v11364_v63 }
  0x10   : > { %9854 = vmatpush3.msk.msra.mxu0 %vm625_vm0, %v495_v1  ;;  %9903 = vmatprep.subr.msk.mxu1 %vm625_vm0, %v8526_v2  ;;  %s11437_s17 = sshll.u32 %s13910_s10, 8  ;;  %360 = vst.msk [vmem:[#allocation2 + $0x28] sm:$0x3] %vm356_vm2, %v11364_v63  ;;  %357 = vst.msk [vmem:[#allocation2 + $0x10] sm:$0x3] %vm356_vm2, %v11364_v63 }
  0x11   : > { %s11443_s20 = scalar_lea.vmem %s13643_s1, %s11437_s17  ;;  %s11450_s23 = scalar_lea.vmem %s13642_s0, %s11437_s17  ;;  %355 = vst.msk [vmem:[#allocation2 + $0x8] sm:$0xff] %vm353_vm1, %v11364_v63  ;;  %358 = vst.msk [vmem:[#allocation2 + $0x18] sm:$0xff] %vm353_vm1, %v11364_v63 }
  0x12   : > { %v496_v3 = vld [vmem:[%s11443_s20] sm:$0xff]  ;;  %v497_v4 = vld [vmem:[%s11443_s20 + $0x8] sm:$0xff]  ;;  %v498_v5 = vld [vmem:[%s11443_s20 + $0x10] sm:$0xff]  ;;  %361 = vst.msk [vmem:[#allocation2 + $0x30] sm:$0xff] %vm353_vm1, %v11364_v63  ;;  %s13542_s28 = scalar_lea.vmem %s13651_s9, %s11437_s17 }
  0x13   : > { %9805 = vmatprep.mubr.msk.f32.mxu1 %vm353_vm1, %v496_v3  ;;  %v463_v6 = vld [vmem:[%s11450_s23] sm:$0xff]  ;;  %v464_v7 = vld [vmem:[%s11450_s23 + $0x8] sm:$0xff]  ;;  %v465_v8 = vld [vmem:[%s11450_s23 + $0x10] sm:$0xff]  ;;  %362 = vst.msk [vmem:[#allocation2 + $0x38] sm:$0xff] %vm353_vm1, %v11364_v63 }
  0x14   : > { %9855 = vmatprep.mubr.msk.f32.mxu0 %vm353_vm1, %v463_v6  ;;  %9806 = vmatmul.mubr.msk.f32.vlgmr.msra.gmra.mrb[0].mxu1 %vm353_vm1, %v497_v4  ;;  %v499_v9 = vld [vmem:[%s11443_s20 + $0x18] sm:$0xff]  ;;  %v500_v11 = vld [vmem:[%s11443_s20 + $0x20] sm:$0xff]  ;;  %v501_v13 = vld [vmem:[%s11443_s20 + $0x28] sm:$0xff]  ;;  %363 = vst.msk [vmem:[#allocation2 + $0x40] sm:$0x3] %vm356_vm2, %v11364_v63 }
  0x15   : > { %9856 = vmatmul.mubr.msk.f32.vlgmr.msra.gmra.mrb[0].mxu0 %vm353_vm1, %v464_v7  ;;  %9808 = vmatprep.mubr.msk.f32.mxu1 %vm353_vm1, %v498_v5  ;;  %v466_v10 = vld [vmem:[%s11450_s23 + $0x18] sm:$0xff]  ;;  %v467_v12 = vld [vmem:[%s11450_s23 + $0x20] sm:$0xff]  ;;  %v468_v14 = vld [vmem:[%s11450_s23 + $0x28] sm:$0xff]  ;;  %364 = vst.msk [vmem:[#allocation2 + $0x48] sm:$0xff] %vm353_vm1, %v11364_v63 }
  0x16   : > { %9858 = vmatprep.mubr.msk.f32.mxu0 %vm353_vm1, %v465_v8  ;;  %9904 = vmatpush3.msk.msra.mxu1 %vm625_vm0, %v8526_v2  ;;  %v502_v15 = vld [vmem:[%s11443_s20 + $0x30] sm:$0xff]  ;;  %v503_v17 = vld [vmem:[%s11443_s20 + $0x38] sm:$0xff]  ;;  %v504_v19 = vld [vmem:[%s11443_s20 + $0x40] sm:$0xff]  ;;  %365 = vst.msk [vmem:[#allocation2 + $0x50] sm:$0xff] %vm353_vm1, %v11364_v63 }
  0x17   : > { %v469_v16 = vld [vmem:[%s11450_s23 + $0x30] sm:$0xff]  ;;  %v470_v18 = vld [vmem:[%s11450_s23 + $0x38] sm:$0xff]  ;;  %v471_v20 = vld [vmem:[%s11450_s23 + $0x40] sm:$0xff]  ;;  %366 = vst.msk [vmem:[#allocation2 + $0x58] sm:$0x3] %vm356_vm2, %v11364_v63 }
  0x18   : > { %9809 = vmatmul.mubr.msk.f32.gmra.mrb[2].mxu1 %vm353_vm1, %v499_v9  ;;  %v505_v21 = vld [vmem:[%s11443_s20 + $0x48] sm:$0xff]  ;;  %v506_v23 = vld [vmem:[%s11443_s20 + $0x50] sm:$0xff]  ;;  %v507_v25 = vld [vmem:[%s11443_s20 + $0x58] sm:$0xff]  ;;  %367 = vst.msk [vmem:[#allocation2 + $0x60] sm:$0xff] %vm353_vm1, %v11364_v63 }
  0x19   : > { %9859 = vmatmul.mubr.msk.f32.gmra.mrb[2].mxu0 %vm353_vm1, %v466_v10  ;;  %9811 = vmatprep.mubr.msk.f32.mxu1 %vm353_vm1, %v500_v11  ;;  %v472_v22 = vld [vmem:[%s11450_s23 + $0x48] sm:$0xff]  ;;  %v473_v24 = vld [vmem:[%s11450_s23 + $0x50] sm:$0xff]  ;;  %v474_v26 = vld [vmem:[%s11450_s23 + $0x58] sm:$0xff]  ;;  %368 = vst.msk [vmem:[#allocation2 + $0x68] sm:$0xff] %vm353_vm1, %v11364_v63 }
  0x1a   : > { %9861 = vmatprep.mubr.msk.f32.mxu0 %vm353_vm1, %v467_v12  ;;  %v508_v27 = vld [vmem:[%s11443_s20 + $0x60] sm:$0xff]  ;;  %v509_v29 = vld [vmem:[%s11443_s20 + $0x68] sm:$0xff]  ;;  %v510_v31 = vld [vmem:[%s11443_s20 + $0x70] sm:$0xff]  ;;  %369 = vst.msk [vmem:[#allocation2 + $0x70] sm:$0x3] %vm356_vm2, %v11364_v63 }
  0x1b   : > { %v475_v28 = vld [vmem:[%s11450_s23 + $0x60] sm:$0xff]  ;;  %v476_v30 = vld [vmem:[%s11450_s23 + $0x68] sm:$0xff]  ;;  %v477_v32 = vld [vmem:[%s11450_s23 + $0x70] sm:$0xff]  ;;  %370 = vst.msk [vmem:[#allocation2 + $0x78] sm:$0xff] %vm353_vm1, %v11364_v63 }
  0x1c   : > { %9812 = vmatmul.mubr.msk.f32.gmra.mrb[4].mxu1 %vm353_vm1, %v501_v13  ;;  %v511_v33 = vld [vmem:[%s11443_s20 + $0x78] sm:$0xff]  ;;  %v512_v35 = vld [vmem:[%s11443_s20 + $0x80] sm:$0xff]  ;;  %v513_v37 = vld [vmem:[%s11443_s20 + $0x88] sm:$0xff]  ;;  %371 = vst.msk [vmem:[#allocation2 + $0x80] sm:$0xff] %vm353_vm1, %v11364_v63 }
  0x1d   : > { %9862 = vmatmul.mubr.msk.f32.gmra.mrb[4].mxu0 %vm353_vm1, %v468_v14  ;;  %9814 = vmatprep.mubr.msk.f32.mxu1 %vm353_vm1, %v502_v15  ;;  %v478_v34 = vld [vmem:[%s11450_s23 + $0x78] sm:$0xff]  ;;  %v479_v36 = vld [vmem:[%s11450_s23 + $0x80] sm:$0xff]  ;;  %v480_v38 = vld [vmem:[%s11450_s23 + $0x88] sm:$0xff]  ;;  %372 = vst.msk [vmem:[#allocation2 + $0x88] sm:$0x3] %vm356_vm2, %v11364_v63 }
  0x1e   : > { %9864 = vmatprep.mubr.msk.f32.mxu0 %vm353_vm1, %v469_v16  ;;  %v514_v39 = vld [vmem:[%s11443_s20 + $0x90] sm:$0xff]  ;;  %v515_v41 = vld [vmem:[%s11443_s20 + $0x98] sm:$0xff]  ;;  %v516_v43 = vld [vmem:[%s11443_s20 + $0xa0] sm:$0xff]  ;;  %373 = vst.msk [vmem:[#allocation2 + $0x90] sm:$0xff] %vm353_vm1, %v11364_v63 }
  0x1f   : > { %v481_v40 = vld [vmem:[%s11450_s23 + $0x90] sm:$0xff]  ;;  %v482_v42 = vld [vmem:[%s11450_s23 + $0x98] sm:$0xff]  ;;  %v483_v44 = vld [vmem:[%s11450_s23 + $0xa0] sm:$0xff]  ;;  %374 = vst.msk [vmem:[#allocation2 + $0x98] sm:$0xff] %vm353_vm1, %v11364_v63 }
  0x20   : > { %9815 = vmatmul.mubr.msk.f32.gmra.mrb[6].mxu1 %vm353_vm1, %v503_v17  ;;  %v517_v45 = vld [vmem:[%s11443_s20 + $0xa8] sm:$0xff]  ;;  %v518_v47 = vld [vmem:[%s11443_s20 + $0xb0] sm:$0xff]  ;;  %v519_v49 = vld [vmem:[%s11443_s20 + $0xb8] sm:$0xff]  ;;  %375 = vst.msk [vmem:[#allocation2 + $0xa0] sm:$0x3] %vm356_vm2, %v11364_v63 }
  0x21   : > { %9865 = vmatmul.mubr.msk.f32.gmra.mrb[6].mxu0 %vm353_vm1, %v470_v18  ;;  %9817 = vmatprep.mubr.msk.f32.mxu1 %vm353_vm1, %v504_v19  ;;  %v484_v46 = vld [vmem:[%s11450_s23 + $0xa8] sm:$0xff]  ;;  %v485_v48 = vld [vmem:[%s11450_s23 + $0xb0] sm:$0xff]  ;;  %v486_v50 = vld [vmem:[%s11450_s23 + $0xb8] sm:$0xff]  ;;  %376 = vst.msk [vmem:[#allocation2 + $0xa8] sm:$0xff] %vm353_vm1, %v11364_v63 }
  0x22   : > { %9867 = vmatprep.mubr.msk.f32.mxu0 %vm353_vm1, %v471_v20  ;;  %v520_v51 = vld [vmem:[%s11443_s20 + $0xc0] sm:$0xff]  ;;  %v521_v53 = vld [vmem:[%s11443_s20 + $0xc8] sm:$0xff]  ;;  %v522_v55 = vld [vmem:[%s11443_s20 + $0xd0] sm:$0xff]  ;;  %377 = vst.msk [vmem:[#allocation2 + $0xb0] sm:$0xff] %vm353_vm1, %v11364_v63 }
  0x23   : > { %v487_v52 = vld [vmem:[%s11450_s23 + $0xc0] sm:$0xff]  ;;  %v488_v54 = vld [vmem:[%s11450_s23 + $0xc8] sm:$0xff]  ;;  %v489_v56 = vld [vmem:[%s11450_s23 + $0xd0] sm:$0xff]  ;;  %378 = vst.msk [vmem:[#allocation2 + $0xb8] sm:$0x3] %vm356_vm2, %v11364_v63 }
  0x24   : > { %9818 = vmatmul.mubr.msk.f32.gmra.mrb[8].mxu1 %vm353_vm1, %v505_v21  ;;  %v523_v57 = vld [vmem:[%s11443_s20 + $0xd8] sm:$0xff]  ;;  %v524_v59 = vld [vmem:[%s11443_s20 + $0xe0] sm:$0xff]  ;;  %v525_v61 = vld [vmem:[%s11443_s20 + $0xe8] sm:$0xff]  ;;  %379 = vst.msk [vmem:[#allocation2 + $0xc0] sm:$0xff] %vm353_vm1, %v11364_v63 }
  0x25   : > { %9868 = vmatmul.mubr.msk.f32.gmra.mrb[8].mxu0 %vm353_vm1, %v472_v22  ;;  %9820 = vmatprep.mubr.msk.f32.mxu1 %vm353_vm1, %v506_v23  ;;  %v490_v58 = vld [vmem:[%s11450_s23 + $0xd8] sm:$0xff]  ;;  %v491_v60 = vld [vmem:[%s11450_s23 + $0xe0] sm:$0xff]  ;;  %v492_v62 = vld [vmem:[%s11450_s23 + $0xe8] sm:$0xff]  ;;  %380 = vst.msk [vmem:[#allocation2 + $0xc8] sm:$0xff] %vm353_vm1, %v11364_v63 }
  0x26   : > { %9870 = vmatprep.mubr.msk.f32.mxu0 %vm353_vm1, %v473_v24  ;;  %381 = vst.msk [vmem:[#allocation2 + $0xd0] sm:$0x3] %vm356_vm2, %v11364_v63  ;;  %384 = vst.msk [vmem:[#allocation2 + $0xe8] sm:$0x3] %vm356_vm2, %v11364_v63  ;;  %v526_v0 = vld [vmem:[%s11443_s20 + $0xf0] sm:$0xff]  ;;  %v527_v2 = vld [vmem:[%s11443_s20 + $0xf8] sm:$0xff] }
  0x27   : > { %382 = vst.msk [vmem:[#allocation2 + $0xd8] sm:$0xff] %vm353_vm1, %v11364_v63  ;;  %383 = vst.msk [vmem:[#allocation2 + $0xe0] sm:$0xff] %vm353_vm1, %v11364_v63  ;;  %v493_v1 = vld [vmem:[%s11450_s23 + $0xf0] sm:$0xff]  ;;  %v494_v3 = vld [vmem:[%s11450_s23 + $0xf8] sm:$0xff] }
  0x28   : > { %9821 = vmatmul.mubr.msk.f32.gmra.mrb[10].mxu1 %vm353_vm1, %v507_v25  ;;  %385 = vst.msk [vmem:[#allocation2 + $0xf0] sm:$0xff] %vm353_vm1, %v11364_v63  ;;  %386 = vst.msk [vmem:[#allocation2 + $0xf8] sm:$0xff] %vm353_vm1, %v11364_v63  ;;  %v1315_v4 = vld [vmem:[#allocation2 + $0x1] sm:$0xff]  ;;  %v1316_v5 = vld [vmem:[#allocation2 + $0x9] sm:$0xff] }
  0x29   : > { %9871 = vmatmul.mubr.msk.f32.gmra.mrb[10].mxu0 %vm353_vm1, %v474_v26  ;;  %9823 = vmatprep.mubr.msk.f32.mxu1 %vm353_vm1, %v508_v27  ;;  %387 = vst.msk [vmem:[#allocation2 + $0x100] sm:$0x3] %vm356_vm2, %v11364_v63  ;;  %390 = vst.msk [vmem:[#allocation2 + $0x118] sm:$0x3] %vm356_vm2, %v11364_v63  ;;  %v1314_v6 = vld [vmem:[%s13647_s5] sm:$0xf] }
  0x2a   : > { %9873 = vmatprep.mubr.msk.f32.mxu0 %vm353_vm1, %v475_v28  ;;  %388 = vst.msk [vmem:[#allocation2 + $0x108] sm:$0xff] %vm353_vm1, %v11364_v63  ;;  %389 = vst.msk [vmem:[#allocation2 + $0x110] sm:$0xff] %vm353_vm1, %v11364_v63  ;;  %9953 = vmatprep.subr.msk.mxu1 %vm625_vm0, %v1314_v6  ;;  %v11806_v7 = vld [vmem:[%s13647_s5 + $0x8] sm:$0xf]  ;;  %v11813_v10 = vld [vmem:[%s13646_s4] ss:$0 sm:$0xff] }
  0x2b   : > { %391 = vst.msk [vmem:[#allocation2 + $0x120] sm:$0xff] %vm353_vm1, %v11364_v63  ;;  %392 = vst.msk [vmem:[#allocation2 + $0x128] sm:$0xff] %vm353_vm1, %v11364_v63 }
  0x2c   : > { %9824 = vmatmul.mubr.msk.f32.gmra.mrb[12].mxu1 %vm353_vm1, %v509_v29  ;;  %393 = vst.msk [vmem:[#allocation2 + $0x130] sm:$0x3] %vm356_vm2, %v11364_v63  ;;  %396 = vst.msk [vmem:[#allocation2 + $0x148] sm:$0x3] %vm356_vm2, %v11364_v63 }
  0x2d   : > { %9874 = vmatmul.mubr.msk.f32.gmra.mrb[12].mxu0 %vm353_vm1, %v476_v30  ;;  %9826 = vmatprep.mubr.msk.f32.mxu1 %vm353_vm1, %v510_v31  ;;  %394 = vst.msk [vmem:[#allocation2 + $0x138] sm:$0xff] %vm353_vm1, %v11364_v63  ;;  %395 = vst.msk [vmem:[#allocation2 + $0x140] sm:$0xff] %vm353_vm1, %v11364_v63 }
  0x2e   : > { %9876 = vmatprep.mubr.msk.f32.mxu0 %vm353_vm1, %v477_v32  ;;  %397 = vst.msk [vmem:[#allocation2 + $0x150] sm:$0xff] %vm353_vm1, %v11364_v63  ;;  %398 = vst.msk [vmem:[#allocation2 + $0x158] sm:$0xff] %vm353_vm1, %v11364_v63 }
  0x2f   : > { %399 = vst.msk [vmem:[#allocation2 + $0x160] sm:$0x3] %vm356_vm2, %v11364_v63  ;;  %402 = vst.msk [vmem:[#allocation2 + $0x178] sm:$0x3] %vm356_vm2, %v11364_v63 }
  0x30   : > { %9827 = vmatmul.mubr.msk.f32.gmra.mrb[14].mxu1 %vm353_vm1, %v511_v33  ;;  %400 = vst.msk [vmem:[#allocation2 + $0x168] sm:$0xff] %vm353_vm1, %v11364_v63  ;;  %401 = vst.msk [vmem:[#allocation2 + $0x170] sm:$0xff] %vm353_vm1, %v11364_v63 }
  0x31   : > { %9877 = vmatmul.mubr.msk.f32.gmra.mrb[14].mxu0 %vm353_vm1, %v478_v34  ;;  %9829 = vmatprep.mubr.msk.f32.mxu1 %vm353_vm1, %v512_v35  ;;  %403 = vst.msk [vmem:[#allocation2 + $0x180] sm:$0xff] %vm353_vm1, %v11364_v63  ;;  %404 = vst.msk [vmem:[#allocation2 + $0x188] sm:$0xff] %vm353_vm1, %v11364_v63 }
  0x32   : > { %9879 = vmatprep.mubr.msk.f32.mxu0 %vm353_vm1, %v479_v36  ;;  %405 = vst.msk [vmem:[#allocation2 + $0x190] sm:$0x3] %vm356_vm2, %v11364_v63  ;;  %408 = vst.msk [vmem:[#allocation2 + $0x1a8] sm:$0x3] %vm356_vm2, %v11364_v63 }
  0x33   : > { %406 = vst.msk [vmem:[#allocation2 + $0x198] sm:$0xff] %vm353_vm1, %v11364_v63  ;;  %407 = vst.msk [vmem:[#allocation2 + $0x1a0] sm:$0xff] %vm353_vm1, %v11364_v63 }
  0x34   : > { %9830 = vmatmul.mubr.msk.f32.gmra.mrb[16].mxu1 %vm353_vm1, %v513_v37  ;;  %409 = vst.msk [vmem:[#allocation3] sm:$0xff] %vm353_vm1, %v11364_v63  ;;  %410 = vst.msk [vmem:[#allocation3 + $0x8] sm:$0xff] %vm353_vm1, %v11364_v63 }
  0x35   : > { %9880 = vmatmul.mubr.msk.f32.gmra.mrb[16].mxu0 %vm353_vm1, %v480_v38  ;;  %9832 = vmatprep.mubr.msk.f32.mxu1 %vm353_vm1, %v514_v39  ;;  %411 = vst.msk [vmem:[#allocation3 + $0x10] sm:$0x3] %vm356_vm2, %v11364_v63  ;;  %414 = vst.msk [vmem:[#allocation3 + $0x28] sm:$0x3] %vm356_vm2, %v11364_v63 }
  0x36   : > { %9882 = vmatprep.mubr.msk.f32.mxu0 %vm353_vm1, %v481_v40  ;;  %412 = vst.msk [vmem:[#allocation3 + $0x18] sm:$0xff] %vm353_vm1, %v11364_v63  ;;  %413 = vst.msk [vmem:[#allocation3 + $0x20] sm:$0xff] %vm353_vm1, %v11364_v63 }
  0x37   : > { %415 = vst.msk [vmem:[#allocation3 + $0x30] sm:$0xff] %vm353_vm1, %v11364_v63  ;;  %416 = vst.msk [vmem:[#allocation3 + $0x38] sm:$0xff] %vm353_vm1, %v11364_v63 }
  0x38   : > { %9833 = vmatmul.mubr.msk.f32.gmra.mrb[18].mxu1 %vm353_vm1, %v515_v41  ;;  %417 = vst.msk [vmem:[#allocation3 + $0x40] sm:$0x3] %vm356_vm2, %v11364_v63  ;;  %420 = vst.msk [vmem:[#allocation3 + $0x58] sm:$0x3] %vm356_vm2, %v11364_v63 }
  0x39   : > { %9883 = vmatmul.mubr.msk.f32.gmra.mrb[18].mxu0 %vm353_vm1, %v482_v42  ;;  %9835 = vmatprep.mubr.msk.f32.mxu1 %vm353_vm1, %v516_v43  ;;  %418 = vst.msk [vmem:[#allocation3 + $0x48] sm:$0xff] %vm353_vm1, %v11364_v63  ;;  %419 = vst.msk [vmem:[#allocation3 + $0x50] sm:$0xff] %vm353_vm1, %v11364_v63 }
  0x3a   : > { %9885 = vmatprep.mubr.msk.f32.mxu0 %vm353_vm1, %v483_v44  ;;  %421 = vst.msk [vmem:[#allocation3 + $0x60] sm:$0xff] %vm353_vm1, %v11364_v63  ;;  %422 = vst.msk [vmem:[#allocation3 + $0x68] sm:$0xff] %vm353_vm1, %v11364_v63 }
  0x3b   : > { %423 = vst.msk [vmem:[#allocation3 + $0x70] sm:$0x3] %vm356_vm2, %v11364_v63  ;;  %426 = vst.msk [vmem:[#allocation3 + $0x88] sm:$0x3] %vm356_vm2, %v11364_v63 }
  0x3c   : > { %9836 = vmatmul.mubr.msk.f32.gmra.mrb[20].mxu1 %vm353_vm1, %v517_v45  ;;  %424 = vst.msk [vmem:[#allocation3 + $0x78] sm:$0xff] %vm353_vm1, %v11364_v63  ;;  %425 = vst.msk [vmem:[#allocation3 + $0x80] sm:$0xff] %vm353_vm1, %v11364_v63 }
  0x3d   : > { %9886 = vmatmul.mubr.msk.f32.gmra.mrb[20].mxu0 %vm353_vm1, %v484_v46  ;;  %9838 = vmatprep.mubr.msk.f32.mxu1 %vm353_vm1, %v518_v47  ;;  %427 = vst.msk [vmem:[#allocation3 + $0x90] sm:$0xff] %vm353_vm1, %v11364_v63  ;;  %428 = vst.msk [vmem:[#allocation3 + $0x98] sm:$0xff] %vm353_vm1, %v11364_v63 }
  0x3e   : > { %9888 = vmatprep.mubr.msk.f32.mxu0 %vm353_vm1, %v485_v48  ;;  %429 = vst.msk [vmem:[#allocation3 + $0xa0] sm:$0x3] %vm356_vm2, %v11364_v63  ;;  %432 = vst.msk [vmem:[#allocation3 + $0xb8] sm:$0x3] %vm356_vm2, %v11364_v63 }
  0x3f   : > { %430 = vst.msk [vmem:[#allocation3 + $0xa8] sm:$0xff] %vm353_vm1, %v11364_v63  ;;  %431 = vst.msk [vmem:[#allocation3 + $0xb0] sm:$0xff] %vm353_vm1, %v11364_v63 }
  0x40   : > { %9839 = vmatmul.mubr.msk.f32.gmra.mrb[22].mxu1 %vm353_vm1, %v519_v49  ;;  %433 = vst.msk [vmem:[#allocation3 + $0xc0] sm:$0xff] %vm353_vm1, %v11364_v63  ;;  %434 = vst.msk [vmem:[#allocation3 + $0xc8] sm:$0xff] %vm353_vm1, %v11364_v63 }
  0x41   : > { %9889 = vmatmul.mubr.msk.f32.gmra.mrb[22].mxu0 %vm353_vm1, %v486_v50  ;;  %9841 = vmatprep.mubr.msk.f32.mxu1 %vm353_vm1, %v520_v51  ;;  %435 = vst.msk [vmem:[#allocation3 + $0xd0] sm:$0x3] %vm356_vm2, %v11364_v63  ;;  %438 = vst.msk [vmem:[#allocation3 + $0xe8] sm:$0x3] %vm356_vm2, %v11364_v63 }
  0x42   : > { %9891 = vmatprep.mubr.msk.f32.mxu0 %vm353_vm1, %v487_v52  ;;  %436 = vst.msk [vmem:[#allocation3 + $0xd8] sm:$0xff] %vm353_vm1, %v11364_v63  ;;  %437 = vst.msk [vmem:[#allocation3 + $0xe0] sm:$0xff] %vm353_vm1, %v11364_v63 }
  0x43   : > { %439 = vst.msk [vmem:[#allocation3 + $0xf0] sm:$0xff] %vm353_vm1, %v11364_v63  ;;  %440 = vst.msk [vmem:[#allocation3 + $0xf8] sm:$0xff] %vm353_vm1, %v11364_v63 }
  0x44   : > { %9842 = vmatmul.mubr.msk.f32.gmra.mrb[24].mxu1 %vm353_vm1, %v521_v53  ;;  %441 = vst.msk [vmem:[#allocation3 + $0x100] sm:$0x3] %vm356_vm2, %v11364_v63  ;;  %444 = vst.msk [vmem:[#allocation3 + $0x118] sm:$0x3] %vm356_vm2, %v11364_v63 }
  0x45   : > { %9892 = vmatmul.mubr.msk.f32.gmra.mrb[24].mxu0 %vm353_vm1, %v488_v54  ;;  %9844 = vmatprep.mubr.msk.f32.mxu1 %vm353_vm1, %v522_v55  ;;  %442 = vst.msk [vmem:[#allocation3 + $0x108] sm:$0xff] %vm353_vm1, %v11364_v63  ;;  %443 = vst.msk [vmem:[#allocation3 + $0x110] sm:$0xff] %vm353_vm1, %v11364_v63 }
  0x46   : > { %9894 = vmatprep.mubr.msk.f32.mxu0 %vm353_vm1, %v489_v56  ;;  %445 = vst.msk [vmem:[#allocation3 + $0x120] sm:$0xff] %vm353_vm1, %v11364_v63  ;;  %446 = vst.msk [vmem:[#allocation3 + $0x128] sm:$0xff] %vm353_vm1, %v11364_v63 }
  0x47   : > { %447 = vst.msk [vmem:[#allocation3 + $0x130] sm:$0x3] %vm356_vm2, %v11364_v63  ;;  %450 = vst.msk [vmem:[#allocation3 + $0x148] sm:$0x3] %vm356_vm2, %v11364_v63 }
  0x48   : > { %9845 = vmatmul.mubr.msk.f32.gmra.mrb[26].mxu1 %vm353_vm1, %v523_v57  ;;  %448 = vst.msk [vmem:[#allocation3 + $0x138] sm:$0xff] %vm353_vm1, %v11364_v63  ;;  %449 = vst.msk [vmem:[#allocation3 + $0x140] sm:$0xff] %vm353_vm1, %v11364_v63 }
  0x49   : > { %9895 = vmatmul.mubr.msk.f32.gmra.mrb[26].mxu0 %vm353_vm1, %v490_v58  ;;  %9847 = vmatprep.mubr.msk.f32.mxu1 %vm353_vm1, %v524_v59  ;;  %451 = vst.msk [vmem:[#allocation3 + $0x150] sm:$0xff] %vm353_vm1, %v11364_v63  ;;  %452 = vst.msk [vmem:[#allocation3 + $0x158] sm:$0xff] %vm353_vm1, %v11364_v63 }
  0x4a   : > { %9897 = vmatprep.mubr.msk.f32.mxu0 %vm353_vm1, %v491_v60  ;;  %453 = vst.msk [vmem:[#allocation3 + $0x160] sm:$0x3] %vm356_vm2, %v11364_v63  ;;  %456 = vst.msk [vmem:[#allocation3 + $0x178] sm:$0x3] %vm356_vm2, %v11364_v63 }
  0x4b   : > { %454 = vst.msk [vmem:[#allocation3 + $0x168] sm:$0xff] %vm353_vm1, %v11364_v63  ;;  %455 = vst.msk [vmem:[#allocation3 + $0x170] sm:$0xff] %vm353_vm1, %v11364_v63 }
  0x4c   : > { %9848 = vmatmul.mubr.msk.f32.gmra.mrb[28].mxu1 %vm353_vm1, %v525_v61  ;;  %457 = vst.msk [vmem:[#allocation3 + $0x180] sm:$0xff] %vm353_vm1, %v11364_v63  ;;  %458 = vst.msk [vmem:[#allocation3 + $0x188] sm:$0xff] %vm353_vm1, %v11364_v63 }
  0x4d   : > { %9898 = vmatmul.mubr.msk.f32.gmra.mrb[28].mxu0 %vm353_vm1, %v492_v62  ;;  %459 = vst.msk [vmem:[#allocation3 + $0x190] sm:$0x3] %vm356_vm2, %v11364_v63  ;;  %462 = vst.msk [vmem:[#allocation3 + $0x1a8] sm:$0x3] %vm356_vm2, %v11364_v63  ;;  %9850 = vmatprep.mubr.msk.f32.mxu1 %vm353_vm1, %v526_v0 }
  0x4e   : > { %460 = vst.msk [vmem:[#allocation3 + $0x198] sm:$0xff] %vm353_vm1, %v11364_v63  ;;  %461 = vst.msk [vmem:[#allocation3 + $0x1a0] sm:$0xff] %vm353_vm1, %v11364_v63  ;;  %9900 = vmatprep.mubr.msk.f32.mxu0 %vm353_vm1, %v493_v1 }
  0x50   : > { %9851 = vmatmul.mubr.msk.f32.gmra.mrb[30].mxu1 %vm353_vm1, %v527_v2 }
  0x51   : > { %9901 = vmatmul.mubr.msk.f32.gmra.mrb[30].mxu0 %vm353_vm1, %v494_v3  ;;  %9905 = vmatprep.mubr.msk.f32.mxu1 %vm353_vm1, %v1315_v4 }
  0x54   : > { %9906 = vmatmul.mubr.msk.f32.vlgmr.msra.gmra.mrb[32].mxu1 %vm353_vm1, %v1316_v5 }
  0x55   : > { %9954 = vmatpush3.msk.msra.mxu1 %vm625_vm0, %v1314_v6 }
  0x56   : > { %10003 = vmatprep.subr.msk.mxu1 %vm625_vm0, %v11806_v7 }
  0xe7   : > { %v9807_v8 = vpop.f32.mrb[0].mxu1 }
  0xe8   : > { %v9857_v9 = vpop.f32.mrb[0].mxu0  ;;  %v695_v11 = vpop.f32.mrb[1].mxu1 }
  0xe9   : > { %v1025_v12 = vadd.f32 %v9857_v9, %v9807_v8  ;;  %v1019_v13 = vpop.f32.mrb[1].mxu0 }
  0xea   : > { %v1020_v14 = vadd.f32 %v1019_v13, %v695_v11 }
  0xeb   : > { %v1186_v15 = vadd.f32 %v11813_v10, %v1025_v12  ;;  %v9810_v16 = vpop.f32.mrb[2].mxu1 }
  0xec   : > { %v1185_v17 = vadd.f32 %v11813_v10, %v1020_v14  ;;  %v9860_v18 = vpop.f32.mrb[2].mxu0  ;;  %v705_v19 = vpop.f32.mrb[3].mxu1 }
  0xed   : > { %v1218_v20 = vmax.f32 %v1186_v15, 0.0  ;;  %v1035_v21 = vadd.f32 %v9860_v18, %v9810_v16  ;;  %v1029_v22 = vpop.f32.mrb[3].mxu0 }
  0xee   : > { %v1217_v23 = vmax.f32 %v1185_v17, 0.0  ;;  %v1030_v24 = vadd.f32 %v1029_v22, %v705_v19 }
  0xef   : > { %1251 = vst.msk [vmem:[#allocation2 + $0x21] sm:$0xff] %vm353_vm1, %v1218_v20  ;;  %v1188_v25 = vadd.f32 %v11813_v10, %v1035_v21  ;;  %v9813_v26 = vpop.f32.mrb[4].mxu1 }
  0xf0   : > { %1250 = vst.msk [vmem:[#allocation2 + $0x19] sm:$0xff] %vm353_vm1, %v1217_v23  ;;  %v1187_v27 = vadd.f32 %v11813_v10, %v1030_v24  ;;  %v9863_v28 = vpop.f32.mrb[4].mxu0  ;;  %v715_v29 = vpop.f32.mrb[5].mxu1 }
  0xf1   : > { %v1220_v30 = vmax.f32 %v1188_v25, 0.0  ;;  %v1045_v31 = vadd.f32 %v9863_v28, %v9813_v26  ;;  %v1039_v32 = vpop.f32.mrb[5].mxu0 }
  0xf2   : > { %v1219_v33 = vmax.f32 %v1187_v27, 0.0  ;;  %v1040_v34 = vadd.f32 %v1039_v32, %v715_v29 }
  0xf3   : > { %1253 = vst.msk [vmem:[#allocation2 + $0x39] sm:$0xff] %vm353_vm1, %v1220_v30  ;;  %v1190_v35 = vadd.f32 %v11813_v10, %v1045_v31  ;;  %v9816_v36 = vpop.f32.mrb[6].mxu1 }
  0xf4   : > { %1252 = vst.msk [vmem:[#allocation2 + $0x31] sm:$0xff] %vm353_vm1, %v1219_v33  ;;  %v1189_v37 = vadd.f32 %v11813_v10, %v1040_v34  ;;  %v9866_v38 = vpop.f32.mrb[6].mxu0  ;;  %v725_v39 = vpop.f32.mrb[7].mxu1 }
  0xf5   : > { %v1222_v40 = vmax.f32 %v1190_v35, 0.0  ;;  %v1055_v41 = vadd.f32 %v9866_v38, %v9816_v36  ;;  %v1049_v42 = vpop.f32.mrb[7].mxu0 }
  0xf6   : > { %v1221_v43 = vmax.f32 %v1189_v37, 0.0  ;;  %v1050_v44 = vadd.f32 %v1049_v42, %v725_v39  ;;  %v11833_v51 = vld [vmem:[#allocation2 + $0x21] sm:$0xff] }
  0xf7   : > { %1255 = vst.msk [vmem:[#allocation2 + $0x51] sm:$0xff] %vm353_vm1, %v1222_v40  ;;  %v1192_v45 = vadd.f32 %v11813_v10, %v1055_v41  ;;  %v9819_v46 = vpop.f32.mrb[8].mxu1  ;;  %v11827_v47 = vld [vmem:[#allocation2 + $0x19] sm:$0xff] }
  0xf8   : > { %1254 = vst.msk [vmem:[#allocation2 + $0x49] sm:$0xff] %vm353_vm1, %v1221_v43  ;;  %v1191_v48 = vadd.f32 %v11813_v10, %v1050_v44  ;;  %v9869_v49 = vpop.f32.mrb[8].mxu0  ;;  %9908 = vmatprep.mubr.msk.f32.mxu1 %vm353_vm1, %v11827_v47  ;;  %v735_v50 = vpop.f32.mrb[9].mxu1 }
  0xf9   : > { %v1224_v52 = vmax.f32 %v1192_v45, 0.0  ;;  %v1065_v53 = vadd.f32 %v9869_v49, %v9819_v46  ;;  %v1059_v54 = vpop.f32.mrb[9].mxu0  ;;  %9909 = vmatmul.mubr.msk.f32.gmra.mrb[34].mxu1 %vm353_vm1, %v11833_v51 }
  0xfa   : > { %v1223_v55 = vmax.f32 %v1191_v48, 0.0  ;;  %v1060_v56 = vadd.f32 %v1059_v54, %v735_v50  ;;  %v11845_v63 = vld [vmem:[#allocation2 + $0x39] sm:$0xff] }
  0xfb   : > { %1257 = vst.msk [vmem:[#allocation2 + $0x69] sm:$0xff] %vm353_vm1, %v1224_v52  ;;  %v1194_v57 = vadd.f32 %v11813_v10, %v1065_v53  ;;  %v9822_v58 = vpop.f32.mrb[10].mxu1  ;;  %v11839_v59 = vld [vmem:[#allocation2 + $0x31] sm:$0xff] }
  0xfc   : > { %1256 = vst.msk [vmem:[#allocation2 + $0x61] sm:$0xff] %vm353_vm1, %v1223_v55  ;;  %v1193_v60 = vadd.f32 %v11813_v10, %v1060_v56  ;;  %v9872_v61 = vpop.f32.mrb[10].mxu0  ;;  %9911 = vmatprep.mubr.msk.f32.mxu1 %vm353_vm1, %v11839_v59  ;;  %v745_v62 = vpop.f32.mrb[11].mxu1 }
  0xfd   : > { %v1226_v0 = vmax.f32 %v1194_v57, 0.0  ;;  %v1075_v1 = vadd.f32 %v9872_v61, %v9822_v58  ;;  %v1069_v2 = vpop.f32.mrb[11].mxu0  ;;  %9912 = vmatmul.mubr.msk.f32.gmra.mrb[36].mxu1 %vm353_vm1, %v11845_v63 }
  0xfe   : > { %v1225_v3 = vmax.f32 %v1193_v60, 0.0  ;;  %v1070_v4 = vadd.f32 %v1069_v2, %v745_v62  ;;  %v11857_v13 = vld [vmem:[#allocation2 + $0x51] sm:$0xff] }
  0xff   : > { %1259 = vst.msk [vmem:[#allocation2 + $0x81] sm:$0xff] %vm353_vm1, %v1226_v0  ;;  %v1196_v5 = vadd.f32 %v11813_v10, %v1075_v1  ;;  %v9825_v6 = vpop.f32.mrb[12].mxu1  ;;  %v11851_v8 = vld [vmem:[#allocation2 + $0x49] sm:$0xff] }
 0x100   : > { %1258 = vst.msk [vmem:[#allocation2 + $0x79] sm:$0xff] %vm353_vm1, %v1225_v3  ;;  %v1195_v9 = vadd.f32 %v11813_v10, %v1070_v4  ;;  %v9875_v11 = vpop.f32.mrb[12].mxu0  ;;  %9914 = vmatprep.mubr.msk.f32.mxu1 %vm353_vm1, %v11851_v8  ;;  %v755_v12 = vpop.f32.mrb[13].mxu1 }
 0x101   : > { %v1228_v14 = vmax.f32 %v1196_v5, 0.0  ;;  %v1085_v15 = vadd.f32 %v9875_v11, %v9825_v6  ;;  %v1079_v16 = vpop.f32.mrb[13].mxu0  ;;  %9915 = vmatmul.mubr.msk.f32.gmra.mrb[38].mxu1 %vm353_vm1, %v11857_v13 }
 0x102   : > { %v1227_v17 = vmax.f32 %v1195_v9, 0.0  ;;  %v1080_v18 = vadd.f32 %v1079_v16, %v755_v12  ;;  %v11869_v25 = vld [vmem:[#allocation2 + $0x69] sm:$0xff] }
 0x103   : > { %1261 = vst.msk [vmem:[#allocation2 + $0x99] sm:$0xff] %vm353_vm1, %v1228_v14  ;;  %v1198_v19 = vadd.f32 %v11813_v10, %v1085_v15  ;;  %v9828_v20 = vpop.f32.mrb[14].mxu1  ;;  %v11863_v21 = vld [vmem:[#allocation2 + $0x61] sm:$0xff] }
 0x104   : > { %1260 = vst.msk [vmem:[#allocation2 + $0x91] sm:$0xff] %vm353_vm1, %v1227_v17  ;;  %v1197_v22 = vadd.f32 %v11813_v10, %v1080_v18  ;;  %v9878_v23 = vpop.f32.mrb[14].mxu0  ;;  %9917 = vmatprep.mubr.msk.f32.mxu1 %vm353_vm1, %v11863_v21  ;;  %v765_v24 = vpop.f32.mrb[15].mxu1 }
 0x105   : > { %v1230_v26 = vmax.f32 %v1198_v19, 0.0  ;;  %v1095_v27 = vadd.f32 %v9878_v23, %v9828_v20  ;;  %v1089_v28 = vpop.f32.mrb[15].mxu0  ;;  %9918 = vmatmul.mubr.msk.f32.gmra.mrb[40].mxu1 %vm353_vm1, %v11869_v25 }
 0x106   : > { %v1229_v29 = vmax.f32 %v1197_v22, 0.0  ;;  %v1090_v30 = vadd.f32 %v1089_v28, %v765_v24  ;;  %v11881_v37 = vld [vmem:[#allocation2 + $0x81] sm:$0xff] }
 0x107   : > { %1263 = vst.msk [vmem:[#allocation2 + $0xb1] sm:$0xff] %vm353_vm1, %v1230_v26  ;;  %v1200_v31 = vadd.f32 %v11813_v10, %v1095_v27  ;;  %v9831_v32 = vpop.f32.mrb[16].mxu1  ;;  %v11875_v33 = vld [vmem:[#allocation2 + $0x79] sm:$0xff] }
 0x108   : > { %1262 = vst.msk [vmem:[#allocation2 + $0xa9] sm:$0xff] %vm353_vm1, %v1229_v29  ;;  %v1199_v34 = vadd.f32 %v11813_v10, %v1090_v30  ;;  %v9881_v35 = vpop.f32.mrb[16].mxu0  ;;  %9920 = vmatprep.mubr.msk.f32.mxu1 %vm353_vm1, %v11875_v33  ;;  %v775_v36 = vpop.f32.mrb[17].mxu1 }
 0x109   : > { %v1232_v38 = vmax.f32 %v1200_v31, 0.0  ;;  %v1105_v39 = vadd.f32 %v9881_v35, %v9831_v32  ;;  %v1099_v40 = vpop.f32.mrb[17].mxu0  ;;  %9921 = vmatmul.mubr.msk.f32.gmra.mrb[42].mxu1 %vm353_vm1, %v11881_v37 }
 0x10a   : > { %v1231_v41 = vmax.f32 %v1199_v34, 0.0  ;;  %v1100_v42 = vadd.f32 %v1099_v40, %v775_v36  ;;  %v11893_v50 = vld [vmem:[#allocation2 + $0x99] sm:$0xff] }
 0x10b   : > { %1265 = vst.msk [vmem:[#allocation2 + $0xc9] sm:$0xff] %vm353_vm1, %v1232_v38  ;;  %v1202_v43 = vadd.f32 %v11813_v10, %v1105_v39  ;;  %v9834_v44 = vpop.f32.mrb[18].mxu1  ;;  %v11887_v45 = vld [vmem:[#allocation2 + $0x91] sm:$0xff] }
 0x10c   : > { %1264 = vst.msk [vmem:[#allocation2 + $0xc1] sm:$0xff] %vm353_vm1, %v1231_v41  ;;  %v1201_v46 = vadd.f32 %v11813_v10, %v1100_v42  ;;  %v9884_v48 = vpop.f32.mrb[18].mxu0  ;;  %9923 = vmatprep.mubr.msk.f32.mxu1 %vm353_vm1, %v11887_v45  ;;  %v785_v49 = vpop.f32.mrb[19].mxu1 }
 0x10d   : > { %v1234_v52 = vmax.f32 %v1202_v43, 0.0  ;;  %v1115_v53 = vadd.f32 %v9884_v48, %v9834_v44  ;;  %v1109_v54 = vpop.f32.mrb[19].mxu0  ;;  %9924 = vmatmul.mubr.msk.f32.gmra.mrb[44].mxu1 %vm353_vm1, %v11893_v50 }
 0x10e   : > { %v1233_v55 = vmax.f32 %v1201_v46, 0.0  ;;  %v1110_v56 = vadd.f32 %v1109_v54, %v785_v49  ;;  %v11905_v1 = vld [vmem:[#allocation2 + $0xb1] sm:$0xff] }
 0x10f   : > { %1267 = vst.msk [vmem:[#allocation2 + $0xe1] sm:$0xff] %vm353_vm1, %v1234_v52  ;;  %v1204_v57 = vadd.f32 %v11813_v10, %v1115_v53  ;;  %v9837_v58 = vpop.f32.mrb[20].mxu1  ;;  %v11899_v60 = vld [vmem:[#allocation2 + $0xa9] sm:$0xff] }
 0x110   : > { %1266 = vst.msk [vmem:[#allocation2 + $0xd9] sm:$0xff] %vm353_vm1, %v1233_v55  ;;  %v1203_v61 = vadd.f32 %v11813_v10, %v1110_v56  ;;  %v9887_v62 = vpop.f32.mrb[20].mxu0  ;;  %9926 = vmatprep.mubr.msk.f32.mxu1 %vm353_vm1, %v11899_v60  ;;  %v795_v0 = vpop.f32.mrb[21].mxu1 }
 0x111   : > { %v1236_v2 = vmax.f32 %v1204_v57, 0.0  ;;  %v1125_v3 = vadd.f32 %v9887_v62, %v9837_v58  ;;  %v1119_v4 = vpop.f32.mrb[21].mxu0  ;;  %9927 = vmatmul.mubr.msk.f32.gmra.mrb[46].mxu1 %vm353_vm1, %v11905_v1 }
 0x112   : > { %v1235_v5 = vmax.f32 %v1203_v61, 0.0  ;;  %v1120_v6 = vadd.f32 %v1119_v4, %v795_v0  ;;  %v11917_v17 = vld [vmem:[#allocation2 + $0xc9] sm:$0xff] }
 0x113   : > { %1269 = vst.msk [vmem:[#allocation2 + $0xf9] sm:$0xff] %vm353_vm1, %v1236_v2  ;;  %v1206_v9 = vadd.f32 %v11813_v10, %v1125_v3  ;;  %v9840_v11 = vpop.f32.mrb[22].mxu1  ;;  %v11911_v12 = vld [vmem:[#allocation2 + $0xc1] sm:$0xff] }
 0x114   : > { %1268 = vst.msk [vmem:[#allocation2 + $0xf1] sm:$0xff] %vm353_vm1, %v1235_v5  ;;  %v1205_v14 = vadd.f32 %v11813_v10, %v1120_v6  ;;  %v9890_v15 = vpop.f32.mrb[22].mxu0  ;;  %9929 = vmatprep.mubr.msk.f32.mxu1 %vm353_vm1, %v11911_v12  ;;  %v805_v16 = vpop.f32.mrb[23].mxu1 }
 0x115   : > { %v1238_v18 = vmax.f32 %v1206_v9, 0.0  ;;  %v1135_v19 = vadd.f32 %v9890_v15, %v9840_v11  ;;  %v1129_v20 = vpop.f32.mrb[23].mxu0  ;;  %9930 = vmatmul.mubr.msk.f32.gmra.mrb[48].mxu1 %vm353_vm1, %v11917_v17 }
 0x116   : > { %v1237_v22 = vmax.f32 %v1205_v14, 0.0  ;;  %v1130_v23 = vadd.f32 %v1129_v20, %v805_v16  ;;  %v11929_v31 = vld [vmem:[#allocation2 + $0xe1] sm:$0xff] }
 0x117   : > { %1271 = vst.msk [vmem:[#allocation2 + $0x111] sm:$0xff] %vm353_vm1, %v1238_v18  ;;  %v1208_v24 = vadd.f32 %v11813_v10, %v1135_v19  ;;  %v9843_v26 = vpop.f32.mrb[24].mxu1  ;;  %v11923_v27 = vld [vmem:[#allocation2 + $0xd9] sm:$0xff] }
 0x118   : > { %1270 = vst.msk [vmem:[#allocation2 + $0x109] sm:$0xff] %vm353_vm1, %v1237_v22  ;;  %v1207_v28 = vadd.f32 %v11813_v10, %v1130_v23  ;;  %v9893_v29 = vpop.f32.mrb[24].mxu0  ;;  %9932 = vmatprep.mubr.msk.f32.mxu1 %vm353_vm1, %v11923_v27  ;;  %v815_v30 = vpop.f32.mrb[25].mxu1 }
 0x119   : > { %v1240_v32 = vmax.f32 %v1208_v24, 0.0  ;;  %v1145_v34 = vadd.f32 %v9893_v29, %v9843_v26  ;;  %v1139_v35 = vpop.f32.mrb[25].mxu0  ;;  %9933 = vmatmul.mubr.msk.f32.gmra.mrb[50].mxu1 %vm353_vm1, %v11929_v31  ;;  %v1282_v26 = vld [vmem:[#allocation2] sm:$0xff]  ;;  %v1283_v29 = vld [vmem:[#allocation2 + $0x8] sm:$0xff] }
 0x11a   : > { %v1239_v36 = vmax.f32 %v1207_v28, 0.0  ;;  %v1140_v38 = vadd.f32 %v1139_v35, %v815_v30  ;;  %v11941_v46 = vld [vmem:[#allocation2 + $0xf9] sm:$0xff]  ;;  %v11999_v30 = vld [vmem:[%s13647_s5 + $0xc] sm:$0xf]  ;;  %v12014_v35 = vld [vmem:[#allocation2 + $0x30] sm:$0xff] }
 0x11b   : > { %1273 = vst.msk [vmem:[#allocation2 + $0x129] sm:$0xff] %vm353_vm1, %v1240_v32  ;;  %v1210_v39 = vadd.f32 %v11813_v10, %v1145_v34  ;;  %v9846_v40 = vpop.f32.mrb[26].mxu1  ;;  %v11935_v41 = vld [vmem:[#allocation2 + $0xf1] sm:$0xff]  ;;  %v12010_v34 = vld [vmem:[#allocation2 + $0x20] sm:$0xff] }
 0x11c   : > { %1272 = vst.msk [vmem:[#allocation2 + $0x121] sm:$0xff] %vm353_vm1, %v1239_v36  ;;  %v1209_v42 = vadd.f32 %v11813_v10, %v1140_v38  ;;  %v9896_v43 = vpop.f32.mrb[26].mxu0  ;;  %9935 = vmatprep.mubr.msk.f32.mxu1 %vm353_vm1, %v11935_v41  ;;  %v825_v44 = vpop.f32.mrb[27].mxu1  ;;  %v12002_v32 = vld [vmem:[#allocation2 + $0x18] sm:$0xff]  ;;  %v12026_v38 = vld [vmem:[#allocation2 + $0x50] sm:$0xff] }
 0x11d   : > { %v1242_v48 = vmax.f32 %v1210_v39, 0.0  ;;  %v1155_v49 = vadd.f32 %v9896_v43, %v9846_v40  ;;  %v1149_v52 = vpop.f32.mrb[27].mxu0  ;;  %9936 = vmatmul.mubr.msk.f32.gmra.mrb[52].mxu1 %vm353_vm1, %v11941_v46  ;;  %v12018_v36 = vld [vmem:[#allocation2 + $0x38] sm:$0xff]  ;;  %v12030_v39 = vld [vmem:[#allocation2 + $0x60] sm:$0xff]  ;;  %v12034_v43 = vld [vmem:[#allocation2 + $0x68] sm:$0xff] }
 0x11e   : > { %v1241_v53 = vmax.f32 %v1209_v42, 0.0  ;;  %v1150_v54 = vadd.f32 %v1149_v52, %v825_v44  ;;  %v11953_v0 = vld [vmem:[#allocation2 + $0x111] sm:$0xff] }
 0x11f   : > { %1275 = vst.msk [vmem:[#allocation2 + $0x141] sm:$0xff] %vm353_vm1, %v1242_v48  ;;  %v1212_v55 = vadd.f32 %v11813_v10, %v1155_v49  ;;  %v9849_v56 = vpop.f32.mrb[28].mxu1  ;;  %v11947_v57 = vld [vmem:[#allocation2 + $0x109] sm:$0xff]  ;;  %v12038_v52 = vld [vmem:[#allocation2 + $0x78] sm:$0xff] }
 0x120   : > { %1274 = vst.msk [vmem:[#allocation2 + $0x139] sm:$0xff] %vm353_vm1, %v1241_v53  ;;  %v1211_v58 = vadd.f32 %v11813_v10, %v1150_v54  ;;  %v9899_v61 = vpop.f32.mrb[28].mxu0  ;;  %9938 = vmatprep.mubr.msk.f32.mxu1 %vm353_vm1, %v11947_v57  ;;  %v835_v62 = vpop.f32.mrb[29].mxu1 }
 0x121   : > { %v1244_v2 = vmax.f32 %v1212_v55, 0.0  ;;  %v1165_v3 = vadd.f32 %v9899_v61, %v9849_v56  ;;  %v1159_v4 = vpop.f32.mrb[29].mxu0  ;;  %9939 = vmatmul.mubr.msk.f32.gmra.mrb[54].mxu1 %vm353_vm1, %v11953_v0  ;;  %v12044_v56 = vld [vmem:[#allocation2 + $0x80] sm:$0xff]  ;;  %v12048_v61 = vld [vmem:[#allocation2 + $0x90] sm:$0xff] }
 0x122   : > { %v1243_v5 = vmax.f32 %v1211_v58, 0.0  ;;  %v1160_v6 = vadd.f32 %v1159_v4, %v835_v62  ;;  %v11965_v15 = vld [vmem:[#allocation2 + $0x129] sm:$0xff]  ;;  %v12066_v4 = vld [vmem:[#allocation2 + $0xc0] sm:$0xff] }
 0x123   : > { %1277 = vst.msk [vmem:[#allocation2 + $0x159] sm:$0xff] %vm353_vm1, %v1244_v2  ;;  %v1214_v9 = vadd.f32 %v11813_v10, %v1165_v3  ;;  %v11959_v11 = vld [vmem:[#allocation2 + $0x121] sm:$0xff]  ;;  %v9852_v40 = vpop.f32.mrb[30].mxu1  ;;  %v12054_v2 = vld [vmem:[#allocation2 + $0x98] sm:$0xff]  ;;  %v12062_v3 = vld [vmem:[#allocation2 + $0xb0] sm:$0xff] }
 0x124   : > { %1276 = vst.msk [vmem:[#allocation2 + $0x151] sm:$0xff] %vm353_vm1, %v1243_v5  ;;  %v1213_v14 = vadd.f32 %v11813_v10, %v1160_v6  ;;  %9941 = vmatprep.mubr.msk.f32.mxu1 %vm353_vm1, %v11959_v11  ;;  %v9902_v42 = vpop.f32.mrb[30].mxu0  ;;  %v845_v48 = vpop.f32.mrb[31].mxu1  ;;  %v12070_v5 = vld [vmem:[#allocation2 + $0xc8] sm:$0xff]  ;;  %v12074_v6 = vld [vmem:[#allocation2 + $0xd8] sm:$0xff] }
 0x125   : > { %v1246_v16 = vmax.f32 %v1214_v9, 0.0  ;;  %9942 = vmatmul.mubr.msk.f32.gmra.mrb[56].mxu1 %vm353_vm1, %v11965_v15  ;;  %v1175_v44 = vadd.f32 %v9902_v42, %v9852_v40  ;;  %v1169_v49 = vpop.f32.mrb[31].mxu0  ;;  %v12078_v9 = vld [vmem:[#allocation2 + $0xe0] sm:$0xff]  ;;  %v12102_v40 = vld [vmem:[#allocation2 + $0x128] sm:$0xff] }
 0x126   : > { %v1245_v18 = vmax.f32 %v1213_v14, 0.0  ;;  %v11975_v20 = vld [vmem:[#allocation2 + $0x141] sm:$0xff]  ;;  %v1170_v53 = vadd.f32 %v1169_v49, %v845_v48  ;;  %v12082_v14 = vld [vmem:[#allocation2 + $0xf0] sm:$0xff] }
 0x127   : > { %1279 = vst.msk [vmem:[#allocation2 + $0x171] sm:$0xff] %vm353_vm1, %v1246_v16  ;;  %v11970_v19 = vld [vmem:[#allocation2 + $0x139] sm:$0xff]  ;;  %v1216_v54 = vadd.f32 %v11813_v10, %v1175_v44 }
 0x128   : > { %1278 = vst.msk [vmem:[#allocation2 + $0x169] sm:$0xff] %vm353_vm1, %v1245_v18  ;;  %9944 = vmatprep.mubr.msk.f32.mxu1 %vm353_vm1, %v11970_v19  ;;  %v1215_v55 = vadd.f32 %v11813_v10, %v1170_v53  ;;  %v12058_v10 = vld [vmem:[#allocation2 + $0xa8] sm:$0xff]  ;;  %v12086_v16 = vld [vmem:[#allocation2 + $0xf8] sm:$0xff]  ;;  %v12110_v44 = vld [vmem:[#allocation2 + $0x140] sm:$0xff] }
 0x129   : > { %9945 = vmatmul.mubr.msk.f32.gmra.mrb[58].mxu1 %vm353_vm1, %v11975_v20  ;;  %v1248_v58 = vmax.f32 %v1216_v54, 0.0  ;;  %v12090_v18 = vld [vmem:[#allocation2 + $0x108] sm:$0xff]  ;;  %v12106_v42 = vld [vmem:[#allocation2 + $0x138] sm:$0xff] }
 0x12a   : > { %v11983_v23 = vld [vmem:[#allocation2 + $0x159] sm:$0xff]  ;;  %v1247_v62 = vmax.f32 %v1215_v55, 0.0  ;;  %v1997_v54 = vld [vmem:[#allocation2 + $0x2] sm:$0xff] }
 0x12b   : > { %v11979_v22 = vld [vmem:[#allocation2 + $0x151] sm:$0xff]  ;;  %1281 = vst.msk [vmem:[#allocation2 + $0x189] sm:$0xff] %vm353_vm1, %v1248_v58 }
 0x12c   : > { %9947 = vmatprep.mubr.msk.f32.mxu1 %vm353_vm1, %v11979_v22  ;;  %1280 = vst.msk [vmem:[#allocation2 + $0x181] sm:$0xff] %vm353_vm1, %v1247_v62  ;;  %v12114_v48 = vld [vmem:[#allocation2 + $0x150] sm:$0xff]  ;;  %v12118_v49 = vld [vmem:[#allocation2 + $0x158] sm:$0xff] }
 0x12d   : > { %9948 = vmatmul.mubr.msk.f32.gmra.mrb[60].mxu1 %vm353_vm1, %v11983_v23  ;;  %v1998_v58 = vld [vmem:[#allocation2 + $0xa] sm:$0xff] }
 0x12e   : > { %v11991_v28 = vld [vmem:[#allocation2 + $0x171] sm:$0xff] }
 0x12f   : > { %v11987_v24 = vld [vmem:[#allocation2 + $0x169] sm:$0xff]  ;;  %13763 = vst [vmem:[#allocation5_spill] sm:$0xff] %v11991_v28 }
 0x130   : > { %13762 = vst [vmem:[#allocation4_spill] sm:$0xff] %v11987_v24  ;;  %9950 = vmatprep.mubr.msk.f32.mxu1 %vm353_vm1, %v11987_v24  ;;  %v12122_v53 = vld [vmem:[#allocation2 + $0x168] sm:$0xff]  ;;  %v12126_v55 = vld [vmem:[#allocation2 + $0x170] sm:$0xff] }
 0x131   : > { %9951 = vmatmul.mubr.msk.f32.gmra.mrb[62].mxu1 %vm353_vm1, %v11991_v28  ;;  %v12134_v62 = vld [vmem:[%s13647_s5 + $0x10] sm:$0xf]  ;;  %v12137_v28 = vld [vmem:[#allocation2 + $0x1a] sm:$0xff] }
 0x132   : > { %9955 = vmatprep.mubr.msk.f32.mxu1 %vm353_vm1, %v1282_v26  ;;  %v12094_v26 = vld [vmem:[#allocation2 + $0x110] sm:$0xff]  ;;  %13764 = vst [vmem:[#allocation6_spill] sm:$0xff] %v12137_v28 }
 0x133   : > { %v12149_v24 = vld [vmem:[#allocation2 + $0x32] sm:$0xff] }
 0x134   : > { %13766 = vst [vmem:[#allocation8_spill] sm:$0xff] %v12149_v24 }
 0x135   : > { %9956 = vmatmul.mubr.msk.f32.vlgmr.msra.gmra.mrb[32].mxu1 %vm353_vm1, %v1283_v29  ;;  %v12098_v29 = vld [vmem:[#allocation2 + $0x120] sm:$0xff] }
 0x136   : > { %10004 = vmatpush3.msk.msra.mxu1 %vm625_vm0, %v11806_v7  ;;  %9958 = vmatprep.mubr.msk.f32.mxu1 %vm353_vm1, %v12002_v32  ;;  %v12022_v7 = vld [vmem:[#allocation2 + $0x48] sm:$0xff] }
 0x137   : > { %10053 = vmatprep.subr.msk.mxu1 %vm625_vm0, %v11999_v30 }
 0x139   : > { %9959 = vmatmul.mubr.msk.f32.gmra.mrb[34].mxu1 %vm353_vm1, %v12010_v34 }
 0x13a   : > { %9961 = vmatprep.mubr.msk.f32.mxu1 %vm353_vm1, %v12014_v35 }
 0x13d   : > { %9962 = vmatmul.mubr.msk.f32.gmra.mrb[36].mxu1 %vm353_vm1, %v12018_v36 }
 0x13e   : > { %9964 = vmatprep.mubr.msk.f32.mxu1 %vm353_vm1, %v12022_v7 }
 0x141   : > { %9965 = vmatmul.mubr.msk.f32.gmra.mrb[38].mxu1 %vm353_vm1, %v12026_v38 }
 0x142   : > { %9967 = vmatprep.mubr.msk.f32.mxu1 %vm353_vm1, %v12030_v39 }
 0x145   : > { %9968 = vmatmul.mubr.msk.f32.gmra.mrb[40].mxu1 %vm353_vm1, %v12034_v43 }
 0x146   : > { %9970 = vmatprep.mubr.msk.f32.mxu1 %vm353_vm1, %v12038_v52 }
 0x149   : > { %9971 = vmatmul.mubr.msk.f32.gmra.mrb[42].mxu1 %vm353_vm1, %v12044_v56 }
 0x14a   : > { %9973 = vmatprep.mubr.msk.f32.mxu1 %vm353_vm1, %v12048_v61 }
 0x14d   : > { %9974 = vmatmul.mubr.msk.f32.gmra.mrb[44].mxu1 %vm353_vm1, %v12054_v2 }
 0x14e   : > { %9976 = vmatprep.mubr.msk.f32.mxu1 %vm353_vm1, %v12058_v10 }
 0x151   : > { %9977 = vmatmul.mubr.msk.f32.gmra.mrb[46].mxu1 %vm353_vm1, %v12062_v3 }
 0x152   : > { %9979 = vmatprep.mubr.msk.f32.mxu1 %vm353_vm1, %v12066_v4 }
 0x155   : > { %9980 = vmatmul.mubr.msk.f32.gmra.mrb[48].mxu1 %vm353_vm1, %v12070_v5 }
 0x156   : > { %9982 = vmatprep.mubr.msk.f32.mxu1 %vm353_vm1, %v12074_v6 }
 0x159   : > { %9983 = vmatmul.mubr.msk.f32.gmra.mrb[50].mxu1 %vm353_vm1, %v12078_v9 }
 0x15a   : > { %9985 = vmatprep.mubr.msk.f32.mxu1 %vm353_vm1, %v12082_v14 }
 0x15d   : > { %9986 = vmatmul.mubr.msk.f32.gmra.mrb[52].mxu1 %vm353_vm1, %v12086_v16 }
 0x15e   : > { %9988 = vmatprep.mubr.msk.f32.mxu1 %vm353_vm1, %v12090_v18 }
 0x161   : > { %9989 = vmatmul.mubr.msk.f32.gmra.mrb[54].mxu1 %vm353_vm1, %v12094_v26 }
 0x162   : > { %9991 = vmatprep.mubr.msk.f32.mxu1 %vm353_vm1, %v12098_v29 }
 0x165   : > { %9992 = vmatmul.mubr.msk.f32.gmra.mrb[56].mxu1 %vm353_vm1, %v12102_v40 }
 0x166   : > { %9994 = vmatprep.mubr.msk.f32.mxu1 %vm353_vm1, %v12106_v42 }
 0x169   : > { %9995 = vmatmul.mubr.msk.f32.gmra.mrb[58].mxu1 %vm353_vm1, %v12110_v44 }
 0x16a   : > { %9997 = vmatprep.mubr.msk.f32.mxu1 %vm353_vm1, %v12114_v48 }
 0x16d   : > { %9998 = vmatmul.mubr.msk.f32.gmra.mrb[60].mxu1 %vm353_vm1, %v12118_v49 }
 0x16e   : > { %10000 = vmatprep.mubr.msk.f32.mxu1 %vm353_vm1, %v12122_v53 }
 0x171   : > { %10001 = vmatmul.mubr.msk.f32.gmra.mrb[62].mxu1 %vm353_vm1, %v12126_v55 }
 0x172   : > { %10005 = vmatprep.mubr.msk.f32.mxu1 %vm353_vm1, %v1997_v54  ;;  %v12145_v54 = vld [vmem:[#allocation2 + $0x22] sm:$0xff] }
 0x173   : > { %13765 = vst [vmem:[#allocation7_spill] sm:$0xff] %v12145_v54 }
 0x175   : > { %10006 = vmatmul.mubr.msk.f32.vlgmr.msra.gmra.mrb[32].mxu1 %vm353_vm1, %v1998_v58  ;;  %v12153_v58 = vld [vmem:[#allocation2 + $0x3a] sm:$0xff] }
 0x176   : > { %10054 = vmatpush3.msk.msra.mxu1 %vm625_vm0, %v11999_v30  ;;  %10008 = vmatprep.mubr.msk.f32.mxu1 %vm353_vm1, %v12137_v28  ;;  %13767 = vst [vmem:[#allocation9_spill] sm:$0xff] %v12153_v58  ;;  %v12157_v30 = vld [vmem:[#allocation2 + $0x4a] sm:$0xff]  ;;  %v12161_v28 = vld [vmem:[#allocation2 + $0x52] sm:$0xff] }
 0x177   : > { %10103 = vmatprep.subr.msk.mxu1 %vm625_vm0, %v12134_v62  ;;  %13768 = vst [vmem:[#allocation10_spill] sm:$0xff] %v12157_v30  ;;  %13769 = vst [vmem:[#allocation11_spill] sm:$0xff] %v12161_v28 }
 0x179   : > { %10009 = vmatmul.mubr.msk.f32.gmra.mrb[34].mxu1 %vm353_vm1, %v12145_v54  ;;  %v12165_v54 = vld [vmem:[#allocation2 + $0x62] sm:$0xff] }
 0x17a   : > { %10011 = vmatprep.mubr.msk.f32.mxu1 %vm353_vm1, %v12149_v24  ;;  %13770 = vst [vmem:[#allocation12_spill] sm:$0xff] %v12165_v54  ;;  %v12169_v24 = vld [vmem:[#allocation2 + $0x6a] sm:$0xff] }
 0x17b   : > { %13771 = vst [vmem:[#allocation13_spill] sm:$0xff] %v12169_v24 }
 0x17d   : > { %10012 = vmatmul.mubr.msk.f32.gmra.mrb[36].mxu1 %vm353_vm1, %v12153_v58  ;;  %v12173_v58 = vld [vmem:[#allocation2 + $0x7a] sm:$0xff] }
 0x17e   : > { %10014 = vmatprep.mubr.msk.f32.mxu1 %vm353_vm1, %v12157_v30  ;;  %13772 = vst [vmem:[#allocation14_spill] sm:$0xff] %v12173_v58  ;;  %v12177_v30 = vld [vmem:[#allocation2 + $0x82] sm:$0xff] }
 0x17f   : > { %13773 = vst [vmem:[#allocation15_spill] sm:$0xff] %v12177_v30 }
 0x181   : > { %10015 = vmatmul.mubr.msk.f32.gmra.mrb[38].mxu1 %vm353_vm1, %v12161_v28  ;;  %v12181_v28 = vld [vmem:[#allocation2 + $0x92] sm:$0xff] }
 0x182   : > { %10017 = vmatprep.mubr.msk.f32.mxu1 %vm353_vm1, %v12165_v54  ;;  %13774 = vst [vmem:[#allocation16_spill] sm:$0xff] %v12181_v28  ;;  %v12185_v54 = vld [vmem:[#allocation2 + $0x9a] sm:$0xff] }
 0x183   : > { %13775 = vst [vmem:[#allocation17_spill] sm:$0xff] %v12185_v54 }
 0x185   : > { %10018 = vmatmul.mubr.msk.f32.gmra.mrb[40].mxu1 %vm353_vm1, %v12169_v24  ;;  %v12189_v24 = vld [vmem:[#allocation2 + $0xaa] sm:$0xff] }
 0x186   : > { %10020 = vmatprep.mubr.msk.f32.mxu1 %vm353_vm1, %v12173_v58  ;;  %13776 = vst [vmem:[#allocation18_spill] sm:$0xff] %v12189_v24  ;;  %v12193_v58 = vld [vmem:[#allocation2 + $0xb2] sm:$0xff] }
 0x187   : > { %13777 = vst [vmem:[#allocation19_spill] sm:$0xff] %v12193_v58 }
 0x189   : > { %10021 = vmatmul.mubr.msk.f32.gmra.mrb[42].mxu1 %vm353_vm1, %v12177_v30  ;;  %v12197_v30 = vld [vmem:[#allocation2 + $0xc2] sm:$0xff] }
 0x18a   : > { %10023 = vmatprep.mubr.msk.f32.mxu1 %vm353_vm1, %v12181_v28  ;;  %13778 = vst [vmem:[#allocation20_spill] sm:$0xff] %v12197_v30  ;;  %v12201_v28 = vld [vmem:[#allocation2 + $0xca] sm:$0xff] }
 0x18b   : > { %13779 = vst [vmem:[#allocation21_spill] sm:$0xff] %v12201_v28 }
 0x18d   : > { %10024 = vmatmul.mubr.msk.f32.gmra.mrb[44].mxu1 %vm353_vm1, %v12185_v54  ;;  %v12205_v54 = vld [vmem:[#allocation2 + $0xda] sm:$0xff] }
 0x18e   : > { %10026 = vmatprep.mubr.msk.f32.mxu1 %vm353_vm1, %v12189_v24  ;;  %13780 = vst [vmem:[#allocation22_spill] sm:$0xff] %v12205_v54  ;;  %v12209_v24 = vld [vmem:[#allocation2 + $0xe2] sm:$0xff] }
 0x18f   : > { %13781 = vst [vmem:[#allocation23_spill] sm:$0xff] %v12209_v24 }
 0x191   : > { %10027 = vmatmul.mubr.msk.f32.gmra.mrb[46].mxu1 %vm353_vm1, %v12193_v58  ;;  %v12213_v58 = vld [vmem:[#allocation2 + $0xf2] sm:$0xff] }
 0x192   : > { %10029 = vmatprep.mubr.msk.f32.mxu1 %vm353_vm1, %v12197_v30  ;;  %13782 = vst [vmem:[#allocation24_spill] sm:$0xff] %v12213_v58  ;;  %v12217_v30 = vld [vmem:[#allocation2 + $0xfa] sm:$0xff] }
 0x193   : > { %13783 = vst [vmem:[#allocation25_spill] sm:$0xff] %v12217_v30 }
 0x195   : > { %10030 = vmatmul.mubr.msk.f32.gmra.mrb[48].mxu1 %vm353_vm1, %v12201_v28  ;;  %v12221_v28 = vld [vmem:[#allocation2 + $0x10a] sm:$0xff] }
 0x196   : > { %10032 = vmatprep.mubr.msk.f32.mxu1 %vm353_vm1, %v12205_v54  ;;  %13784 = vst [vmem:[#allocation26_spill] sm:$0xff] %v12221_v28  ;;  %v12225_v54 = vld [vmem:[#allocation2 + $0x112] sm:$0xff] }
 0x197   : > { %13785 = vst [vmem:[#allocation27_spill] sm:$0xff] %v12225_v54 }
 0x199   : > { %10033 = vmatmul.mubr.msk.f32.gmra.mrb[50].mxu1 %vm353_vm1, %v12209_v24  ;;  %v12229_v24 = vld [vmem:[#allocation2 + $0x122] sm:$0xff] }
 0x19a   : > { %10035 = vmatprep.mubr.msk.f32.mxu1 %vm353_vm1, %v12213_v58  ;;  %13786 = vst [vmem:[#allocation28_spill] sm:$0xff] %v12229_v24  ;;  %v12233_v58 = vld [vmem:[#allocation2 + $0x12a] sm:$0xff] }
 0x19b   : > { %13787 = vst [vmem:[#allocation29_spill] sm:$0xff] %v12233_v58 }
 0x19d   : > { %10036 = vmatmul.mubr.msk.f32.gmra.mrb[52].mxu1 %vm353_vm1, %v12217_v30  ;;  %v12237_v30 = vld [vmem:[#allocation2 + $0x13a] sm:$0xff] }
 0x19e   : > { %10038 = vmatprep.mubr.msk.f32.mxu1 %vm353_vm1, %v12221_v28  ;;  %13788 = vst [vmem:[#allocation30_spill] sm:$0xff] %v12237_v30  ;;  %v12241_v28 = vld [vmem:[#allocation2 + $0x142] sm:$0xff] }
 0x1a1   : > { %10039 = vmatmul.mubr.msk.f32.gmra.mrb[54].mxu1 %vm353_vm1, %v12225_v54  ;;  %v12245_v54 = vld [vmem:[#allocation2 + $0x152] sm:$0xff] }
 0x1a2   : > { %10041 = vmatprep.mubr.msk.f32.mxu1 %vm353_vm1, %v12229_v24  ;;  %13789 = vst [vmem:[#allocation31_spill] sm:$0xff] %v12245_v54  ;;  %v12249_v24 = vld [vmem:[#allocation2 + $0x15a] sm:$0xff] }
 0x1a5   : > { %10042 = vmatmul.mubr.msk.f32.gmra.mrb[56].mxu1 %vm353_vm1, %v12233_v58  ;;  %v12253_v58 = vld [vmem:[#allocation2 + $0x16a] sm:$0xff] }
 0x1a6   : > { %10044 = vmatprep.mubr.msk.f32.mxu1 %vm353_vm1, %v12237_v30  ;;  %13790 = vst [vmem:[#allocation32_spill] sm:$0xff] %v12253_v58  ;;  %v12257_v30 = vld [vmem:[#allocation2 + $0x172] sm:$0xff] }
 0x1a9   : > { %10045 = vmatmul.mubr.msk.f32.gmra.mrb[58].mxu1 %vm353_vm1, %v12241_v28 }
 0x1aa   : > { %10047 = vmatprep.mubr.msk.f32.mxu1 %vm353_vm1, %v12245_v54  ;;  %v8695_v54 = vld [vmem:[%s13647_s5 + $0x14] sm:$0xf] }
 0x1ad   : > { %10048 = vmatmul.mubr.msk.f32.gmra.mrb[60].mxu1 %vm353_vm1, %v12249_v24 }
 0x1ae   : > { %10050 = vmatprep.mubr.msk.f32.mxu1 %vm353_vm1, %v12253_v58 }
 0x1b1   : > { %10051 = vmatmul.mubr.msk.f32.gmra.mrb[62].mxu1 %vm353_vm1, %v12257_v30 }
 0x1b2   : > { %10055 = vmatprep.mubr.msk.f32.mxu1 %vm353_vm1, %v12002_v32  ;;  %v12327_v32 = vld [vmem:[#allocation2 + $0x180] sm:$0xff] }
 0x1b5   : > { %10056 = vmatmul.mubr.msk.f32.vlgmr.msra.gmra.mrb[32].mxu1 %vm353_vm1, %v12010_v34  ;;  %v12331_v34 = vld [vmem:[#allocation2 + $0x188] sm:$0xff] }
 0x1b6   : > { %10104 = vmatpush3.msk.msra.mxu1 %vm625_vm0, %v12134_v62  ;;  %10058 = vmatprep.mubr.msk.f32.mxu1 %vm353_vm1, %v12014_v35  ;;  %v8729_v62 = vld [vmem:[%s13647_s5 + $0x18] sm:$0xf] }
 0x1b7   : > { %10153 = vmatprep.subr.msk.mxu1 %vm625_vm0, %v8695_v54 }
 0x1b9   : > { %10059 = vmatmul.mubr.msk.f32.gmra.mrb[34].mxu1 %vm353_vm1, %v12018_v36 }
 0x1ba   : > { %10061 = vmatprep.mubr.msk.f32.mxu1 %vm353_vm1, %v12022_v7 }
 0x1bd   : > { %10062 = vmatmul.mubr.msk.f32.gmra.mrb[36].mxu1 %vm353_vm1, %v12026_v38 }
 0x1be   : > { %10064 = vmatprep.mubr.msk.f32.mxu1 %vm353_vm1, %v12030_v39 }
 0x1c1   : > { %10065 = vmatmul.mubr.msk.f32.gmra.mrb[38].mxu1 %vm353_vm1, %v12034_v43 }
 0x1c2   : > { %10067 = vmatprep.mubr.msk.f32.mxu1 %vm353_vm1, %v12038_v52 }
 0x1c5   : > { %10068 = vmatmul.mubr.msk.f32.gmra.mrb[40].mxu1 %vm353_vm1, %v12044_v56 }
 0x1c6   : > { %10070 = vmatprep.mubr.msk.f32.mxu1 %vm353_vm1, %v12048_v61 }
 0x1c9   : > { %10071 = vmatmul.mubr.msk.f32.gmra.mrb[42].mxu1 %vm353_vm1, %v12054_v2 }
 0x1ca   : > { %10073 = vmatprep.mubr.msk.f32.mxu1 %vm353_vm1, %v12058_v10 }
 0x1cd   : > { %10074 = vmatmul.mubr.msk.f32.gmra.mrb[44].mxu1 %vm353_vm1, %v12062_v3 }
 0x1ce   : > { %10076 = vmatprep.mubr.msk.f32.mxu1 %vm353_vm1, %v12066_v4 }
 0x1d1   : > { %10077 = vmatmul.mubr.msk.f32.gmra.mrb[46].mxu1 %vm353_vm1, %v12070_v5 }
 0x1d2   : > { %10079 = vmatprep.mubr.msk.f32.mxu1 %vm353_vm1, %v12074_v6 }
 0x1d5   : > { %10080 = vmatmul.mubr.msk.f32.gmra.mrb[48].mxu1 %vm353_vm1, %v12078_v9 }
 0x1d6   : > { %10082 = vmatprep.mubr.msk.f32.mxu1 %vm353_vm1, %v12082_v14 }
 0x1d9   : > { %10083 = vmatmul.mubr.msk.f32.gmra.mrb[50].mxu1 %vm353_vm1, %v12086_v16 }
 0x1da   : > { %10085 = vmatprep.mubr.msk.f32.mxu1 %vm353_vm1, %v12090_v18 }
 0x1dd   : > { %10086 = vmatmul.mubr.msk.f32.gmra.mrb[52].mxu1 %vm353_vm1, %v12094_v26 }
 0x1de   : > { %10088 = vmatprep.mubr.msk.f32.mxu1 %vm353_vm1, %v12098_v29 }
 0x1e1   : > { %10089 = vmatmul.mubr.msk.f32.gmra.mrb[54].mxu1 %vm353_vm1, %v12102_v40 }
 0x1e2   : > { %10091 = vmatprep.mubr.msk.f32.mxu1 %vm353_vm1, %v12106_v42 }
 0x1e5   : > { %10092 = vmatmul.mubr.msk.f32.gmra.mrb[56].mxu1 %vm353_vm1, %v12110_v44 }
 0x1e6   : > { %10094 = vmatprep.mubr.msk.f32.mxu1 %vm353_vm1, %v12114_v48 }
 0x1e9   : > { %10095 = vmatmul.mubr.msk.f32.gmra.mrb[58].mxu1 %vm353_vm1, %v12118_v49 }
 0x1ea   : > { %10097 = vmatprep.mubr.msk.f32.mxu1 %vm353_vm1, %v12122_v53 }
 0x1ed   : > { %10098 = vmatmul.mubr.msk.f32.gmra.mrb[60].mxu1 %vm353_vm1, %v12126_v55 }
 0x1ee   : > { %10100 = vmatprep.mubr.msk.f32.mxu1 %vm353_vm1, %v12327_v32 }
 0x1f1   : > { %10101 = vmatmul.mubr.msk.f32.gmra.mrb[62].mxu1 %vm353_vm1, %v12331_v34 }
 0x1f2   : > { %10105 = vmatprep.mubr.msk.f32.mxu1 %vm353_vm1, %v11827_v47  ;;  %v13791_v47 = vld [vmem:[#allocation4_spill] sm:$0xff] }
 0x1f5   : > { %10106 = vmatmul.mubr.msk.f32.vlgmr.msra.gmra.mrb[32].mxu1 %vm353_vm1, %v11833_v51  ;;  %v13792_v51 = vld [vmem:[#allocation5_spill] sm:$0xff] }
 0x1f6   : > { %10154 = vmatpush3.msk.msra.mxu1 %vm625_vm0, %v8695_v54  ;;  %10108 = vmatprep.mubr.msk.f32.mxu1 %vm353_vm1, %v11839_v59  ;;  %v12400_v59 = vld [vmem:[#allocation2 + $0x181] sm:$0xff] }
 0x1f7   : > { %10203 = vmatprep.subr.msk.mxu1 %vm625_vm0, %v8729_v62  ;;  %v13803_v54 = vld [vmem:[#allocation16_spill] sm:$0xff] }
 0x1f9   : > { %10109 = vmatmul.mubr.msk.f32.gmra.mrb[34].mxu1 %vm353_vm1, %v11845_v63  ;;  %v12404_v63 = vld [vmem:[#allocation2 + $0x189] sm:$0xff] }
 0x1fa   : > { %10111 = vmatprep.mubr.msk.f32.mxu1 %vm353_vm1, %v11851_v8  ;;  %v13793_v8 = vld [vmem:[#allocation6_spill] sm:$0xff] }
 0x1fd   : > { %10112 = vmatmul.mubr.msk.f32.gmra.mrb[36].mxu1 %vm353_vm1, %v11857_v13  ;;  %v8763_v13 = vld [vmem:[%s13647_s5 + $0x1c] sm:$0xf] }
 0x1fe   : > { %10114 = vmatprep.mubr.msk.f32.mxu1 %vm353_vm1, %v11863_v21  ;;  %v13794_v21 = vld [vmem:[#allocation7_spill] sm:$0xff] }
 0x201   : > { %10115 = vmatmul.mubr.msk.f32.gmra.mrb[38].mxu1 %vm353_vm1, %v11869_v25  ;;  %v13795_v25 = vld [vmem:[#allocation8_spill] sm:$0xff] }
 0x202   : > { %10117 = vmatprep.mubr.msk.f32.mxu1 %vm353_vm1, %v11875_v33  ;;  %v13796_v33 = vld [vmem:[#allocation9_spill] sm:$0xff] }
 0x205   : > { %10118 = vmatmul.mubr.msk.f32.gmra.mrb[40].mxu1 %vm353_vm1, %v11881_v37  ;;  %v13797_v37 = vld [vmem:[#allocation10_spill] sm:$0xff] }
 0x206   : > { %10120 = vmatprep.mubr.msk.f32.mxu1 %vm353_vm1, %v11887_v45  ;;  %v13798_v45 = vld [vmem:[#allocation11_spill] sm:$0xff] }
 0x209   : > { %10121 = vmatmul.mubr.msk.f32.gmra.mrb[42].mxu1 %vm353_vm1, %v11893_v50  ;;  %v13799_v50 = vld [vmem:[#allocation12_spill] sm:$0xff] }
 0x20a   : > { %10123 = vmatprep.mubr.msk.f32.mxu1 %vm353_vm1, %v11899_v60  ;;  %v13800_v60 = vld [vmem:[#allocation13_spill] sm:$0xff] }
 0x20d   : > { %10124 = vmatmul.mubr.msk.f32.gmra.mrb[44].mxu1 %vm353_vm1, %v11905_v1  ;;  %v13801_v1 = vld [vmem:[#allocation14_spill] sm:$0xff] }
 0x20e   : > { %10126 = vmatprep.mubr.msk.f32.mxu1 %vm353_vm1, %v11911_v12  ;;  %v13802_v12 = vld [vmem:[#allocation15_spill] sm:$0xff] }
 0x211   : > { %10127 = vmatmul.mubr.msk.f32.gmra.mrb[46].mxu1 %vm353_vm1, %v11917_v17 }
 0x212   : > { %10129 = vmatprep.mubr.msk.f32.mxu1 %vm353_vm1, %v11923_v27 }
 0x215   : > { %10130 = vmatmul.mubr.msk.f32.gmra.mrb[48].mxu1 %vm353_vm1, %v11929_v31 }
 0x216   : > { %10132 = vmatprep.mubr.msk.f32.mxu1 %vm353_vm1, %v11935_v41 }
 0x219   : > { %10133 = vmatmul.mubr.msk.f32.gmra.mrb[50].mxu1 %vm353_vm1, %v11941_v46 }
 0x21a   : > { %10135 = vmatprep.mubr.msk.f32.mxu1 %vm353_vm1, %v11947_v57 }
 0x21d   : > { %10136 = vmatmul.mubr.msk.f32.gmra.mrb[52].mxu1 %vm353_vm1, %v11953_v0 }
 0x21e   : > { %10138 = vmatprep.mubr.msk.f32.mxu1 %vm353_vm1, %v11959_v11 }
 0x221   : > { %10139 = vmatmul.mubr.msk.f32.gmra.mrb[54].mxu1 %vm353_vm1, %v11965_v15 }
 0x222   : > { %10141 = vmatprep.mubr.msk.f32.mxu1 %vm353_vm1, %v11970_v19 }
 0x225   : > { %10142 = vmatmul.mubr.msk.f32.gmra.mrb[56].mxu1 %vm353_vm1, %v11975_v20 }
 0x226   : > { %10144 = vmatprep.mubr.msk.f32.mxu1 %vm353_vm1, %v11979_v22 }
 0x229   : > { %10145 = vmatmul.mubr.msk.f32.gmra.mrb[58].mxu1 %vm353_vm1, %v11983_v23 }
 0x22a   : > { %10147 = vmatprep.mubr.msk.f32.mxu1 %vm353_vm1, %v13791_v47 }
 0x22d   : > { %10148 = vmatmul.mubr.msk.f32.gmra.mrb[60].mxu1 %vm353_vm1, %v13792_v51 }
 0x22e   : > { %10150 = vmatprep.mubr.msk.f32.mxu1 %vm353_vm1, %v12400_v59 }
 0x231   : > { %10151 = vmatmul.mubr.msk.f32.gmra.mrb[62].mxu1 %vm353_vm1, %v12404_v63 }
 0x232   : > { %10155 = vmatprep.mubr.msk.f32.mxu1 %vm353_vm1, %v13793_v8  ;;  %v13805_v8 = vld [vmem:[#allocation18_spill] sm:$0xff] }
 0x235   : > { %10156 = vmatmul.mubr.msk.f32.vlgmr.msra.gmra.mrb[32].mxu1 %vm353_vm1, %v13794_v21  ;;  %v13806_v21 = vld [vmem:[#allocation19_spill] sm:$0xff] }
 0x236   : > { %10204 = vmatpush3.msk.msra.mxu1 %vm625_vm0, %v8729_v62  ;;  %10158 = vmatprep.mubr.msk.f32.mxu1 %vm353_vm1, %v13795_v25  ;;  %v13804_v62 = vld [vmem:[#allocation17_spill] sm:$0xff] }
 0x237   : > { %10253 = vmatprep.subr.msk.mxu1 %vm625_vm0, %v8763_v13 }
 0x239   : > { %10159 = vmatmul.mubr.msk.f32.gmra.mrb[34].mxu1 %vm353_vm1, %v13796_v33 }
 0x23a   : > { %10161 = vmatprep.mubr.msk.f32.mxu1 %vm353_vm1, %v13797_v37 }
 0x23d   : > { %10162 = vmatmul.mubr.msk.f32.gmra.mrb[36].mxu1 %vm353_vm1, %v13798_v45 }
 0x23e   : > { %10164 = vmatprep.mubr.msk.f32.mxu1 %vm353_vm1, %v13799_v50  ;;  %v13807_v50 = vld [vmem:[#allocation20_spill] sm:$0xff] }
 0x241   : > { %10165 = vmatmul.mubr.msk.f32.gmra.mrb[38].mxu1 %vm353_vm1, %v13800_v60  ;;  %v13808_v60 = vld [vmem:[#allocation21_spill] sm:$0xff] }
 0x242   : > { %10167 = vmatprep.mubr.msk.f32.mxu1 %vm353_vm1, %v13801_v1  ;;  %v13809_v1 = vld [vmem:[#allocation22_spill] sm:$0xff] }
 0x245   : > { %10168 = vmatmul.mubr.msk.f32.gmra.mrb[40].mxu1 %vm353_vm1, %v13802_v12  ;;  %v13810_v12 = vld [vmem:[#allocation23_spill] sm:$0xff] }
 0x246   : > { %10170 = vmatprep.mubr.msk.f32.mxu1 %vm353_vm1, %v13803_v54  ;;  %v13811_v54 = vld [vmem:[#allocation24_spill] sm:$0xff] }
 0x249   : > { %10171 = vmatmul.mubr.msk.f32.gmra.mrb[42].mxu1 %vm353_vm1, %v13804_v62  ;;  %v13812_v62 = vld [vmem:[#allocation25_spill] sm:$0xff] }
 0x24a   : > { %10173 = vmatprep.mubr.msk.f32.mxu1 %vm353_vm1, %v13805_v8  ;;  %v13813_v8 = vld [vmem:[#allocation26_spill] sm:$0xff] }
 0x24d   : > { %10174 = vmatmul.mubr.msk.f32.gmra.mrb[44].mxu1 %vm353_vm1, %v13806_v21  ;;  %v13814_v21 = vld [vmem:[#allocation27_spill] sm:$0xff] }
 0x24e   : > { %10176 = vmatprep.mubr.msk.f32.mxu1 %vm353_vm1, %v13807_v50  ;;  %v13815_v50 = vld [vmem:[#allocation28_spill] sm:$0xff] }
 0x251   : > { %10177 = vmatmul.mubr.msk.f32.gmra.mrb[46].mxu1 %vm353_vm1, %v13808_v60  ;;  %v13816_v60 = vld [vmem:[#allocation29_spill] sm:$0xff] }
 0x252   : > { %10179 = vmatprep.mubr.msk.f32.mxu1 %vm353_vm1, %v13809_v1  ;;  %v13817_v1 = vld [vmem:[#allocation30_spill] sm:$0xff] }
 0x255   : > { %10180 = vmatmul.mubr.msk.f32.gmra.mrb[48].mxu1 %vm353_vm1, %v13810_v12 }
 0x256   : > { %10182 = vmatprep.mubr.msk.f32.mxu1 %vm353_vm1, %v13811_v54  ;;  %v13818_v54 = vld [vmem:[#allocation31_spill] sm:$0xff] }
 0x259   : > { %10183 = vmatmul.mubr.msk.f32.gmra.mrb[50].mxu1 %vm353_vm1, %v13812_v62 }
 0x25a   : > { %10185 = vmatprep.mubr.msk.f32.mxu1 %vm353_vm1, %v13813_v8 }
 0x25d   : > { %10186 = vmatmul.mubr.msk.f32.gmra.mrb[52].mxu1 %vm353_vm1, %v13814_v21 }
 0x25e   : > { %10188 = vmatprep.mubr.msk.f32.mxu1 %vm353_vm1, %v13815_v50  ;;  %v12473_v50 = vld [vmem:[#allocation2 + $0x182] sm:$0xff] }
 0x261   : > { %10189 = vmatmul.mubr.msk.f32.gmra.mrb[54].mxu1 %vm353_vm1, %v13816_v60 }
 0x262   : > { %10191 = vmatprep.mubr.msk.f32.mxu1 %vm353_vm1, %v13817_v1  ;;  %v12477_v1 = vld [vmem:[#allocation2 + $0x18a] sm:$0xff] }
 0x265   : > { %10192 = vmatmul.mubr.msk.f32.gmra.mrb[56].mxu1 %vm353_vm1, %v12241_v28 }
 0x266   : > { %10194 = vmatprep.mubr.msk.f32.mxu1 %vm353_vm1, %v13818_v54 }
 0x269   : > { %10195 = vmatmul.mubr.msk.f32.gmra.mrb[58].mxu1 %vm353_vm1, %v12249_v24 }
 0x26a   : > { %10197 = vmatprep.mubr.msk.f32.mxu1 %vm353_vm1, %v12253_v58  ;;  %v8797_v58 = vld [vmem:[%s13647_s5 + $0x20] sm:$0xf] }
 0x26d   : > { %10198 = vmatmul.mubr.msk.f32.gmra.mrb[60].mxu1 %vm353_vm1, %v12257_v30 }
 0x26e   : > { %10200 = vmatprep.mubr.msk.f32.mxu1 %vm353_vm1, %v12473_v50 }
 0x271   : > { %10201 = vmatmul.mubr.msk.f32.gmra.mrb[62].mxu1 %vm353_vm1, %v12477_v1 }
 0x272   : > { %10205 = vmatprep.mubr.msk.f32.mxu1 %vm353_vm1, %v12014_v35  ;;  %v3588_v35 = vld [vmem:[#allocation2 + $0x198] sm:$0xff] }
 0x275   : > { %10206 = vmatmul.mubr.msk.f32.vlgmr.msra.gmra.mrb[32].mxu1 %vm353_vm1, %v12018_v36  ;;  %v3589_v36 = vld [vmem:[#allocation2 + $0x1a0] sm:$0xff] }
 0x276   : > { %10254 = vmatpush3.msk.msra.mxu1 %vm625_vm0, %v8763_v13  ;;  %10208 = vmatprep.mubr.msk.f32.mxu1 %vm353_vm1, %v12022_v7  ;;  %v3948_v7 = vld [vmem:[#allocation2 + $0x31] sm:$0xff] }
 0x277   : > { %10303 = vmatprep.subr.msk.mxu1 %vm625_vm0, %v8797_v58 }
 0x279   : > { %10209 = vmatmul.mubr.msk.f32.gmra.mrb[34].mxu1 %vm353_vm1, %v12026_v38  ;;  %v8832_v38 = vld [vmem:[%s13649_s7 + $0x4] sm:$0xf] }
 0x27a   : > { %10211 = vmatprep.mubr.msk.f32.mxu1 %vm353_vm1, %v12030_v39  ;;  %10353 = vmatprep.subr.msk.mxu0 %vm625_vm0, %v8832_v38  ;;  %v3949_v39 = vld [vmem:[#allocation2 + $0x39] sm:$0xff] }
 0x27b   : > { %10354 = vmatpush3.msk.msra.mxu0 %vm625_vm0, %v8832_v38 }
 0x27d   : > { %10212 = vmatmul.mubr.msk.f32.gmra.mrb[36].mxu1 %vm353_vm1, %v12034_v43  ;;  %v3950_v43 = vld [vmem:[#allocation2 + $0x49] sm:$0xff] }
 0x27e   : > { %10214 = vmatprep.mubr.msk.f32.mxu1 %vm353_vm1, %v12038_v52  ;;  %v3951_v52 = vld [vmem:[#allocation2 + $0x51] sm:$0xff] }
 0x281   : > { %10215 = vmatmul.mubr.msk.f32.gmra.mrb[38].mxu1 %vm353_vm1, %v12044_v56  ;;  %v3952_v56 = vld [vmem:[#allocation2 + $0x61] sm:$0xff] }
 0x282   : > { %10217 = vmatprep.mubr.msk.f32.mxu1 %vm353_vm1, %v12048_v61  ;;  %v3953_v61 = vld [vmem:[#allocation2 + $0x69] sm:$0xff] }
 0x285   : > { %10218 = vmatmul.mubr.msk.f32.gmra.mrb[40].mxu1 %vm353_vm1, %v12054_v2  ;;  %v3954_v2 = vld [vmem:[#allocation2 + $0x79] sm:$0xff] }
 0x286   : > { %10220 = vmatprep.mubr.msk.f32.mxu1 %vm353_vm1, %v12058_v10  ;;  %v3955_v10 = vld [vmem:[#allocation2 + $0x81] sm:$0xff] }
 0x289   : > { %10221 = vmatmul.mubr.msk.f32.gmra.mrb[42].mxu1 %vm353_vm1, %v12062_v3  ;;  %v3956_v3 = vld [vmem:[#allocation2 + $0x91] sm:$0xff] }
 0x28a   : > { %10223 = vmatprep.mubr.msk.f32.mxu1 %vm353_vm1, %v12066_v4  ;;  %v3957_v4 = vld [vmem:[#allocation2 + $0x99] sm:$0xff] }
 0x28d   : > { %10224 = vmatmul.mubr.msk.f32.gmra.mrb[44].mxu1 %vm353_vm1, %v12070_v5  ;;  %v3958_v5 = vld [vmem:[#allocation2 + $0xa9] sm:$0xff] }
 0x28e   : > { %10226 = vmatprep.mubr.msk.f32.mxu1 %vm353_vm1, %v12074_v6  ;;  %v3959_v6 = vld [vmem:[#allocation2 + $0xb1] sm:$0xff] }
 0x291   : > { %10227 = vmatmul.mubr.msk.f32.gmra.mrb[46].mxu1 %vm353_vm1, %v12078_v9  ;;  %v3960_v9 = vld [vmem:[#allocation2 + $0xc1] sm:$0xff] }
 0x292   : > { %10229 = vmatprep.mubr.msk.f32.mxu1 %vm353_vm1, %v12082_v14  ;;  %v13830_v14 = vld [vmem:[#allocation24_spill] sm:$0xff] }
 0x295   : > { %10230 = vmatmul.mubr.msk.f32.gmra.mrb[48].mxu1 %vm353_vm1, %v12086_v16  ;;  %v13831_v16 = vld [vmem:[#allocation28_spill] sm:$0xff] }
 0x296   : > { %10232 = vmatprep.mubr.msk.f32.mxu1 %vm353_vm1, %v12090_v18  ;;  %v13832_v18 = vld [vmem:[#allocation30_spill] sm:$0xff] }
 0x299   : > { %10233 = vmatmul.mubr.msk.f32.gmra.mrb[50].mxu1 %vm353_vm1, %v12094_v26  ;;  %v13833_v26 = vld [vmem:[#allocation32_spill] sm:$0xff] }
 0x29a   : > { %10235 = vmatprep.mubr.msk.f32.mxu1 %vm353_vm1, %v12098_v29  ;;  %v4368_v29 = vld [vmem:[#allocation2 + $0x19a] sm:$0xff] }
 0x29d   : > { %10236 = vmatmul.mubr.msk.f32.gmra.mrb[52].mxu1 %vm353_vm1, %v12102_v40  ;;  %v4865_v40 = vld [vmem:[#allocation3 + $0x1] sm:$0xff] }
 0x29e   : > { %10238 = vmatprep.mubr.msk.f32.mxu1 %vm353_vm1, %v12106_v42  ;;  %10355 = vmatprep.mubr.msk.f32.mxu0 %vm353_vm1, %v4865_v40  ;;  %v4864_v42 = vld [vmem:[%s13649_s7] sm:$0xf] }
 0x29f   : > { %10403 = vmatprep.subr.msk.mxu0 %vm625_vm0, %v4864_v42 }
 0x2a1   : > { %10239 = vmatmul.mubr.msk.f32.gmra.mrb[54].mxu1 %vm353_vm1, %v12110_v44  ;;  %v12675_v44 = vld [vmem:[%s13649_s7 + $0x8] sm:$0xf] }
 0x2a2   : > { %10241 = vmatprep.mubr.msk.f32.mxu1 %vm353_vm1, %v12114_v48  ;;  %v12682_v48 = vld [vmem:[%s13648_s6] ss:$0 sm:$0xff] }
 0x2a5   : > { %10242 = vmatmul.mubr.msk.f32.gmra.mrb[56].mxu1 %vm353_vm1, %v12118_v49 }
 0x2a6   : > { %10244 = vmatprep.mubr.msk.f32.mxu1 %vm353_vm1, %v12122_v53 }
 0x2a9   : > { %10245 = vmatmul.mubr.msk.f32.gmra.mrb[58].mxu1 %vm353_vm1, %v12126_v55 }
 0x2aa   : > { %10247 = vmatprep.mubr.msk.f32.mxu1 %vm353_vm1, %v12327_v32 }
 0x2ad   : > { %10248 = vmatmul.mubr.msk.f32.gmra.mrb[60].mxu1 %vm353_vm1, %v12331_v34 }
 0x2ae   : > { %10250 = vmatprep.mubr.msk.f32.mxu1 %vm353_vm1, %v3588_v35 }
 0x2b1   : > { %10251 = vmatmul.mubr.msk.f32.gmra.mrb[62].mxu1 %vm353_vm1, %v3589_v36 }
 0x2b2   : > { %10255 = vmatprep.mubr.msk.f32.mxu1 %vm353_vm1, %v3948_v7 }
 0x2b5   : > { %10256 = vmatmul.mubr.msk.f32.vlgmr.msra.gmra.mrb[32].mxu1 %vm353_vm1, %v3949_v39 }
 0x2b6   : > { %10304 = vmatpush3.msk.msra.mxu1 %vm625_vm0, %v8797_v58  ;;  %10258 = vmatprep.mubr.msk.f32.mxu1 %vm353_vm1, %v3950_v43 }
 0x2b9   : > { %10259 = vmatmul.mubr.msk.f32.gmra.mrb[34].mxu1 %vm353_vm1, %v3951_v52 }
 0x2ba   : > { %10261 = vmatprep.mubr.msk.f32.mxu1 %vm353_vm1, %v3952_v56 }
 0x2bd   : > { %10262 = vmatmul.mubr.msk.f32.gmra.mrb[36].mxu1 %vm353_vm1, %v3953_v61 }
 0x2be   : > { %10264 = vmatprep.mubr.msk.f32.mxu1 %vm353_vm1, %v3954_v2 }
 0x2c1   : > { %10265 = vmatmul.mubr.msk.f32.gmra.mrb[38].mxu1 %vm353_vm1, %v3955_v10 }
 0x2c2   : > { %10267 = vmatprep.mubr.msk.f32.mxu1 %vm353_vm1, %v3956_v3 }
 0x2c5   : > { %10268 = vmatmul.mubr.msk.f32.gmra.mrb[40].mxu1 %vm353_vm1, %v3957_v4 }
 0x2c6   : > { %10270 = vmatprep.mubr.msk.f32.mxu1 %vm353_vm1, %v3958_v5 }
 0x2c9   : > { %10271 = vmatmul.mubr.msk.f32.gmra.mrb[42].mxu1 %vm353_vm1, %v3959_v6 }
 0x2ca   : > { %10273 = vmatprep.mubr.msk.f32.mxu1 %vm353_vm1, %v3960_v9 }
 0x2cd   : > { %10274 = vmatmul.mubr.msk.f32.gmra.mrb[44].mxu1 %vm353_vm1, %v11917_v17  ;;  %v3978_v17 = vld [vmem:[#allocation2 + $0x199] sm:$0xff] }
 0x2ce   : > { %10276 = vmatprep.mubr.msk.f32.mxu1 %vm353_vm1, %v11923_v27  ;;  %v3979_v27 = vld [vmem:[#allocation2 + $0x1a1] sm:$0xff] }
 0x2d1   : > { %10277 = vmatmul.mubr.msk.f32.gmra.mrb[46].mxu1 %vm353_vm1, %v11929_v31  ;;  %v13819_v31 = vld [vmem:[#allocation12_spill] sm:$0xff] }
 0x2d2   : > { %10279 = vmatprep.mubr.msk.f32.mxu1 %vm353_vm1, %v11935_v41  ;;  %v13820_v41 = vld [vmem:[#allocation13_spill] sm:$0xff] }
 0x2d5   : > { %10280 = vmatmul.mubr.msk.f32.gmra.mrb[48].mxu1 %vm353_vm1, %v11941_v46  ;;  %v13821_v46 = vld [vmem:[#allocation14_spill] sm:$0xff] }
 0x2d6   : > { %10282 = vmatprep.mubr.msk.f32.mxu1 %vm353_vm1, %v11947_v57  ;;  %v13822_v57 = vld [vmem:[#allocation15_spill] sm:$0xff] }
 0x2d9   : > { %10283 = vmatmul.mubr.msk.f32.gmra.mrb[50].mxu1 %vm353_vm1, %v11953_v0  ;;  %v13823_v0 = vld [vmem:[#allocation16_spill] sm:$0xff] }
 0x2da   : > { %10285 = vmatprep.mubr.msk.f32.mxu1 %vm353_vm1, %v11959_v11  ;;  %v13824_v11 = vld [vmem:[#allocation17_spill] sm:$0xff] }
 0x2dd   : > { %10286 = vmatmul.mubr.msk.f32.gmra.mrb[52].mxu1 %vm353_vm1, %v11965_v15  ;;  %v13825_v15 = vld [vmem:[#allocation18_spill] sm:$0xff] }
 0x2de   : > { %10288 = vmatprep.mubr.msk.f32.mxu1 %vm353_vm1, %v11970_v19  ;;  %v13826_v19 = vld [vmem:[#allocation19_spill] sm:$0xff] }
 0x2e1   : > { %10289 = vmatmul.mubr.msk.f32.gmra.mrb[54].mxu1 %vm353_vm1, %v11975_v20  ;;  %v13827_v20 = vld [vmem:[#allocation20_spill] sm:$0xff] }
 0x2e2   : > { %10291 = vmatprep.mubr.msk.f32.mxu1 %vm353_vm1, %v11979_v22  ;;  %v13828_v22 = vld [vmem:[#allocation21_spill] sm:$0xff] }
 0x2e5   : > { %10292 = vmatmul.mubr.msk.f32.gmra.mrb[56].mxu1 %vm353_vm1, %v11983_v23  ;;  %v13829_v23 = vld [vmem:[#allocation22_spill] sm:$0xff] }
 0x2e6   : > { %10294 = vmatprep.mubr.msk.f32.mxu1 %vm353_vm1, %v13791_v47 }
 0x2e9   : > { %10295 = vmatmul.mubr.msk.f32.gmra.mrb[58].mxu1 %vm353_vm1, %v13792_v51 }
 0x2ea   : > { %10297 = vmatprep.mubr.msk.f32.mxu1 %vm353_vm1, %v12400_v59 }
 0x2ed   : > { %10298 = vmatmul.mubr.msk.f32.gmra.mrb[60].mxu1 %vm353_vm1, %v12404_v63 }
 0x2ee   : > { %10300 = vmatprep.mubr.msk.f32.mxu1 %vm353_vm1, %v3978_v17 }
 0x2f1   : > { %10301 = vmatmul.mubr.msk.f32.gmra.mrb[62].mxu1 %vm353_vm1, %v3979_v27 }
 0x2f2   : > { %10305 = vmatprep.mubr.msk.f32.mxu1 %vm353_vm1, %v13795_v25 }
 0x2f5   : > { %10306 = vmatmul.mubr.msk.f32.vlgmr.msra.gmra.mrb[32].mxu1 %vm353_vm1, %v13796_v33 }
 0x2f6   : > { %10308 = vmatprep.mubr.msk.f32.mxu1 %vm353_vm1, %v13797_v37 }
 0x2f9   : > { %10309 = vmatmul.mubr.msk.f32.gmra.mrb[34].mxu1 %vm353_vm1, %v13798_v45 }
 0x2fa   : > { %10311 = vmatprep.mubr.msk.f32.mxu1 %vm353_vm1, %v13819_v31 }
 0x2fd   : > { %10312 = vmatmul.mubr.msk.f32.gmra.mrb[36].mxu1 %vm353_vm1, %v13820_v41 }
 0x2fe   : > { %10314 = vmatprep.mubr.msk.f32.mxu1 %vm353_vm1, %v13821_v46 }
 0x301   : > { %10315 = vmatmul.mubr.msk.f32.gmra.mrb[38].mxu1 %vm353_vm1, %v13822_v57 }
 0x302   : > { %10317 = vmatprep.mubr.msk.f32.mxu1 %vm353_vm1, %v13823_v0 }
 0x305   : > { %10318 = vmatmul.mubr.msk.f32.gmra.mrb[40].mxu1 %vm353_vm1, %v13824_v11 }
 0x306   : > { %10320 = vmatprep.mubr.msk.f32.mxu1 %vm353_vm1, %v13825_v15 }
 0x309   : > { %10321 = vmatmul.mubr.msk.f32.gmra.mrb[42].mxu1 %vm353_vm1, %v13826_v19 }
 0x30a   : > { %10323 = vmatprep.mubr.msk.f32.mxu1 %vm353_vm1, %v13827_v20 }
 0x30d   : > { %10324 = vmatmul.mubr.msk.f32.gmra.mrb[44].mxu1 %vm353_vm1, %v13828_v22 }
 0x30e   : > { %10326 = vmatprep.mubr.msk.f32.mxu1 %vm353_vm1, %v13829_v23 }
 0x311   : > { %10327 = vmatmul.mubr.msk.f32.gmra.mrb[46].mxu1 %vm353_vm1, %v13810_v12 }
 0x312   : > { %10329 = vmatprep.mubr.msk.f32.mxu1 %vm353_vm1, %v13830_v14 }
 0x315   : > { %10330 = vmatmul.mubr.msk.f32.gmra.mrb[48].mxu1 %vm353_vm1, %v13812_v62 }
 0x316   : > { %10332 = vmatprep.mubr.msk.f32.mxu1 %vm353_vm1, %v13813_v8 }
 0x319   : > { %10333 = vmatmul.mubr.msk.f32.gmra.mrb[50].mxu1 %vm353_vm1, %v13814_v21 }
 0x31a   : > { %10335 = vmatprep.mubr.msk.f32.mxu1 %vm353_vm1, %v13831_v16 }
 0x31d   : > { %10336 = vmatmul.mubr.msk.f32.gmra.mrb[52].mxu1 %vm353_vm1, %v13816_v60 }
 0x31e   : > { %10338 = vmatprep.mubr.msk.f32.mxu1 %vm353_vm1, %v13832_v18 }
 0x321   : > { %10339 = vmatmul.mubr.msk.f32.gmra.mrb[54].mxu1 %vm353_vm1, %v12241_v28  ;;  %v4369_v28 = vld [vmem:[#allocation2 + $0x1a2] sm:$0xff] }
 0x322   : > { %10341 = vmatprep.mubr.msk.f32.mxu1 %vm353_vm1, %v13818_v54 }
 0x325   : > { %10342 = vmatmul.mubr.msk.f32.gmra.mrb[56].mxu1 %vm353_vm1, %v12249_v24  ;;  %v4866_v24 = vld [vmem:[#allocation3 + $0x9] sm:$0xff] }
 0x326   : > { %10344 = vmatprep.mubr.msk.f32.mxu1 %vm353_vm1, %v13833_v26  ;;  %10356 = vmatmul.mubr.msk.f32.vlgmr.msra.gmra.mrb[32].mxu0 %vm353_vm1, %v4866_v24 }
 0x327   : > { %10404 = vmatpush3.msk.msra.mxu0 %vm625_vm0, %v4864_v42 }
 0x328   : > { %10453 = vmatprep.subr.msk.mxu0 %vm625_vm0, %v12675_v44 }
 0x329   : > { %10345 = vmatmul.mubr.msk.f32.gmra.mrb[58].mxu1 %vm353_vm1, %v12257_v30 }
 0x32a   : > { %10347 = vmatprep.mubr.msk.f32.mxu1 %vm353_vm1, %v12473_v50 }
 0x32d   : > { %10348 = vmatmul.mubr.msk.f32.gmra.mrb[60].mxu1 %vm353_vm1, %v12477_v1 }
 0x32e   : > { %10350 = vmatprep.mubr.msk.f32.mxu1 %vm353_vm1, %v4368_v29 }
 0x331   : > { %10351 = vmatmul.mubr.msk.f32.gmra.mrb[62].mxu1 %vm353_vm1, %v4369_v28 }
 0x3c8   : > { %v10307_v49 = vpop.f32.mrb[32].mxu1 }
 0x3c9   : > { %v4736_v53 = vadd.f32 %v10307_v49, %v12682_v48  ;;  %v4537_v55 = vpop.f32.mrb[33].mxu1 }
 0x3ca   : > { %v4735_v58 = vadd.f32 %v12682_v48, %v4537_v55 }
 0x3cb   : > { %v4768_v30 = vmax.f32 %v4736_v53, 0.0 }
 0x3cc   : > { %v4767_v32 = vmax.f32 %v4735_v58, 0.0  ;;  %v10310_v34 = vpop.f32.mrb[34].mxu1 }
 0x3cd   : > { %4801 = vst.msk [vmem:[#allocation3 + $0x21] sm:$0xff] %vm353_vm1, %v4768_v30  ;;  %v4738_v47 = vadd.f32 %v10310_v34, %v12682_v48  ;;  %v4547_v51 = vpop.f32.mrb[35].mxu1 }
 0x3ce   : > { %4800 = vst.msk [vmem:[#allocation3 + $0x19] sm:$0xff] %vm353_vm1, %v4767_v32  ;;  %v4737_v59 = vadd.f32 %v12682_v48, %v4547_v51 }
 0x3cf   : > { %v4770_v63 = vmax.f32 %v4738_v47, 0.0 }
 0x3d0   : > { %v4769_v13 = vmax.f32 %v4737_v59, 0.0  ;;  %v10313_v25 = vpop.f32.mrb[36].mxu1 }
 0x3d1   : > { %4803 = vst.msk [vmem:[#allocation3 + $0x39] sm:$0xff] %vm353_vm1, %v4770_v63  ;;  %v4740_v33 = vadd.f32 %v10313_v25, %v12682_v48  ;;  %v4557_v37 = vpop.f32.mrb[37].mxu1 }
 0x3d2   : > { %4802 = vst.msk [vmem:[#allocation3 + $0x31] sm:$0xff] %vm353_vm1, %v4769_v13  ;;  %v4739_v45 = vadd.f32 %v12682_v48, %v4557_v37 }
 0x3d3   : > { %v4772_v50 = vmax.f32 %v4740_v33, 0.0 }
 0x3d4   : > { %v4771_v60 = vmax.f32 %v4739_v45, 0.0  ;;  %v10316_v1 = vpop.f32.mrb[38].mxu1  ;;  %v12702_v21 = vld [vmem:[#allocation3 + $0x21] sm:$0xff] }
 0x3d5   : > { %4805 = vst.msk [vmem:[#allocation3 + $0x51] sm:$0xff] %vm353_vm1, %v4772_v50  ;;  %v4742_v12 = vadd.f32 %v10316_v1, %v12682_v48  ;;  %v4567_v54 = vpop.f32.mrb[39].mxu1  ;;  %v12696_v62 = vld [vmem:[#allocation3 + $0x19] sm:$0xff] }
 0x3d6   : > { %4804 = vst.msk [vmem:[#allocation3 + $0x49] sm:$0xff] %vm353_vm1, %v4771_v60  ;;  %v4741_v8 = vadd.f32 %v12682_v48, %v4567_v54  ;;  %10358 = vmatprep.mubr.msk.f32.mxu0 %vm353_vm1, %v12696_v62 }
 0x3d7   : > { %v4774_v35 = vmax.f32 %v4742_v12, 0.0  ;;  %10359 = vmatmul.mubr.msk.f32.gmra.mrb[34].mxu0 %vm353_vm1, %v12702_v21 }
 0x3d8   : > { %v4773_v36 = vmax.f32 %v4741_v8, 0.0  ;;  %v10319_v7 = vpop.f32.mrb[40].mxu1  ;;  %v12714_v56 = vld [vmem:[#allocation3 + $0x39] sm:$0xff] }
 0x3d9   : > { %4807 = vst.msk [vmem:[#allocation3 + $0x69] sm:$0xff] %vm353_vm1, %v4774_v35  ;;  %v4744_v38 = vadd.f32 %v10319_v7, %v12682_v48  ;;  %v4577_v39 = vpop.f32.mrb[41].mxu1  ;;  %v12708_v43 = vld [vmem:[#allocation3 + $0x31] sm:$0xff] }
 0x3da   : > { %4806 = vst.msk [vmem:[#allocation3 + $0x61] sm:$0xff] %vm353_vm1, %v4773_v36  ;;  %v4743_v52 = vadd.f32 %v12682_v48, %v4577_v39  ;;  %10361 = vmatprep.mubr.msk.f32.mxu0 %vm353_vm1, %v12708_v43 }
 0x3db   : > { %v4776_v61 = vmax.f32 %v4744_v38, 0.0  ;;  %10362 = vmatmul.mubr.msk.f32.gmra.mrb[36].mxu0 %vm353_vm1, %v12714_v56 }
 0x3dc   : > { %v4775_v2 = vmax.f32 %v4743_v52, 0.0  ;;  %v10322_v10 = vpop.f32.mrb[42].mxu1  ;;  %v12726_v9 = vld [vmem:[#allocation3 + $0x51] sm:$0xff] }
 0x3dd   : > { %4809 = vst.msk [vmem:[#allocation3 + $0x81] sm:$0xff] %vm353_vm1, %v4776_v61  ;;  %v4746_v3 = vadd.f32 %v10322_v10, %v12682_v48  ;;  %v4587_v4 = vpop.f32.mrb[43].mxu1  ;;  %v12720_v5 = vld [vmem:[#allocation3 + $0x49] sm:$0xff] }
 0x3de   : > { %4808 = vst.msk [vmem:[#allocation3 + $0x79] sm:$0xff] %vm353_vm1, %v4775_v2  ;;  %v4745_v6 = vadd.f32 %v12682_v48, %v4587_v4  ;;  %10364 = vmatprep.mubr.msk.f32.mxu0 %vm353_vm1, %v12720_v5 }
 0x3df   : > { %v4778_v17 = vmax.f32 %v4746_v3, 0.0  ;;  %10365 = vmatmul.mubr.msk.f32.gmra.mrb[38].mxu0 %vm353_vm1, %v12726_v9 }
 0x3e0   : > { %v4777_v27 = vmax.f32 %v4745_v6, 0.0  ;;  %v10325_v31 = vpop.f32.mrb[44].mxu1  ;;  %v12738_v11 = vld [vmem:[#allocation3 + $0x69] sm:$0xff] }
 0x3e1   : > { %4811 = vst.msk [vmem:[#allocation3 + $0x99] sm:$0xff] %vm353_vm1, %v4778_v17  ;;  %v4748_v41 = vadd.f32 %v10325_v31, %v12682_v48  ;;  %v4597_v46 = vpop.f32.mrb[45].mxu1  ;;  %v12732_v57 = vld [vmem:[#allocation3 + $0x61] sm:$0xff] }
 0x3e2   : > { %4810 = vst.msk [vmem:[#allocation3 + $0x91] sm:$0xff] %vm353_vm1, %v4777_v27  ;;  %v4747_v0 = vadd.f32 %v12682_v48, %v4597_v46  ;;  %10367 = vmatprep.mubr.msk.f32.mxu0 %vm353_vm1, %v12732_v57 }
 0x3e3   : > { %v4780_v15 = vmax.f32 %v4748_v41, 0.0  ;;  %10368 = vmatmul.mubr.msk.f32.gmra.mrb[40].mxu0 %vm353_vm1, %v12738_v11 }
 0x3e4   : > { %v4779_v19 = vmax.f32 %v4747_v0, 0.0  ;;  %v10328_v20 = vpop.f32.mrb[46].mxu1  ;;  %v12750_v18 = vld [vmem:[#allocation3 + $0x81] sm:$0xff] }
 0x3e5   : > { %4813 = vst.msk [vmem:[#allocation3 + $0xb1] sm:$0xff] %vm353_vm1, %v4780_v15  ;;  %v4750_v22 = vadd.f32 %v10328_v20, %v12682_v48  ;;  %v4607_v23 = vpop.f32.mrb[47].mxu1  ;;  %v12744_v14 = vld [vmem:[#allocation3 + $0x79] sm:$0xff] }
 0x3e6   : > { %4812 = vst.msk [vmem:[#allocation3 + $0xa9] sm:$0xff] %vm353_vm1, %v4779_v19  ;;  %v4749_v16 = vadd.f32 %v12682_v48, %v4607_v23  ;;  %10370 = vmatprep.mubr.msk.f32.mxu0 %vm353_vm1, %v12744_v14 }
 0x3e7   : > { %v4782_v26 = vmax.f32 %v4750_v22, 0.0  ;;  %10371 = vmatmul.mubr.msk.f32.gmra.mrb[42].mxu0 %vm353_vm1, %v12750_v18 }
 0x3e8   : > { %v4781_v29 = vmax.f32 %v4749_v16, 0.0  ;;  %v10331_v28 = vpop.f32.mrb[48].mxu1  ;;  %v12762_v53 = vld [vmem:[#allocation3 + $0x99] sm:$0xff] }
 0x3e9   : > { %4815 = vst.msk [vmem:[#allocation3 + $0xc9] sm:$0xff] %vm353_vm1, %v4782_v26  ;;  %v4752_v40 = vadd.f32 %v10331_v28, %v12682_v48  ;;  %v4617_v24 = vpop.f32.mrb[49].mxu1  ;;  %v12756_v42 = vld [vmem:[#allocation3 + $0x91] sm:$0xff] }
 0x3ea   : > { %4814 = vst.msk [vmem:[#allocation3 + $0xc1] sm:$0xff] %vm353_vm1, %v4781_v29  ;;  %v4751_v49 = vadd.f32 %v12682_v48, %v4617_v24  ;;  %10373 = vmatprep.mubr.msk.f32.mxu0 %vm353_vm1, %v12756_v42 }
 0x3eb   : > { %v4784_v55 = vmax.f32 %v4752_v40, 0.0  ;;  %10374 = vmatmul.mubr.msk.f32.gmra.mrb[44].mxu0 %vm353_vm1, %v12762_v53 }
 0x3ec   : > { %v4783_v58 = vmax.f32 %v4751_v49, 0.0  ;;  %v10334_v30 = vpop.f32.mrb[50].mxu1  ;;  %v12774_v59 = vld [vmem:[#allocation3 + $0xb1] sm:$0xff] }
 0x3ed   : > { %4817 = vst.msk [vmem:[#allocation3 + $0xe1] sm:$0xff] %vm353_vm1, %v4784_v55  ;;  %v4754_v32 = vadd.f32 %v10334_v30, %v12682_v48  ;;  %v4627_v34 = vpop.f32.mrb[51].mxu1  ;;  %v12768_v47 = vld [vmem:[#allocation3 + $0xa9] sm:$0xff] }
 0x3ee   : > { %4816 = vst.msk [vmem:[#allocation3 + $0xd9] sm:$0xff] %vm353_vm1, %v4783_v58  ;;  %v4753_v51 = vadd.f32 %v12682_v48, %v4627_v34  ;;  %10376 = vmatprep.mubr.msk.f32.mxu0 %vm353_vm1, %v12768_v47 }
 0x3ef   : > { %v4786_v63 = vmax.f32 %v4754_v32, 0.0  ;;  %10377 = vmatmul.mubr.msk.f32.gmra.mrb[46].mxu0 %vm353_vm1, %v12774_v59 }
 0x3f0   : > { %v4785_v13 = vmax.f32 %v4753_v51, 0.0  ;;  %v10337_v25 = vpop.f32.mrb[52].mxu1  ;;  %v12786_v60 = vld [vmem:[#allocation3 + $0xc9] sm:$0xff] }
 0x3f1   : > { %4819 = vst.msk [vmem:[#allocation3 + $0xf9] sm:$0xff] %vm353_vm1, %v4786_v63  ;;  %v4756_v33 = vadd.f32 %v10337_v25, %v12682_v48  ;;  %v4637_v37 = vpop.f32.mrb[53].mxu1  ;;  %v12780_v45 = vld [vmem:[#allocation3 + $0xc1] sm:$0xff] }
 0x3f2   : > { %4818 = vst.msk [vmem:[#allocation3 + $0xf1] sm:$0xff] %vm353_vm1, %v4785_v13  ;;  %v4755_v50 = vadd.f32 %v12682_v48, %v4637_v37  ;;  %10379 = vmatprep.mubr.msk.f32.mxu0 %vm353_vm1, %v12780_v45  ;;  %v4832_v37 = vld [vmem:[#allocation3] sm:$0xff] }
 0x3f3   : > { %v4788_v1 = vmax.f32 %v4756_v33, 0.0  ;;  %10380 = vmatmul.mubr.msk.f32.gmra.mrb[48].mxu0 %vm353_vm1, %v12786_v60 }
 0x3f4   : > { %v4787_v12 = vmax.f32 %v4755_v50, 0.0  ;;  %v10340_v54 = vpop.f32.mrb[54].mxu1  ;;  %v12798_v38 = vld [vmem:[#allocation3 + $0xe1] sm:$0xff] }
 0x3f5   : > { %4821 = vst.msk [vmem:[#allocation3 + $0x111] sm:$0xff] %vm353_vm1, %v4788_v1  ;;  %v4758_v8 = vadd.f32 %v10340_v54, %v12682_v48  ;;  %v4647_v35 = vpop.f32.mrb[55].mxu1  ;;  %v12792_v36 = vld [vmem:[#allocation3 + $0xd9] sm:$0xff]  ;;  %v4833_v1 = vld [vmem:[#allocation3 + $0x8] sm:$0xff] }
 0x3f6   : > { %4820 = vst.msk [vmem:[#allocation3 + $0x109] sm:$0xff] %vm353_vm1, %v4787_v12  ;;  %v4757_v7 = vadd.f32 %v12682_v48, %v4647_v35  ;;  %10382 = vmatprep.mubr.msk.f32.mxu0 %vm353_vm1, %v12792_v36  ;;  %v12872_v12 = vld [vmem:[%s13649_s7 + $0xc] sm:$0xf]  ;;  %v12887_v35 = vld [vmem:[#allocation3 + $0x30] sm:$0xff] }
 0x3f7   : > { %v4790_v39 = vmax.f32 %v4758_v8, 0.0  ;;  %10383 = vmatmul.mubr.msk.f32.gmra.mrb[50].mxu0 %vm353_vm1, %v12798_v38  ;;  %v12875_v54 = vld [vmem:[#allocation3 + $0x18] sm:$0xff]  ;;  %v12883_v8 = vld [vmem:[#allocation3 + $0x20] sm:$0xff] }
 0x3f8   : > { %v4789_v52 = vmax.f32 %v4757_v7, 0.0  ;;  %v10343_v61 = vpop.f32.mrb[56].mxu1  ;;  %v12810_v6 = vld [vmem:[#allocation3 + $0xf9] sm:$0xff] }
 0x3f9   : > { %4823 = vst.msk [vmem:[#allocation3 + $0x129] sm:$0xff] %vm353_vm1, %v4790_v39  ;;  %v4760_v2 = vadd.f32 %v10343_v61, %v12682_v48  ;;  %v4657_v10 = vpop.f32.mrb[57].mxu1  ;;  %v12804_v3 = vld [vmem:[#allocation3 + $0xf1] sm:$0xff]  ;;  %v12907_v61 = vld [vmem:[#allocation3 + $0x68] sm:$0xff] }
 0x3fa   : > { %4822 = vst.msk [vmem:[#allocation3 + $0x121] sm:$0xff] %vm353_vm1, %v4789_v52  ;;  %v4759_v4 = vadd.f32 %v12682_v48, %v4657_v10  ;;  %10385 = vmatprep.mubr.msk.f32.mxu0 %vm353_vm1, %v12804_v3  ;;  %v12891_v7 = vld [vmem:[#allocation3 + $0x38] sm:$0xff]  ;;  %v12899_v39 = vld [vmem:[#allocation3 + $0x50] sm:$0xff]  ;;  %v12903_v52 = vld [vmem:[#allocation3 + $0x60] sm:$0xff] }
 0x3fb   : > { %v4792_v17 = vmax.f32 %v4760_v2, 0.0  ;;  %10386 = vmatmul.mubr.msk.f32.gmra.mrb[52].mxu0 %vm353_vm1, %v12810_v6  ;;  %v12911_v2 = vld [vmem:[#allocation3 + $0x78] sm:$0xff]  ;;  %v12915_v10 = vld [vmem:[#allocation3 + $0x80] sm:$0xff] }
 0x3fc   : > { %v4791_v27 = vmax.f32 %v4759_v4, 0.0  ;;  %v10346_v31 = vpop.f32.mrb[58].mxu1  ;;  %v12822_v19 = vld [vmem:[#allocation3 + $0x111] sm:$0xff] }
 0x3fd   : > { %4825 = vst.msk [vmem:[#allocation3 + $0x141] sm:$0xff] %vm353_vm1, %v4792_v17  ;;  %v4762_v41 = vadd.f32 %v10346_v31, %v12682_v48  ;;  %v4667_v46 = vpop.f32.mrb[59].mxu1  ;;  %v12816_v0 = vld [vmem:[#allocation3 + $0x109] sm:$0xff]  ;;  %v12923_v17 = vld [vmem:[#allocation3 + $0x98] sm:$0xff] }
 0x3fe   : > { %4824 = vst.msk [vmem:[#allocation3 + $0x139] sm:$0xff] %vm353_vm1, %v4791_v27  ;;  %v4761_v15 = vadd.f32 %v12682_v48, %v4667_v46  ;;  %10388 = vmatprep.mubr.msk.f32.mxu0 %vm353_vm1, %v12816_v0  ;;  %v12919_v4 = vld [vmem:[#allocation3 + $0x90] sm:$0xff]  ;;  %v12927_v27 = vld [vmem:[#allocation3 + $0xa8] sm:$0xff] }
 0x3ff   : > { %v4794_v20 = vmax.f32 %v4762_v41, 0.0  ;;  %10389 = vmatmul.mubr.msk.f32.gmra.mrb[54].mxu0 %vm353_vm1, %v12822_v19  ;;  %v12931_v31 = vld [vmem:[#allocation3 + $0xb0] sm:$0xff]  ;;  %v12935_v41 = vld [vmem:[#allocation3 + $0xc0] sm:$0xff]  ;;  %v12939_v46 = vld [vmem:[#allocation3 + $0xc8] sm:$0xff] }
 0x400   : > { %v4793_v22 = vmax.f32 %v4761_v15, 0.0  ;;  %v10349_v23 = vpop.f32.mrb[60].mxu1  ;;  %v12834_v40 = vld [vmem:[#allocation3 + $0x129] sm:$0xff]  ;;  %v12943_v15 = vld [vmem:[#allocation3 + $0xd8] sm:$0xff] }
 0x401   : > { %4827 = vst.msk [vmem:[#allocation3 + $0x159] sm:$0xff] %vm353_vm1, %v4794_v20  ;;  %v4764_v16 = vadd.f32 %v10349_v23, %v12682_v48  ;;  %v4677_v26 = vpop.f32.mrb[61].mxu1  ;;  %v12828_v29 = vld [vmem:[#allocation3 + $0x121] sm:$0xff]  ;;  %v12955_v23 = vld [vmem:[#allocation3 + $0xf8] sm:$0xff] }
 0x402   : > { %4826 = vst.msk [vmem:[#allocation3 + $0x151] sm:$0xff] %vm353_vm1, %v4793_v22  ;;  %v4763_v28 = vadd.f32 %v12682_v48, %v4677_v26  ;;  %10391 = vmatprep.mubr.msk.f32.mxu0 %vm353_vm1, %v12828_v29  ;;  %v12947_v20 = vld [vmem:[#allocation3 + $0xe0] sm:$0xff]  ;;  %v12951_v22 = vld [vmem:[#allocation3 + $0xf0] sm:$0xff] }
 0x403   : > { %v4796_v24 = vmax.f32 %v4764_v16, 0.0  ;;  %10392 = vmatmul.mubr.msk.f32.gmra.mrb[56].mxu0 %vm353_vm1, %v12834_v40  ;;  %v12959_v16 = vld [vmem:[#allocation3 + $0x108] sm:$0xff]  ;;  %v12963_v26 = vld [vmem:[#allocation3 + $0x110] sm:$0xff] }
 0x404   : > { %v4795_v49 = vmax.f32 %v4763_v28, 0.0  ;;  %v10352_v55 = vpop.f32.mrb[62].mxu1  ;;  %v12846_v51 = vld [vmem:[#allocation3 + $0x141] sm:$0xff] }
 0x405   : > { %4829 = vst.msk [vmem:[#allocation3 + $0x171] sm:$0xff] %vm353_vm1, %v4796_v24  ;;  %v4766_v58 = vadd.f32 %v10352_v55, %v12682_v48  ;;  %v4687_v30 = vpop.f32.mrb[63].mxu1  ;;  %v12840_v32 = vld [vmem:[#allocation3 + $0x139] sm:$0xff]  ;;  %v12971_v24 = vld [vmem:[#allocation3 + $0x128] sm:$0xff] }
 0x406   : > { %4828 = vst.msk [vmem:[#allocation3 + $0x169] sm:$0xff] %vm353_vm1, %v4795_v49  ;;  %v4765_v34 = vadd.f32 %v12682_v48, %v4687_v30  ;;  %10394 = vmatprep.mubr.msk.f32.mxu0 %vm353_vm1, %v12840_v32  ;;  %v12967_v28 = vld [vmem:[#allocation3 + $0x120] sm:$0xff]  ;;  %v12975_v49 = vld [vmem:[#allocation3 + $0x138] sm:$0xff] }
 0x407   : > { %v4798_v63 = vmax.f32 %v4766_v58, 0.0  ;;  %10395 = vmatmul.mubr.msk.f32.gmra.mrb[58].mxu0 %vm353_vm1, %v12846_v51  ;;  %v12979_v55 = vld [vmem:[#allocation3 + $0x140] sm:$0xff] }
 0x408   : > { %v4797_v13 = vmax.f32 %v4765_v34, 0.0  ;;  %v12856_v48 = vld [vmem:[#allocation3 + $0x159] sm:$0xff] }
 0x409   : > { %4831 = vst.msk [vmem:[#allocation3 + $0x189] sm:$0xff] %vm353_vm1, %v4798_v63  ;;  %v12851_v25 = vld [vmem:[#allocation3 + $0x151] sm:$0xff]  ;;  %v5547_v63 = vld [vmem:[#allocation3 + $0x2] sm:$0xff] }
 0x40a   : > { %4830 = vst.msk [vmem:[#allocation3 + $0x181] sm:$0xff] %vm353_vm1, %v4797_v13  ;;  %10397 = vmatprep.mubr.msk.f32.mxu0 %vm353_vm1, %v12851_v25  ;;  %v12983_v58 = vld [vmem:[#allocation3 + $0x150] sm:$0xff]  ;;  %v12987_v30 = vld [vmem:[#allocation3 + $0x158] sm:$0xff] }
 0x40b   : > { %10398 = vmatmul.mubr.msk.f32.gmra.mrb[60].mxu0 %vm353_vm1, %v12856_v48 }
 0x40c   : > { %v12864_v50 = vld [vmem:[#allocation3 + $0x171] sm:$0xff] }
 0x40d   : > { %v12860_v33 = vld [vmem:[#allocation3 + $0x169] sm:$0xff]  ;;  %13835 = vst [vmem:[#allocation5_spill] sm:$0xff] %v12864_v50 }
 0x40e   : > { %13834 = vst [vmem:[#allocation4_spill] sm:$0xff] %v12860_v33  ;;  %10400 = vmatprep.mubr.msk.f32.mxu0 %vm353_vm1, %v12860_v33  ;;  %v12991_v34 = vld [vmem:[#allocation3 + $0x168] sm:$0xff]  ;;  %v12995_v13 = vld [vmem:[#allocation3 + $0x170] sm:$0xff] }
 0x40f   : > { %10401 = vmatmul.mubr.msk.f32.gmra.mrb[62].mxu0 %vm353_vm1, %v12864_v50  ;;  %v13006_v50 = vld [vmem:[#allocation3 + $0x1a] sm:$0xff]  ;;  %v13018_v33 = vld [vmem:[#allocation3 + $0x32] sm:$0xff] }
 0x410   : > { %10405 = vmatprep.mubr.msk.f32.mxu0 %vm353_vm1, %v4832_v37  ;;  %v5548_v37 = vld [vmem:[#allocation3 + $0xa] sm:$0xff]  ;;  %13836 = vst [vmem:[#allocation6_spill] sm:$0xff] %v13006_v50  ;;  %13838 = vst [vmem:[#allocation8_spill] sm:$0xff] %v13018_v33 }
 0x413   : > { %10406 = vmatmul.mubr.msk.f32.vlgmr.msra.gmra.mrb[32].mxu0 %vm353_vm1, %v4833_v1  ;;  %v13003_v1 = vld [vmem:[%s13649_s7 + $0x10] sm:$0xf] }
 0x414   : > { %10454 = vmatpush3.msk.msra.mxu0 %vm625_vm0, %v12675_v44  ;;  %10408 = vmatprep.mubr.msk.f32.mxu0 %vm353_vm1, %v12875_v54  ;;  %v12895_v44 = vld [vmem:[#allocation3 + $0x48] sm:$0xff] }
 0x415   : > { %10503 = vmatprep.subr.msk.mxu0 %vm625_vm0, %v12872_v12 }
 0x417   : > { %10409 = vmatmul.mubr.msk.f32.gmra.mrb[34].mxu0 %vm353_vm1, %v12883_v8 }
 0x418   : > { %10411 = vmatprep.mubr.msk.f32.mxu0 %vm353_vm1, %v12887_v35 }
 0x41b   : > { %10412 = vmatmul.mubr.msk.f32.gmra.mrb[36].mxu0 %vm353_vm1, %v12891_v7 }
 0x41c   : > { %10414 = vmatprep.mubr.msk.f32.mxu0 %vm353_vm1, %v12895_v44 }
 0x41f   : > { %10415 = vmatmul.mubr.msk.f32.gmra.mrb[38].mxu0 %vm353_vm1, %v12899_v39 }
 0x420   : > { %10417 = vmatprep.mubr.msk.f32.mxu0 %vm353_vm1, %v12903_v52 }
 0x423   : > { %10418 = vmatmul.mubr.msk.f32.gmra.mrb[40].mxu0 %vm353_vm1, %v12907_v61 }
 0x424   : > { %10420 = vmatprep.mubr.msk.f32.mxu0 %vm353_vm1, %v12911_v2 }
 0x427   : > { %10421 = vmatmul.mubr.msk.f32.gmra.mrb[42].mxu0 %vm353_vm1, %v12915_v10 }
 0x428   : > { %10423 = vmatprep.mubr.msk.f32.mxu0 %vm353_vm1, %v12919_v4 }
 0x42b   : > { %10424 = vmatmul.mubr.msk.f32.gmra.mrb[44].mxu0 %vm353_vm1, %v12923_v17 }
 0x42c   : > { %10426 = vmatprep.mubr.msk.f32.mxu0 %vm353_vm1, %v12927_v27 }
 0x42f   : > { %10427 = vmatmul.mubr.msk.f32.gmra.mrb[46].mxu0 %vm353_vm1, %v12931_v31 }
 0x430   : > { %10429 = vmatprep.mubr.msk.f32.mxu0 %vm353_vm1, %v12935_v41 }
 0x433   : > { %10430 = vmatmul.mubr.msk.f32.gmra.mrb[48].mxu0 %vm353_vm1, %v12939_v46 }
 0x434   : > { %10432 = vmatprep.mubr.msk.f32.mxu0 %vm353_vm1, %v12943_v15 }
 0x437   : > { %10433 = vmatmul.mubr.msk.f32.gmra.mrb[50].mxu0 %vm353_vm1, %v12947_v20 }
 0x438   : > { %10435 = vmatprep.mubr.msk.f32.mxu0 %vm353_vm1, %v12951_v22 }
 0x43b   : > { %10436 = vmatmul.mubr.msk.f32.gmra.mrb[52].mxu0 %vm353_vm1, %v12955_v23 }
 0x43c   : > { %10438 = vmatprep.mubr.msk.f32.mxu0 %vm353_vm1, %v12959_v16 }
 0x43f   : > { %10439 = vmatmul.mubr.msk.f32.gmra.mrb[54].mxu0 %vm353_vm1, %v12963_v26 }
 0x440   : > { %10441 = vmatprep.mubr.msk.f32.mxu0 %vm353_vm1, %v12967_v28 }
 0x443   : > { %10442 = vmatmul.mubr.msk.f32.gmra.mrb[56].mxu0 %vm353_vm1, %v12971_v24 }
 0x444   : > { %10444 = vmatprep.mubr.msk.f32.mxu0 %vm353_vm1, %v12975_v49 }
 0x447   : > { %10445 = vmatmul.mubr.msk.f32.gmra.mrb[58].mxu0 %vm353_vm1, %v12979_v55 }
 0x448   : > { %10447 = vmatprep.mubr.msk.f32.mxu0 %vm353_vm1, %v12983_v58 }
 0x44b   : > { %10448 = vmatmul.mubr.msk.f32.gmra.mrb[60].mxu0 %vm353_vm1, %v12987_v30 }
 0x44c   : > { %10450 = vmatprep.mubr.msk.f32.mxu0 %vm353_vm1, %v12991_v34 }
 0x44f   : > { %10451 = vmatmul.mubr.msk.f32.gmra.mrb[62].mxu0 %vm353_vm1, %v12995_v13 }
 0x450   : > { %10455 = vmatprep.mubr.msk.f32.mxu0 %vm353_vm1, %v5547_v63  ;;  %v13014_v63 = vld [vmem:[#allocation3 + $0x22] sm:$0xff] }
 0x451   : > { %13837 = vst [vmem:[#allocation7_spill] sm:$0xff] %v13014_v63 }
 0x453   : > { %10456 = vmatmul.mubr.msk.f32.vlgmr.msra.gmra.mrb[32].mxu0 %vm353_vm1, %v5548_v37  ;;  %v13022_v37 = vld [vmem:[#allocation3 + $0x3a] sm:$0xff] }
 0x454   : > { %10504 = vmatpush3.msk.msra.mxu0 %vm625_vm0, %v12872_v12  ;;  %10458 = vmatprep.mubr.msk.f32.mxu0 %vm353_vm1, %v13006_v50  ;;  %13839 = vst [vmem:[#allocation9_spill] sm:$0xff] %v13022_v37  ;;  %v13026_v12 = vld [vmem:[#allocation3 + $0x4a] sm:$0xff]  ;;  %v13030_v50 = vld [vmem:[#allocation3 + $0x52] sm:$0xff] }
 0x455   : > { %10553 = vmatprep.subr.msk.mxu0 %vm625_vm0, %v13003_v1  ;;  %13840 = vst [vmem:[#allocation10_spill] sm:$0xff] %v13026_v12  ;;  %13841 = vst [vmem:[#allocation11_spill] sm:$0xff] %v13030_v50 }
 0x457   : > { %10459 = vmatmul.mubr.msk.f32.gmra.mrb[34].mxu0 %vm353_vm1, %v13014_v63  ;;  %v13034_v63 = vld [vmem:[#allocation3 + $0x62] sm:$0xff] }
 0x458   : > { %10461 = vmatprep.mubr.msk.f32.mxu0 %vm353_vm1, %v13018_v33  ;;  %13842 = vst [vmem:[#allocation23_spill] sm:$0xff] %v13034_v63  ;;  %v13038_v33 = vld [vmem:[#allocation3 + $0x6a] sm:$0xff] }
 0x459   : > { %13843 = vst [vmem:[#allocation25_spill] sm:$0xff] %v13038_v33 }
 0x45b   : > { %10462 = vmatmul.mubr.msk.f32.gmra.mrb[36].mxu0 %vm353_vm1, %v13022_v37  ;;  %v13042_v37 = vld [vmem:[#allocation3 + $0x7a] sm:$0xff] }
 0x45c   : > { %10464 = vmatprep.mubr.msk.f32.mxu0 %vm353_vm1, %v13026_v12  ;;  %13844 = vst [vmem:[#allocation26_spill] sm:$0xff] %v13042_v37  ;;  %v13046_v12 = vld [vmem:[#allocation3 + $0x82] sm:$0xff] }
 0x45d   : > { %13845 = vst [vmem:[#allocation27_spill] sm:$0xff] %v13046_v12 }
 0x45f   : > { %10465 = vmatmul.mubr.msk.f32.gmra.mrb[38].mxu0 %vm353_vm1, %v13030_v50  ;;  %v13050_v50 = vld [vmem:[#allocation3 + $0x92] sm:$0xff] }
 0x460   : > { %10467 = vmatprep.mubr.msk.f32.mxu0 %vm353_vm1, %v13034_v63  ;;  %13846 = vst [vmem:[#allocation29_spill] sm:$0xff] %v13050_v50  ;;  %v13054_v63 = vld [vmem:[#allocation3 + $0x9a] sm:$0xff] }
 0x461   : > { %13847 = vst [vmem:[#allocation31_spill] sm:$0xff] %v13054_v63 }
 0x463   : > { %10468 = vmatmul.mubr.msk.f32.gmra.mrb[40].mxu0 %vm353_vm1, %v13038_v33  ;;  %v13058_v33 = vld [vmem:[#allocation3 + $0xaa] sm:$0xff] }
 0x464   : > { %10470 = vmatprep.mubr.msk.f32.mxu0 %vm353_vm1, %v13042_v37  ;;  %13848 = vst [vmem:[#allocation12_spill] sm:$0xff] %v13058_v33  ;;  %v13062_v37 = vld [vmem:[#allocation3 + $0xb2] sm:$0xff] }
 0x465   : > { %13849 = vst [vmem:[#allocation13_spill] sm:$0xff] %v13062_v37 }
 0x467   : > { %10471 = vmatmul.mubr.msk.f32.gmra.mrb[42].mxu0 %vm353_vm1, %v13046_v12  ;;  %v13066_v12 = vld [vmem:[#allocation3 + $0xc2] sm:$0xff] }
 0x468   : > { %10473 = vmatprep.mubr.msk.f32.mxu0 %vm353_vm1, %v13050_v50  ;;  %13850 = vst [vmem:[#allocation14_spill] sm:$0xff] %v13066_v12  ;;  %v13070_v50 = vld [vmem:[#allocation3 + $0xca] sm:$0xff] }
 0x469   : > { %13851 = vst [vmem:[#allocation15_spill] sm:$0xff] %v13070_v50 }
 0x46b   : > { %10474 = vmatmul.mubr.msk.f32.gmra.mrb[44].mxu0 %vm353_vm1, %v13054_v63  ;;  %v13074_v63 = vld [vmem:[#allocation3 + $0xda] sm:$0xff] }
 0x46c   : > { %10476 = vmatprep.mubr.msk.f32.mxu0 %vm353_vm1, %v13058_v33  ;;  %13852 = vst [vmem:[#allocation16_spill] sm:$0xff] %v13074_v63  ;;  %v13078_v33 = vld [vmem:[#allocation3 + $0xe2] sm:$0xff] }
 0x46d   : > { %13853 = vst [vmem:[#allocation17_spill] sm:$0xff] %v13078_v33 }
 0x46f   : > { %10477 = vmatmul.mubr.msk.f32.gmra.mrb[46].mxu0 %vm353_vm1, %v13062_v37  ;;  %v13082_v37 = vld [vmem:[#allocation3 + $0xf2] sm:$0xff] }
 0x470   : > { %10479 = vmatprep.mubr.msk.f32.mxu0 %vm353_vm1, %v13066_v12  ;;  %13854 = vst [vmem:[#allocation18_spill] sm:$0xff] %v13082_v37  ;;  %v13086_v12 = vld [vmem:[#allocation3 + $0xfa] sm:$0xff] }
 0x471   : > { %13855 = vst [vmem:[#allocation19_spill] sm:$0xff] %v13086_v12 }
 0x473   : > { %10480 = vmatmul.mubr.msk.f32.gmra.mrb[48].mxu0 %vm353_vm1, %v13070_v50  ;;  %v13090_v50 = vld [vmem:[#allocation3 + $0x10a] sm:$0xff] }
 0x474   : > { %10482 = vmatprep.mubr.msk.f32.mxu0 %vm353_vm1, %v13074_v63  ;;  %13856 = vst [vmem:[#allocation20_spill] sm:$0xff] %v13090_v50  ;;  %v13094_v63 = vld [vmem:[#allocation3 + $0x112] sm:$0xff] }
 0x475   : > { %13857 = vst [vmem:[#allocation21_spill] sm:$0xff] %v13094_v63 }
 0x477   : > { %10483 = vmatmul.mubr.msk.f32.gmra.mrb[50].mxu0 %vm353_vm1, %v13078_v33  ;;  %v13098_v33 = vld [vmem:[#allocation3 + $0x122] sm:$0xff] }
 0x478   : > { %10485 = vmatprep.mubr.msk.f32.mxu0 %vm353_vm1, %v13082_v37  ;;  %13858 = vst [vmem:[#allocation22_spill] sm:$0xff] %v13098_v33  ;;  %v13102_v37 = vld [vmem:[#allocation3 + $0x12a] sm:$0xff] }
 0x479   : > { %13859 = vst [vmem:[#allocation24_spill] sm:$0xff] %v13102_v37 }
 0x47b   : > { %10486 = vmatmul.mubr.msk.f32.gmra.mrb[52].mxu0 %vm353_vm1, %v13086_v12  ;;  %v13106_v12 = vld [vmem:[#allocation3 + $0x13a] sm:$0xff] }
 0x47c   : > { %10488 = vmatprep.mubr.msk.f32.mxu0 %vm353_vm1, %v13090_v50  ;;  %13860 = vst [vmem:[#allocation28_spill] sm:$0xff] %v13106_v12  ;;  %v13110_v50 = vld [vmem:[#allocation3 + $0x142] sm:$0xff] }
 0x47f   : > { %10489 = vmatmul.mubr.msk.f32.gmra.mrb[54].mxu0 %vm353_vm1, %v13094_v63  ;;  %v13114_v63 = vld [vmem:[#allocation3 + $0x152] sm:$0xff] }
 0x480   : > { %10491 = vmatprep.mubr.msk.f32.mxu0 %vm353_vm1, %v13098_v33  ;;  %13861 = vst [vmem:[#allocation30_spill] sm:$0xff] %v13114_v63  ;;  %v13118_v33 = vld [vmem:[#allocation3 + $0x15a] sm:$0xff] }
 0x483   : > { %10492 = vmatmul.mubr.msk.f32.gmra.mrb[56].mxu0 %vm353_vm1, %v13102_v37  ;;  %v13122_v37 = vld [vmem:[#allocation3 + $0x16a] sm:$0xff] }
 0x484   : > { %10494 = vmatprep.mubr.msk.f32.mxu0 %vm353_vm1, %v13106_v12  ;;  %13862 = vst [vmem:[#allocation32_spill] sm:$0xff] %v13122_v37  ;;  %v13126_v12 = vld [vmem:[#allocation3 + $0x172] sm:$0xff] }
 0x487   : > { %10495 = vmatmul.mubr.msk.f32.gmra.mrb[58].mxu0 %vm353_vm1, %v13110_v50 }
 0x488   : > { %10497 = vmatprep.mubr.msk.f32.mxu0 %vm353_vm1, %v13114_v63  ;;  %v9001_v63 = vld [vmem:[%s13649_s7 + $0x14] sm:$0xf] }
 0x48b   : > { %10498 = vmatmul.mubr.msk.f32.gmra.mrb[60].mxu0 %vm353_vm1, %v13118_v33 }
 0x48c   : > { %10500 = vmatprep.mubr.msk.f32.mxu0 %vm353_vm1, %v13122_v37 }
 0x48f   : > { %10501 = vmatmul.mubr.msk.f32.gmra.mrb[62].mxu0 %vm353_vm1, %v13126_v12 }
 0x490   : > { %10505 = vmatprep.mubr.msk.f32.mxu0 %vm353_vm1, %v12875_v54  ;;  %v13196_v54 = vld [vmem:[#allocation3 + $0x180] sm:$0xff] }
 0x493   : > { %10506 = vmatmul.mubr.msk.f32.vlgmr.msra.gmra.mrb[32].mxu0 %vm353_vm1, %v12883_v8  ;;  %v13200_v8 = vld [vmem:[#allocation3 + $0x188] sm:$0xff] }
 0x494   : > { %10554 = vmatpush3.msk.msra.mxu0 %vm625_vm0, %v13003_v1  ;;  %10508 = vmatprep.mubr.msk.f32.mxu0 %vm353_vm1, %v12887_v35  ;;  %v9035_v1 = vld [vmem:[%s13649_s7 + $0x18] sm:$0xf] }
 0x495   : > { %10603 = vmatprep.subr.msk.mxu0 %vm625_vm0, %v9001_v63 }
 0x497   : > { %10509 = vmatmul.mubr.msk.f32.gmra.mrb[34].mxu0 %vm353_vm1, %v12891_v7 }
 0x498   : > { %10511 = vmatprep.mubr.msk.f32.mxu0 %vm353_vm1, %v12895_v44 }
 0x49b   : > { %10512 = vmatmul.mubr.msk.f32.gmra.mrb[36].mxu0 %vm353_vm1, %v12899_v39 }
 0x49c   : > { %10514 = vmatprep.mubr.msk.f32.mxu0 %vm353_vm1, %v12903_v52 }
 0x49f   : > { %10515 = vmatmul.mubr.msk.f32.gmra.mrb[38].mxu0 %vm353_vm1, %v12907_v61 }
 0x4a0   : > { %10517 = vmatprep.mubr.msk.f32.mxu0 %vm353_vm1, %v12911_v2 }
 0x4a3   : > { %10518 = vmatmul.mubr.msk.f32.gmra.mrb[40].mxu0 %vm353_vm1, %v12915_v10 }
 0x4a4   : > { %10520 = vmatprep.mubr.msk.f32.mxu0 %vm353_vm1, %v12919_v4 }
 0x4a7   : > { %10521 = vmatmul.mubr.msk.f32.gmra.mrb[42].mxu0 %vm353_vm1, %v12923_v17 }
 0x4a8   : > { %10523 = vmatprep.mubr.msk.f32.mxu0 %vm353_vm1, %v12927_v27 }
 0x4ab   : > { %10524 = vmatmul.mubr.msk.f32.gmra.mrb[44].mxu0 %vm353_vm1, %v12931_v31 }
 0x4ac   : > { %10526 = vmatprep.mubr.msk.f32.mxu0 %vm353_vm1, %v12935_v41 }
 0x4af   : > { %10527 = vmatmul.mubr.msk.f32.gmra.mrb[46].mxu0 %vm353_vm1, %v12939_v46 }
 0x4b0   : > { %10529 = vmatprep.mubr.msk.f32.mxu0 %vm353_vm1, %v12943_v15 }
 0x4b3   : > { %10530 = vmatmul.mubr.msk.f32.gmra.mrb[48].mxu0 %vm353_vm1, %v12947_v20 }
 0x4b4   : > { %10532 = vmatprep.mubr.msk.f32.mxu0 %vm353_vm1, %v12951_v22 }
 0x4b7   : > { %10533 = vmatmul.mubr.msk.f32.gmra.mrb[50].mxu0 %vm353_vm1, %v12955_v23 }
 0x4b8   : > { %10535 = vmatprep.mubr.msk.f32.mxu0 %vm353_vm1, %v12959_v16 }
 0x4bb   : > { %10536 = vmatmul.mubr.msk.f32.gmra.mrb[52].mxu0 %vm353_vm1, %v12963_v26 }
 0x4bc   : > { %10538 = vmatprep.mubr.msk.f32.mxu0 %vm353_vm1, %v12967_v28 }
 0x4bf   : > { %10539 = vmatmul.mubr.msk.f32.gmra.mrb[54].mxu0 %vm353_vm1, %v12971_v24 }
 0x4c0   : > { %10541 = vmatprep.mubr.msk.f32.mxu0 %vm353_vm1, %v12975_v49 }
 0x4c3   : > { %10542 = vmatmul.mubr.msk.f32.gmra.mrb[56].mxu0 %vm353_vm1, %v12979_v55 }
 0x4c4   : > { %10544 = vmatprep.mubr.msk.f32.mxu0 %vm353_vm1, %v12983_v58 }
 0x4c7   : > { %10545 = vmatmul.mubr.msk.f32.gmra.mrb[58].mxu0 %vm353_vm1, %v12987_v30 }
 0x4c8   : > { %10547 = vmatprep.mubr.msk.f32.mxu0 %vm353_vm1, %v12991_v34 }
 0x4cb   : > { %10548 = vmatmul.mubr.msk.f32.gmra.mrb[60].mxu0 %vm353_vm1, %v12995_v13 }
 0x4cc   : > { %10550 = vmatprep.mubr.msk.f32.mxu0 %vm353_vm1, %v13196_v54 }
 0x4cf   : > { %10551 = vmatmul.mubr.msk.f32.gmra.mrb[62].mxu0 %vm353_vm1, %v13200_v8 }
 0x4d0   : > { %10555 = vmatprep.mubr.msk.f32.mxu0 %vm353_vm1, %v12696_v62  ;;  %v13863_v62 = vld [vmem:[#allocation4_spill] sm:$0xff] }
 0x4d3   : > { %10556 = vmatmul.mubr.msk.f32.vlgmr.msra.gmra.mrb[32].mxu0 %vm353_vm1, %v12702_v21  ;;  %v13864_v21 = vld [vmem:[#allocation5_spill] sm:$0xff] }
 0x4d4   : > { %10604 = vmatpush3.msk.msra.mxu0 %vm625_vm0, %v9001_v63  ;;  %10558 = vmatprep.mubr.msk.f32.mxu0 %vm353_vm1, %v12708_v43  ;;  %v13269_v43 = vld [vmem:[#allocation3 + $0x181] sm:$0xff]  ;;  %v13872_v63 = vld [vmem:[#allocation25_spill] sm:$0xff] }
 0x4d5   : > { %10653 = vmatprep.subr.msk.mxu0 %vm625_vm0, %v9035_v1 }
 0x4d7   : > { %10559 = vmatmul.mubr.msk.f32.gmra.mrb[34].mxu0 %vm353_vm1, %v12714_v56  ;;  %v13273_v56 = vld [vmem:[#allocation3 + $0x189] sm:$0xff] }
 0x4d8   : > { %10561 = vmatprep.mubr.msk.f32.mxu0 %vm353_vm1, %v12720_v5  ;;  %v13865_v5 = vld [vmem:[#allocation6_spill] sm:$0xff] }
 0x4db   : > { %10562 = vmatmul.mubr.msk.f32.gmra.mrb[36].mxu0 %vm353_vm1, %v12726_v9  ;;  %v9069_v9 = vld [vmem:[%s13649_s7 + $0x1c] sm:$0xf] }
 0x4dc   : > { %10564 = vmatprep.mubr.msk.f32.mxu0 %vm353_vm1, %v12732_v57  ;;  %v13866_v57 = vld [vmem:[#allocation7_spill] sm:$0xff] }
 0x4df   : > { %10565 = vmatmul.mubr.msk.f32.gmra.mrb[38].mxu0 %vm353_vm1, %v12738_v11  ;;  %v13867_v11 = vld [vmem:[#allocation8_spill] sm:$0xff] }
 0x4e0   : > { %10567 = vmatprep.mubr.msk.f32.mxu0 %vm353_vm1, %v12744_v14  ;;  %v13868_v14 = vld [vmem:[#allocation9_spill] sm:$0xff] }
 0x4e3   : > { %10568 = vmatmul.mubr.msk.f32.gmra.mrb[40].mxu0 %vm353_vm1, %v12750_v18  ;;  %v13869_v18 = vld [vmem:[#allocation10_spill] sm:$0xff] }
 0x4e4   : > { %10570 = vmatprep.mubr.msk.f32.mxu0 %vm353_vm1, %v12756_v42  ;;  %v13870_v42 = vld [vmem:[#allocation11_spill] sm:$0xff] }
 0x4e7   : > { %10571 = vmatmul.mubr.msk.f32.gmra.mrb[42].mxu0 %vm353_vm1, %v12762_v53  ;;  %v13871_v53 = vld [vmem:[#allocation23_spill] sm:$0xff] }
 0x4e8   : > { %10573 = vmatprep.mubr.msk.f32.mxu0 %vm353_vm1, %v12768_v47 }
 0x4eb   : > { %10574 = vmatmul.mubr.msk.f32.gmra.mrb[44].mxu0 %vm353_vm1, %v12774_v59 }
 0x4ec   : > { %10576 = vmatprep.mubr.msk.f32.mxu0 %vm353_vm1, %v12780_v45 }
 0x4ef   : > { %10577 = vmatmul.mubr.msk.f32.gmra.mrb[46].mxu0 %vm353_vm1, %v12786_v60 }
 0x4f0   : > { %10579 = vmatprep.mubr.msk.f32.mxu0 %vm353_vm1, %v12792_v36 }
 0x4f3   : > { %10580 = vmatmul.mubr.msk.f32.gmra.mrb[48].mxu0 %vm353_vm1, %v12798_v38 }
 0x4f4   : > { %10582 = vmatprep.mubr.msk.f32.mxu0 %vm353_vm1, %v12804_v3 }
 0x4f7   : > { %10583 = vmatmul.mubr.msk.f32.gmra.mrb[50].mxu0 %vm353_vm1, %v12810_v6 }
 0x4f8   : > { %10585 = vmatprep.mubr.msk.f32.mxu0 %vm353_vm1, %v12816_v0 }
 0x4fb   : > { %10586 = vmatmul.mubr.msk.f32.gmra.mrb[52].mxu0 %vm353_vm1, %v12822_v19 }
 0x4fc   : > { %10588 = vmatprep.mubr.msk.f32.mxu0 %vm353_vm1, %v12828_v29 }
 0x4ff   : > { %10589 = vmatmul.mubr.msk.f32.gmra.mrb[54].mxu0 %vm353_vm1, %v12834_v40 }
 0x500   : > { %10591 = vmatprep.mubr.msk.f32.mxu0 %vm353_vm1, %v12840_v32 }
 0x503   : > { %10592 = vmatmul.mubr.msk.f32.gmra.mrb[56].mxu0 %vm353_vm1, %v12846_v51 }
 0x504   : > { %10594 = vmatprep.mubr.msk.f32.mxu0 %vm353_vm1, %v12851_v25 }
 0x507   : > { %10595 = vmatmul.mubr.msk.f32.gmra.mrb[58].mxu0 %vm353_vm1, %v12856_v48 }
 0x508   : > { %10597 = vmatprep.mubr.msk.f32.mxu0 %vm353_vm1, %v13863_v62 }
 0x50b   : > { %10598 = vmatmul.mubr.msk.f32.gmra.mrb[60].mxu0 %vm353_vm1, %v13864_v21 }
 0x50c   : > { %10600 = vmatprep.mubr.msk.f32.mxu0 %vm353_vm1, %v13269_v43 }
 0x50f   : > { %10601 = vmatmul.mubr.msk.f32.gmra.mrb[62].mxu0 %vm353_vm1, %v13273_v56 }
 0x510   : > { %10605 = vmatprep.mubr.msk.f32.mxu0 %vm353_vm1, %v13865_v5  ;;  %v13874_v5 = vld [vmem:[#allocation27_spill] sm:$0xff] }
 0x513   : > { %10606 = vmatmul.mubr.msk.f32.vlgmr.msra.gmra.mrb[32].mxu0 %vm353_vm1, %v13866_v57  ;;  %v13875_v57 = vld [vmem:[#allocation29_spill] sm:$0xff] }
 0x514   : > { %10654 = vmatpush3.msk.msra.mxu0 %vm625_vm0, %v9035_v1  ;;  %10608 = vmatprep.mubr.msk.f32.mxu0 %vm353_vm1, %v13867_v11  ;;  %v13873_v1 = vld [vmem:[#allocation26_spill] sm:$0xff] }
 0x515   : > { %10703 = vmatprep.subr.msk.mxu0 %vm625_vm0, %v9069_v9 }
 0x517   : > { %10609 = vmatmul.mubr.msk.f32.gmra.mrb[34].mxu0 %vm353_vm1, %v13868_v14  ;;  %v13876_v14 = vld [vmem:[#allocation31_spill] sm:$0xff] }
 0x518   : > { %10611 = vmatprep.mubr.msk.f32.mxu0 %vm353_vm1, %v13869_v18  ;;  %v13877_v18 = vld [vmem:[#allocation12_spill] sm:$0xff] }
 0x51b   : > { %10612 = vmatmul.mubr.msk.f32.gmra.mrb[36].mxu0 %vm353_vm1, %v13870_v42  ;;  %v13878_v42 = vld [vmem:[#allocation13_spill] sm:$0xff] }
 0x51c   : > { %10614 = vmatprep.mubr.msk.f32.mxu0 %vm353_vm1, %v13871_v53  ;;  %v13879_v53 = vld [vmem:[#allocation14_spill] sm:$0xff] }
 0x51f   : > { %10615 = vmatmul.mubr.msk.f32.gmra.mrb[38].mxu0 %vm353_vm1, %v13872_v63  ;;  %v13880_v63 = vld [vmem:[#allocation15_spill] sm:$0xff] }
 0x520   : > { %10617 = vmatprep.mubr.msk.f32.mxu0 %vm353_vm1, %v13873_v1  ;;  %v13881_v1 = vld [vmem:[#allocation16_spill] sm:$0xff] }
 0x523   : > { %10618 = vmatmul.mubr.msk.f32.gmra.mrb[40].mxu0 %vm353_vm1, %v13874_v5  ;;  %v13882_v5 = vld [vmem:[#allocation17_spill] sm:$0xff] }
 0x524   : > { %10620 = vmatprep.mubr.msk.f32.mxu0 %vm353_vm1, %v13875_v57  ;;  %v13883_v57 = vld [vmem:[#allocation18_spill] sm:$0xff] }
 0x527   : > { %10621 = vmatmul.mubr.msk.f32.gmra.mrb[42].mxu0 %vm353_vm1, %v13876_v14  ;;  %v13884_v14 = vld [vmem:[#allocation19_spill] sm:$0xff] }
 0x528   : > { %10623 = vmatprep.mubr.msk.f32.mxu0 %vm353_vm1, %v13877_v18  ;;  %v13885_v18 = vld [vmem:[#allocation20_spill] sm:$0xff] }
 0x52b   : > { %10624 = vmatmul.mubr.msk.f32.gmra.mrb[44].mxu0 %vm353_vm1, %v13878_v42  ;;  %v13886_v42 = vld [vmem:[#allocation21_spill] sm:$0xff] }
 0x52c   : > { %10626 = vmatprep.mubr.msk.f32.mxu0 %vm353_vm1, %v13879_v53  ;;  %v13887_v53 = vld [vmem:[#allocation22_spill] sm:$0xff] }
 0x52f   : > { %10627 = vmatmul.mubr.msk.f32.gmra.mrb[46].mxu0 %vm353_vm1, %v13880_v63  ;;  %v13888_v63 = vld [vmem:[#allocation24_spill] sm:$0xff] }
 0x530   : > { %10629 = vmatprep.mubr.msk.f32.mxu0 %vm353_vm1, %v13881_v1  ;;  %v13889_v1 = vld [vmem:[#allocation28_spill] sm:$0xff] }
 0x533   : > { %10630 = vmatmul.mubr.msk.f32.gmra.mrb[48].mxu0 %vm353_vm1, %v13882_v5 }
 0x534   : > { %10632 = vmatprep.mubr.msk.f32.mxu0 %vm353_vm1, %v13883_v57  ;;  %v13890_v57 = vld [vmem:[#allocation30_spill] sm:$0xff] }
 0x537   : > { %10633 = vmatmul.mubr.msk.f32.gmra.mrb[50].mxu0 %vm353_vm1, %v13884_v14 }
 0x538   : > { %10635 = vmatprep.mubr.msk.f32.mxu0 %vm353_vm1, %v13885_v18 }
 0x53b   : > { %10636 = vmatmul.mubr.msk.f32.gmra.mrb[52].mxu0 %vm353_vm1, %v13886_v42 }
 0x53c   : > { %10638 = vmatprep.mubr.msk.f32.mxu0 %vm353_vm1, %v13887_v53  ;;  %v13342_v53 = vld [vmem:[#allocation3 + $0x182] sm:$0xff] }
 0x53f   : > { %10639 = vmatmul.mubr.msk.f32.gmra.mrb[54].mxu0 %vm353_vm1, %v13888_v63 }
 0x540   : > { %10641 = vmatprep.mubr.msk.f32.mxu0 %vm353_vm1, %v13889_v1  ;;  %v13346_v1 = vld [vmem:[#allocation3 + $0x18a] sm:$0xff] }
 0x543   : > { %10642 = vmatmul.mubr.msk.f32.gmra.mrb[56].mxu0 %vm353_vm1, %v13110_v50 }
 0x544   : > { %10644 = vmatprep.mubr.msk.f32.mxu0 %vm353_vm1, %v13890_v57 }
 0x547   : > { %10645 = vmatmul.mubr.msk.f32.gmra.mrb[58].mxu0 %vm353_vm1, %v13118_v33 }
 0x548   : > { %10647 = vmatprep.mubr.msk.f32.mxu0 %vm353_vm1, %v13122_v37  ;;  %v9103_v37 = vld [vmem:[%s13649_s7 + $0x20] sm:$0xf] }
 0x54b   : > { %10648 = vmatmul.mubr.msk.f32.gmra.mrb[60].mxu0 %vm353_vm1, %v13126_v12 }
 0x54c   : > { %10650 = vmatprep.mubr.msk.f32.mxu0 %vm353_vm1, %v13342_v53 }
 0x54f   : > { %10651 = vmatmul.mubr.msk.f32.gmra.mrb[62].mxu0 %vm353_vm1, %v13346_v1 }
 0x550   : > { %10655 = vmatprep.mubr.msk.f32.mxu0 %vm353_vm1, %v12887_v35  ;;  %v7138_v35 = vld [vmem:[#allocation3 + $0x198] sm:$0xff] }
 0x553   : > { %10656 = vmatmul.mubr.msk.f32.vlgmr.msra.gmra.mrb[32].mxu0 %vm353_vm1, %v12891_v7  ;;  %v7139_v7 = vld [vmem:[#allocation3 + $0x1a0] sm:$0xff] }
 0x554   : > { %10704 = vmatpush3.msk.msra.mxu0 %vm625_vm0, %v9069_v9  ;;  %10658 = vmatprep.mubr.msk.f32.mxu0 %vm353_vm1, %v12895_v44  ;;  %v7498_v44 = vld [vmem:[#allocation3 + $0x31] sm:$0xff] }
 0x555   : > { %10753 = vmatprep.subr.msk.mxu0 %vm625_vm0, %v9103_v37 }
 0x557   : > { %10659 = vmatmul.mubr.msk.f32.gmra.mrb[34].mxu0 %vm353_vm1, %v12899_v39  ;;  %v7499_v39 = vld [vmem:[#allocation3 + $0x39] sm:$0xff] }
 0x558   : > { %10661 = vmatprep.mubr.msk.f32.mxu0 %vm353_vm1, %v12903_v52  ;;  %v7500_v52 = vld [vmem:[#allocation3 + $0x49] sm:$0xff] }
 0x55b   : > { %10662 = vmatmul.mubr.msk.f32.gmra.mrb[36].mxu0 %vm353_vm1, %v12907_v61  ;;  %v7501_v61 = vld [vmem:[#allocation3 + $0x51] sm:$0xff] }
 0x55c   : > { %10664 = vmatprep.mubr.msk.f32.mxu0 %vm353_vm1, %v12911_v2  ;;  %v7502_v2 = vld [vmem:[#allocation3 + $0x61] sm:$0xff] }
 0x55f   : > { %10665 = vmatmul.mubr.msk.f32.gmra.mrb[38].mxu0 %vm353_vm1, %v12915_v10  ;;  %v7503_v10 = vld [vmem:[#allocation3 + $0x69] sm:$0xff] }
 0x560   : > { %10667 = vmatprep.mubr.msk.f32.mxu0 %vm353_vm1, %v12919_v4  ;;  %v7504_v4 = vld [vmem:[#allocation3 + $0x79] sm:$0xff] }
 0x563   : > { %10668 = vmatmul.mubr.msk.f32.gmra.mrb[40].mxu0 %vm353_vm1, %v12923_v17  ;;  %v7505_v17 = vld [vmem:[#allocation3 + $0x81] sm:$0xff] }
 0x564   : > { %10670 = vmatprep.mubr.msk.f32.mxu0 %vm353_vm1, %v12927_v27  ;;  %v7506_v27 = vld [vmem:[#allocation3 + $0x91] sm:$0xff] }
 0x567   : > { %10671 = vmatmul.mubr.msk.f32.gmra.mrb[42].mxu0 %vm353_vm1, %v12931_v31  ;;  %v7507_v31 = vld [vmem:[#allocation3 + $0x99] sm:$0xff] }
 0x568   : > { %10673 = vmatprep.mubr.msk.f32.mxu0 %vm353_vm1, %v12935_v41  ;;  %v13905_v41 = vld [vmem:[#allocation18_spill] sm:$0xff] }
 0x56b   : > { %10674 = vmatmul.mubr.msk.f32.gmra.mrb[44].mxu0 %vm353_vm1, %v12939_v46  ;;  %v13906_v46 = vld [vmem:[#allocation22_spill] sm:$0xff] }
 0x56c   : > { %10676 = vmatprep.mubr.msk.f32.mxu0 %vm353_vm1, %v12943_v15  ;;  %v13907_v15 = vld [vmem:[#allocation28_spill] sm:$0xff] }
 0x56f   : > { %10677 = vmatmul.mubr.msk.f32.gmra.mrb[46].mxu0 %vm353_vm1, %v12947_v20  ;;  %v13908_v20 = vld [vmem:[#allocation32_spill] sm:$0xff] }
 0x570   : > { %10679 = vmatprep.mubr.msk.f32.mxu0 %vm353_vm1, %v12951_v22  ;;  %v7918_v22 = vld [vmem:[#allocation3 + $0x19a] sm:$0xff] }
 0x573   : > { %10680 = vmatmul.mubr.msk.f32.gmra.mrb[48].mxu0 %vm353_vm1, %v12955_v23 }
 0x574   : > { %10682 = vmatprep.mubr.msk.f32.mxu0 %vm353_vm1, %v12959_v16 }
 0x577   : > { %10683 = vmatmul.mubr.msk.f32.gmra.mrb[50].mxu0 %vm353_vm1, %v12963_v26 }
 0x578   : > { %10685 = vmatprep.mubr.msk.f32.mxu0 %vm353_vm1, %v12967_v28 }
 0x57b   : > { %10686 = vmatmul.mubr.msk.f32.gmra.mrb[52].mxu0 %vm353_vm1, %v12971_v24 }
 0x57c   : > { %10688 = vmatprep.mubr.msk.f32.mxu0 %vm353_vm1, %v12975_v49 }
 0x57f   : > { %10689 = vmatmul.mubr.msk.f32.gmra.mrb[54].mxu0 %vm353_vm1, %v12979_v55 }
 0x580   : > { %10691 = vmatprep.mubr.msk.f32.mxu0 %vm353_vm1, %v12983_v58 }
 0x583   : > { %10692 = vmatmul.mubr.msk.f32.gmra.mrb[56].mxu0 %vm353_vm1, %v12987_v30 }
 0x584   : > { %10694 = vmatprep.mubr.msk.f32.mxu0 %vm353_vm1, %v12991_v34 }
 0x587   : > { %10695 = vmatmul.mubr.msk.f32.gmra.mrb[58].mxu0 %vm353_vm1, %v12995_v13 }
 0x588   : > { %10697 = vmatprep.mubr.msk.f32.mxu0 %vm353_vm1, %v13196_v54 }
 0x58b   : > { %10698 = vmatmul.mubr.msk.f32.gmra.mrb[60].mxu0 %vm353_vm1, %v13200_v8 }
 0x58c   : > { %10700 = vmatprep.mubr.msk.f32.mxu0 %vm353_vm1, %v7138_v35 }
 0x58f   : > { %10701 = vmatmul.mubr.msk.f32.gmra.mrb[62].mxu0 %vm353_vm1, %v7139_v7 }
 0x590   : > { %10705 = vmatprep.mubr.msk.f32.mxu0 %vm353_vm1, %v7498_v44 }
 0x593   : > { %10706 = vmatmul.mubr.msk.f32.vlgmr.msra.gmra.mrb[32].mxu0 %vm353_vm1, %v7499_v39 }
 0x594   : > { %10754 = vmatpush3.msk.msra.mxu0 %vm625_vm0, %v9103_v37  ;;  %10708 = vmatprep.mubr.msk.f32.mxu0 %vm353_vm1, %v7500_v52 }
 0x597   : > { %10709 = vmatmul.mubr.msk.f32.gmra.mrb[34].mxu0 %vm353_vm1, %v7501_v61 }
 0x598   : > { %10711 = vmatprep.mubr.msk.f32.mxu0 %vm353_vm1, %v7502_v2 }
 0x59b   : > { %10712 = vmatmul.mubr.msk.f32.gmra.mrb[36].mxu0 %vm353_vm1, %v7503_v10 }
 0x59c   : > { %10714 = vmatprep.mubr.msk.f32.mxu0 %vm353_vm1, %v7504_v4 }
 0x59f   : > { %10715 = vmatmul.mubr.msk.f32.gmra.mrb[38].mxu0 %vm353_vm1, %v7505_v17 }
 0x5a0   : > { %10717 = vmatprep.mubr.msk.f32.mxu0 %vm353_vm1, %v7506_v27 }
 0x5a3   : > { %10718 = vmatmul.mubr.msk.f32.gmra.mrb[40].mxu0 %vm353_vm1, %v7507_v31 }
 0x5a4   : > { %10720 = vmatprep.mubr.msk.f32.mxu0 %vm353_vm1, %v12768_v47  ;;  %v7528_v47 = vld [vmem:[#allocation3 + $0x199] sm:$0xff] }
 0x5a7   : > { %10721 = vmatmul.mubr.msk.f32.gmra.mrb[42].mxu0 %vm353_vm1, %v12774_v59  ;;  %v7529_v59 = vld [vmem:[#allocation3 + $0x1a1] sm:$0xff] }
 0x5a8   : > { %10723 = vmatprep.mubr.msk.f32.mxu0 %vm353_vm1, %v12780_v45  ;;  %v13891_v45 = vld [vmem:[#allocation9_spill] sm:$0xff] }
 0x5ab   : > { %10724 = vmatmul.mubr.msk.f32.gmra.mrb[44].mxu0 %vm353_vm1, %v12786_v60  ;;  %v13892_v60 = vld [vmem:[#allocation10_spill] sm:$0xff] }
 0x5ac   : > { %10726 = vmatprep.mubr.msk.f32.mxu0 %vm353_vm1, %v12792_v36  ;;  %v13893_v36 = vld [vmem:[#allocation11_spill] sm:$0xff] }
 0x5af   : > { %10727 = vmatmul.mubr.msk.f32.gmra.mrb[46].mxu0 %vm353_vm1, %v12798_v38  ;;  %v13894_v38 = vld [vmem:[#allocation23_spill] sm:$0xff] }
 0x5b0   : > { %10729 = vmatprep.mubr.msk.f32.mxu0 %vm353_vm1, %v12804_v3  ;;  %v13895_v3 = vld [vmem:[#allocation25_spill] sm:$0xff] }
 0x5b3   : > { %10730 = vmatmul.mubr.msk.f32.gmra.mrb[48].mxu0 %vm353_vm1, %v12810_v6  ;;  %v13896_v6 = vld [vmem:[#allocation26_spill] sm:$0xff] }
 0x5b4   : > { %10732 = vmatprep.mubr.msk.f32.mxu0 %vm353_vm1, %v12816_v0  ;;  %v13897_v0 = vld [vmem:[#allocation27_spill] sm:$0xff] }
 0x5b7   : > { %10733 = vmatmul.mubr.msk.f32.gmra.mrb[50].mxu0 %vm353_vm1, %v12822_v19  ;;  %v13898_v19 = vld [vmem:[#allocation29_spill] sm:$0xff] }
 0x5b8   : > { %10735 = vmatprep.mubr.msk.f32.mxu0 %vm353_vm1, %v12828_v29  ;;  %v13899_v29 = vld [vmem:[#allocation31_spill] sm:$0xff] }
 0x5bb   : > { %10736 = vmatmul.mubr.msk.f32.gmra.mrb[52].mxu0 %vm353_vm1, %v12834_v40  ;;  %v13900_v40 = vld [vmem:[#allocation12_spill] sm:$0xff] }
 0x5bc   : > { %10738 = vmatprep.mubr.msk.f32.mxu0 %vm353_vm1, %v12840_v32  ;;  %v13901_v32 = vld [vmem:[#allocation13_spill] sm:$0xff] }
 0x5bf   : > { %10739 = vmatmul.mubr.msk.f32.gmra.mrb[54].mxu0 %vm353_vm1, %v12846_v51  ;;  %v13902_v51 = vld [vmem:[#allocation14_spill] sm:$0xff] }
 0x5c0   : > { %10741 = vmatprep.mubr.msk.f32.mxu0 %vm353_vm1, %v12851_v25  ;;  %v13903_v25 = vld [vmem:[#allocation15_spill] sm:$0xff] }
 0x5c3   : > { %10742 = vmatmul.mubr.msk.f32.gmra.mrb[56].mxu0 %vm353_vm1, %v12856_v48  ;;  %v13904_v48 = vld [vmem:[#allocation16_spill] sm:$0xff] }
 0x5c4   : > { %10744 = vmatprep.mubr.msk.f32.mxu0 %vm353_vm1, %v13863_v62 }
 0x5c7   : > { %10745 = vmatmul.mubr.msk.f32.gmra.mrb[58].mxu0 %vm353_vm1, %v13864_v21 }
 0x5c8   : > { %10747 = vmatprep.mubr.msk.f32.mxu0 %vm353_vm1, %v13269_v43 }
 0x5cb   : > { %10748 = vmatmul.mubr.msk.f32.gmra.mrb[60].mxu0 %vm353_vm1, %v13273_v56 }
 0x5cc   : > { %10750 = vmatprep.mubr.msk.f32.mxu0 %vm353_vm1, %v7528_v47 }
 0x5cf   : > { %10751 = vmatmul.mubr.msk.f32.gmra.mrb[62].mxu0 %vm353_vm1, %v7529_v59 }
 0x5d0   : > { %10755 = vmatprep.mubr.msk.f32.mxu0 %vm353_vm1, %v13867_v11 }
 0x5d3   : > { %10756 = vmatmul.mubr.msk.f32.vlgmr.msra.gmra.mrb[32].mxu0 %vm353_vm1, %v13891_v45 }
 0x5d4   : > { %10758 = vmatprep.mubr.msk.f32.mxu0 %vm353_vm1, %v13892_v60 }
 0x5d7   : > { %10759 = vmatmul.mubr.msk.f32.gmra.mrb[34].mxu0 %vm353_vm1, %v13893_v36 }
 0x5d8   : > { %10761 = vmatprep.mubr.msk.f32.mxu0 %vm353_vm1, %v13894_v38 }
 0x5db   : > { %10762 = vmatmul.mubr.msk.f32.gmra.mrb[36].mxu0 %vm353_vm1, %v13895_v3 }
 0x5dc   : > { %10764 = vmatprep.mubr.msk.f32.mxu0 %vm353_vm1, %v13896_v6 }
 0x5df   : > { %10765 = vmatmul.mubr.msk.f32.gmra.mrb[38].mxu0 %vm353_vm1, %v13897_v0 }
 0x5e0   : > { %10767 = vmatprep.mubr.msk.f32.mxu0 %vm353_vm1, %v13898_v19 }
 0x5e3   : > { %10768 = vmatmul.mubr.msk.f32.gmra.mrb[40].mxu0 %vm353_vm1, %v13899_v29 }
 0x5e4   : > { %10770 = vmatprep.mubr.msk.f32.mxu0 %vm353_vm1, %v13900_v40 }
 0x5e7   : > { %10771 = vmatmul.mubr.msk.f32.gmra.mrb[42].mxu0 %vm353_vm1, %v13901_v32 }
 0x5e8   : > { %10773 = vmatprep.mubr.msk.f32.mxu0 %vm353_vm1, %v13902_v51 }
 0x5eb   : > { %10774 = vmatmul.mubr.msk.f32.gmra.mrb[44].mxu0 %vm353_vm1, %v13903_v25 }
 0x5ec   : > { %10776 = vmatprep.mubr.msk.f32.mxu0 %vm353_vm1, %v13904_v48 }
 0x5ef   : > { %10777 = vmatmul.mubr.msk.f32.gmra.mrb[46].mxu0 %vm353_vm1, %v13882_v5 }
 0x5f0   : > { %10779 = vmatprep.mubr.msk.f32.mxu0 %vm353_vm1, %v13905_v41 }
 0x5f3   : > { %10780 = vmatmul.mubr.msk.f32.gmra.mrb[48].mxu0 %vm353_vm1, %v13884_v14 }
 0x5f4   : > { %10782 = vmatprep.mubr.msk.f32.mxu0 %vm353_vm1, %v13885_v18 }
 0x5f7   : > { %10783 = vmatmul.mubr.msk.f32.gmra.mrb[50].mxu0 %vm353_vm1, %v13886_v42 }
 0x5f8   : > { %10785 = vmatprep.mubr.msk.f32.mxu0 %vm353_vm1, %v13906_v46 }
 0x5fb   : > { %10786 = vmatmul.mubr.msk.f32.gmra.mrb[52].mxu0 %vm353_vm1, %v13888_v63 }
 0x5fc   : > { %10788 = vmatprep.mubr.msk.f32.mxu0 %vm353_vm1, %v13907_v15 }
 0x5ff   : > { %10789 = vmatmul.mubr.msk.f32.gmra.mrb[54].mxu0 %vm353_vm1, %v13110_v50  ;;  %v7919_v50 = vld [vmem:[#allocation3 + $0x1a2] sm:$0xff] }
 0x600   : > { %10791 = vmatprep.mubr.msk.f32.mxu0 %vm353_vm1, %v13890_v57 }
 0x603   : > { %10792 = vmatmul.mubr.msk.f32.gmra.mrb[56].mxu0 %vm353_vm1, %v13118_v33  ;;  %v13535_v33 = vld [vmem:[%s13650_s8] ss:$0 sm:$0xff] }
 0x604   : > { %10794 = vmatprep.mubr.msk.f32.mxu0 %vm353_vm1, %v13908_v20 }
 0x607   : > { %10795 = vmatmul.mubr.msk.f32.gmra.mrb[58].mxu0 %vm353_vm1, %v13126_v12 }
 0x608   : > { %10797 = vmatprep.mubr.msk.f32.mxu0 %vm353_vm1, %v13342_v53 }
 0x60b   : > { %10798 = vmatmul.mubr.msk.f32.gmra.mrb[60].mxu0 %vm353_vm1, %v13346_v1 }
 0x60c   : > { %10800 = vmatprep.mubr.msk.f32.mxu0 %vm353_vm1, %v7918_v22 }
 0x60f   : > { %10801 = vmatmul.mubr.msk.f32.gmra.mrb[62].mxu0 %vm353_vm1, %v7919_v50 }
 0x6a6   : > { %v10757_v23 = vpop.f32.mrb[32].mxu0 }
 0x6a7   : > { %v8286_v16 = vadd.f32 %v10757_v23, %v13535_v33  ;;  %v8087_v26 = vpop.f32.mrb[33].mxu0 }
 0x6a8   : > { %v8285_v28 = vadd.f32 %v13535_v33, %v8087_v26 }
 0x6a9   : > { %v8318_v24 = vmax.f32 %v8286_v16, 0.0 }
 0x6aa   : > { %v8317_v49 = vmax.f32 %v8285_v28, 0.0  ;;  %v10760_v55 = vpop.f32.mrb[34].mxu0 }
 0x6ab   : > { %8350 = vst.msk [vmem:[%s13542_s28 + $0x8] sm:$0xff] %vm353_vm1, %v8318_v24  ;;  %v8288_v58 = vadd.f32 %v10760_v55, %v13535_v33  ;;  %v8097_v30 = vpop.f32.mrb[35].mxu0 }
 0x6ac   : > { %8349 = vst.msk [vmem:[%s13542_s28] sm:$0xff] %vm353_vm1, %v8317_v49  ;;  %v8287_v34 = vadd.f32 %v13535_v33, %v8097_v30 }
 0x6ad   : > { %v8320_v13 = vmax.f32 %v8288_v58, 0.0 }
 0x6ae   : > { %v8319_v37 = vmax.f32 %v8287_v34, 0.0  ;;  %v10763_v12 = vpop.f32.mrb[36].mxu0 }
 0x6af   : > { %8352 = vst.msk [vmem:[%s13542_s28 + $0x18] sm:$0xff] %vm353_vm1, %v8320_v13  ;;  %v8290_v54 = vadd.f32 %v10763_v12, %v13535_v33  ;;  %v8107_v8 = vpop.f32.mrb[37].mxu0 }
 0x6b0   : > { %8351 = vst.msk [vmem:[%s13542_s28 + $0x10] sm:$0xff] %vm353_vm1, %v8319_v37  ;;  %v8289_v62 = vadd.f32 %v13535_v33, %v8107_v8 }
 0x6b1   : > { %v8322_v21 = vmax.f32 %v8290_v54, 0.0 }
 0x6b2   : > { %v8321_v43 = vmax.f32 %v8289_v62, 0.0  ;;  %v10766_v56 = vpop.f32.mrb[38].mxu0 }
 0x6b3   : > { %8354 = vst.msk [vmem:[%s13542_s28 + $0x28] sm:$0xff] %vm353_vm1, %v8322_v21  ;;  %v8292_v9 = vadd.f32 %v10766_v56, %v13535_v33  ;;  %v8117_v11 = vpop.f32.mrb[39].mxu0 }
 0x6b4   : > { %8353 = vst.msk [vmem:[%s13542_s28 + $0x20] sm:$0xff] %vm353_vm1, %v8321_v43  ;;  %v8291_v14 = vadd.f32 %v13535_v33, %v8117_v11 }
 0x6b5   : > { %v8324_v18 = vmax.f32 %v8292_v9, 0.0 }
 0x6b6   : > { %v8323_v42 = vmax.f32 %v8291_v14, 0.0  ;;  %v10769_v53 = vpop.f32.mrb[40].mxu0 }
 0x6b7   : > { %8356 = vst.msk [vmem:[%s13542_s28 + $0x38] sm:$0xff] %vm353_vm1, %v8324_v18  ;;  %v8294_v63 = vadd.f32 %v10769_v53, %v13535_v33  ;;  %v8127_v1 = vpop.f32.mrb[41].mxu0 }
 0x6b8   : > { %8355 = vst.msk [vmem:[%s13542_s28 + $0x30] sm:$0xff] %vm353_vm1, %v8323_v42  ;;  %v8293_v5 = vadd.f32 %v13535_v33, %v8127_v1 }
 0x6b9   : > { %v8326_v57 = vmax.f32 %v8294_v63, 0.0 }
 0x6ba   : > { %v8325_v35 = vmax.f32 %v8293_v5, 0.0  ;;  %v10772_v7 = vpop.f32.mrb[42].mxu0 }
 0x6bb   : > { %8358 = vst.msk [vmem:[%s13542_s28 + $0x48] sm:$0xff] %vm353_vm1, %v8326_v57  ;;  %v8296_v44 = vadd.f32 %v10772_v7, %v13535_v33  ;;  %v8137_v39 = vpop.f32.mrb[43].mxu0 }
 0x6bc   : > { %8357 = vst.msk [vmem:[%s13542_s28 + $0x40] sm:$0xff] %vm353_vm1, %v8325_v35  ;;  %v8295_v52 = vadd.f32 %v13535_v33, %v8137_v39 }
 0x6bd   : > { %v8328_v61 = vmax.f32 %v8296_v44, 0.0 }
 0x6be   : > { %v8327_v2 = vmax.f32 %v8295_v52, 0.0  ;;  %v10775_v10 = vpop.f32.mrb[44].mxu0 }
 0x6bf   : > { %8360 = vst.msk [vmem:[%s13542_s28 + $0x58] sm:$0xff] %vm353_vm1, %v8328_v61  ;;  %v8298_v4 = vadd.f32 %v10775_v10, %v13535_v33  ;;  %v8147_v17 = vpop.f32.mrb[45].mxu0 }
 0x6c0   : > { %8359 = vst.msk [vmem:[%s13542_s28 + $0x50] sm:$0xff] %vm353_vm1, %v8327_v2  ;;  %v8297_v27 = vadd.f32 %v13535_v33, %v8147_v17 }
 0x6c1   : > { %v8330_v31 = vmax.f32 %v8298_v4, 0.0 }
 0x6c2   : > { %v8329_v47 = vmax.f32 %v8297_v27, 0.0  ;;  %v10778_v59 = vpop.f32.mrb[46].mxu0 }
 0x6c3   : > { %8362 = vst.msk [vmem:[%s13542_s28 + $0x68] sm:$0xff] %vm353_vm1, %v8330_v31  ;;  %v8300_v45 = vadd.f32 %v10778_v59, %v13535_v33  ;;  %v8157_v60 = vpop.f32.mrb[47].mxu0 }
 0x6c4   : > { %8361 = vst.msk [vmem:[%s13542_s28 + $0x60] sm:$0xff] %vm353_vm1, %v8329_v47  ;;  %v8299_v36 = vadd.f32 %v13535_v33, %v8157_v60 }
 0x6c5   : > { %v8332_v38 = vmax.f32 %v8300_v45, 0.0 }
 0x6c6   : > { %v8331_v3 = vmax.f32 %v8299_v36, 0.0  ;;  %v10781_v6 = vpop.f32.mrb[48].mxu0 }
 0x6c7   : > { %8364 = vst.msk [vmem:[%s13542_s28 + $0x78] sm:$0xff] %vm353_vm1, %v8332_v38  ;;  %v8302_v0 = vadd.f32 %v10781_v6, %v13535_v33  ;;  %v8167_v19 = vpop.f32.mrb[49].mxu0 }
 0x6c8   : > { %8363 = vst.msk [vmem:[%s13542_s28 + $0x70] sm:$0xff] %vm353_vm1, %v8331_v3  ;;  %v8301_v29 = vadd.f32 %v13535_v33, %v8167_v19 }
 0x6c9   : > { %v8334_v40 = vmax.f32 %v8302_v0, 0.0 }
 0x6ca   : > { %v8333_v32 = vmax.f32 %v8301_v29, 0.0  ;;  %v10784_v51 = vpop.f32.mrb[50].mxu0 }
 0x6cb   : > { %8366 = vst.msk [vmem:[%s13542_s28 + $0x88] sm:$0xff] %vm353_vm1, %v8334_v40  ;;  %v8304_v25 = vadd.f32 %v10784_v51, %v13535_v33  ;;  %v8177_v48 = vpop.f32.mrb[51].mxu0 }
 0x6cc   : > { %8365 = vst.msk [vmem:[%s13542_s28 + $0x80] sm:$0xff] %vm353_vm1, %v8333_v32  ;;  %v8303_v41 = vadd.f32 %v13535_v33, %v8177_v48 }
 0x6cd   : > { %v8336_v46 = vmax.f32 %v8304_v25, 0.0 }
 0x6ce   : > { %v8335_v15 = vmax.f32 %v8303_v41, 0.0  ;;  %v10787_v20 = vpop.f32.mrb[52].mxu0 }
 0x6cf   : > { %8368 = vst.msk [vmem:[%s13542_s28 + $0x98] sm:$0xff] %vm353_vm1, %v8336_v46  ;;  %v8306_v22 = vadd.f32 %v10787_v20, %v13535_v33  ;;  %v8187_v50 = vpop.f32.mrb[53].mxu0 }
 0x6d0   : > { %8367 = vst.msk [vmem:[%s13542_s28 + $0x90] sm:$0xff] %vm353_vm1, %v8335_v15  ;;  %v8305_v23 = vadd.f32 %v13535_v33, %v8187_v50 }
 0x6d1   : > { %v8338_v16 = vmax.f32 %v8306_v22, 0.0 }
 0x6d2   : > { %v8337_v26 = vmax.f32 %v8305_v23, 0.0  ;;  %v10790_v28 = vpop.f32.mrb[54].mxu0 }
 0x6d3   : > { %8370 = vst.msk [vmem:[%s13542_s28 + $0xa8] sm:$0xff] %vm353_vm1, %v8338_v16  ;;  %v8308_v24 = vadd.f32 %v10790_v28, %v13535_v33  ;;  %v8197_v49 = vpop.f32.mrb[55].mxu0 }
 0x6d4   : > { %8369 = vst.msk [vmem:[%s13542_s28 + $0xa0] sm:$0xff] %vm353_vm1, %v8337_v26  ;;  %v8307_v55 = vadd.f32 %v13535_v33, %v8197_v49 }
 0x6d5   : > { %v8340_v58 = vmax.f32 %v8308_v24, 0.0 }
 0x6d6   : > { %v8339_v30 = vmax.f32 %v8307_v55, 0.0  ;;  %v10793_v34 = vpop.f32.mrb[56].mxu0 }
 0x6d7   : > { %8372 = vst.msk [vmem:[%s13542_s28 + $0xb8] sm:$0xff] %vm353_vm1, %v8340_v58  ;;  %v8310_v13 = vadd.f32 %v10793_v34, %v13535_v33  ;;  %v8207_v37 = vpop.f32.mrb[57].mxu0 }
 0x6d8   : > { %8371 = vst.msk [vmem:[%s13542_s28 + $0xb0] sm:$0xff] %vm353_vm1, %v8339_v30  ;;  %v8309_v12 = vadd.f32 %v13535_v33, %v8207_v37 }
 0x6d9   : > { %v8342_v54 = vmax.f32 %v8310_v13, 0.0 }
 0x6da   : > { %v8341_v8 = vmax.f32 %v8309_v12, 0.0  ;;  %v10796_v62 = vpop.f32.mrb[58].mxu0 }
 0x6db   : > { %8374 = vst.msk [vmem:[%s13542_s28 + $0xc8] sm:$0xff] %vm353_vm1, %v8342_v54  ;;  %v8312_v21 = vadd.f32 %v10796_v62, %v13535_v33  ;;  %v8217_v43 = vpop.f32.mrb[59].mxu0 }
 0x6dc   : > { %8373 = vst.msk [vmem:[%s13542_s28 + $0xc0] sm:$0xff] %vm353_vm1, %v8341_v8  ;;  %v8311_v56 = vadd.f32 %v13535_v33, %v8217_v43 }
 0x6dd   : > { %v8344_v9 = vmax.f32 %v8312_v21, 0.0 }
 0x6de   : > { %v8343_v11 = vmax.f32 %v8311_v56, 0.0  ;;  %v10799_v14 = vpop.f32.mrb[60].mxu0 }
 0x6df   : > { %8376 = vst.msk [vmem:[%s13542_s28 + $0xd8] sm:$0xff] %vm353_vm1, %v8344_v9  ;;  %v8314_v18 = vadd.f32 %v10799_v14, %v13535_v33  ;;  %v8227_v42 = vpop.f32.mrb[61].mxu0 }
 0x6e0   : > { %8375 = vst.msk [vmem:[%s13542_s28 + $0xd0] sm:$0xff] %vm353_vm1, %v8343_v11  ;;  %v8313_v53 = vadd.f32 %v13535_v33, %v8227_v42 }
 0x6e1   : > { %v8346_v63 = vmax.f32 %v8314_v18, 0.0 }
 0x6e2   : > { %v8345_v1 = vmax.f32 %v8313_v53, 0.0  ;;  %v10802_v5 = vpop.f32.mrb[62].mxu0 }
 0x6e3   : > { %8378 = vst.msk [vmem:[%s13542_s28 + $0xe8] sm:$0xff] %vm353_vm1, %v8346_v63  ;;  %v8316_v57 = vadd.f32 %v10802_v5, %v13535_v33  ;;  %v8237_v35 = vpop.f32.mrb[63].mxu0 }
 0x6e4   : > { %8377 = vst.msk [vmem:[%s13542_s28 + $0xe0] sm:$0xff] %vm353_vm1, %v8345_v1  ;;  %v8315_v7 = vadd.f32 %v13535_v33, %v8237_v35 }
 0x6e5   : > { %v8348_v44 = vmax.f32 %v8316_v57, 0.0 }
 0x6e6   : > { %v8347_v39 = vmax.f32 %v8315_v7, 0.0 }
 0x6e7   : > { %8380 = vst.msk [vmem:[%s13542_s28 + $0xf8] sm:$0xff] %vm353_vm1, %v8348_v44 }
 0x6e8   : > { %8379 = vst.msk [vmem:[%s13542_s28 + $0xf0] sm:$0xff] %vm353_vm1, %v8347_v39 }
 0x6e9 PF: > { %s19_s30 = sadd.s32 1, %s11362_s30  }
 0x6ea   : > { %p16_p4 = scmp.ge.s32.totalorder %s19_s30, 4  }
 0x6ec   :  { %18 = sbr.rel (!%p16_p4) target bundleno = 1 (0x1), region = 109 }

</bundles_post_ra>
